<compile_context>
chip_gen: v6e
topology: v6e:2x2x1
jax: 0.10.0
libtpu: 0.0.40
codegen_flags: <defaults>
</compile_context>

<pallas_src>
import functools

import jax
import jax.numpy as jnp
from jax import lax
from jax.experimental import pallas as pl
from jax.experimental.pallas import tpu as pltpu


def _sigmoid(x):
    # One EUP push (tanh) instead of exp + reciprocal.
    return 0.5 * jnp.tanh(0.5 * x) + 0.5


def convlstm_kernel(p_ref, w_ref, b_ref, c_ref, h_out_ref, c_out_ref):
    # p_ref:  (Mblk, KKC)      bf16  im2col patches, quarter-interleaved rows
    # w_ref:  (KKC, 4*C_hid)   bf16  flattened HWIO conv weight (grid-resident)
    # b_ref:  (4, 4*C_hid)     f32   conv bias pre-packed to the lane layout
    # c_ref:  (Q, 4*C_hid)     f32   prev cell state, packed lane-dense
    # h_out_ref / c_out_ref: (Q, 4*C_hid) f32 packed lane-dense
    Q, G = c_ref.shape
    C = G // 4

    # Single full-depth MXU pass: bf16 operands, f32 accumulation.
    gates = jnp.dot(p_ref[...], w_ref[...], preferred_element_type=jnp.float32)

    # Rows of `gates` are quarter-interleaved: block-local row g*Q + r holds
    # the gate pre-activations of spatial position 4*r + g (the wrapper built
    # the patches that way), so regrouping each gate across the four row
    # quarters with a lane concat yields the packed (Q, 4*C_hid) layout of
    # c_ref and the outputs — every elementwise op and store is a dense
    # 128-lane vreg, every DMA is contiguous.
    #
    # The epilogue is chunked over packed rows: pack -> activate -> consume ->
    # store per chunk, bounding the number of live f32 vregs.
    CH = min(Q, 64)
    for r0 in range(0, Q, CH):
        def pack(col):
            # gate `col` for packed rows [r0, r0+CH), bias folded in.
            return jnp.concatenate(
                [gates[g * Q + r0:g * Q + r0 + CH, col * C:(col + 1) * C]
                 for g in range(4)],
                axis=-1) + b_ref[col:col + 1, :]

        # PyTorch chunk(4, dim=channel) ordering: in, remember, out, cell.
        in_gate = _sigmoid(pack(0))
        rem_gate = _sigmoid(pack(1))
        out_gate = _sigmoid(pack(2))
        cell_gate = jnp.tanh(pack(3))

        c_prev = c_ref[pl.ds(r0, CH), :]
        c_new = rem_gate * c_prev + in_gate * cell_gate
        h_new = out_gate * jnp.tanh(c_new)

        # Full-width (128-lane) stores, contiguous DMA back to HBM.
        c_out_ref[pl.ds(r0, CH), :] = c_new
        h_out_ref[pl.ds(r0, CH), :] = h_new


def _default_num_blocks():
    """2-way grid split only pays off on v7x (2 TensorCores per chip)."""
    try:
        kind = jax.devices()[0].device_kind.lower()
    except Exception:
        return 1
    return 2 if "v7" in kind else 1


@functools.partial(jax.jit, static_argnames=("num_blocks",))
def conv_lstm_2d(x_nhwc, prev_h, prev_c, w_hwio, bias, *, num_blocks=None):
    """One ConvLSTM2d step. Activations NHWC f32; weight HWIO; 3x3 'same' conv."""
    if num_blocks is None:
        num_blocks = _default_num_blocks()   # trace-time only

    B, H, W, C_in = x_nhwc.shape
    C_hid = prev_h.shape[-1]
    K = w_hwio.shape[0]
    pad = (K - 1) // 2
    C_tot = C_in + C_hid
    G = 4 * C_hid
    M = B * H * W
    KKC = K * K * C_tot

    assert W % 4 == 0, "W must be a multiple of 4 (quarter-interleaved packing)"
    assert M % (4 * num_blocks) == 0, "B*H*W must divide evenly into 4*num_blocks"
    Mblk = M // num_blocks
    Q = Mblk // 4
    assert Q % 8 == 0, "rows per block must keep sublane alignment"
    Wq = W // 4

    # ---- wrapper-side layout plumbing (single fused XLA pass) --------------
    # channel concat -> bf16 (MXU operand dtype) -> zero 'same' padding.
    stacked = jnp.concatenate([x_nhwc, prev_h], axis=-1).astype(jnp.bfloat16)
    xpad = jnp.pad(stacked, ((0, 0), (pad, pad), (pad, pad), (0, 0)))

    # im2col built DIRECTLY in quarter-interleaved row order (no separate
    # row-permutation HBM relayout): quarter g holds the spatial positions
    # with w % 4 == g (ordered by (b, h, w//4)), so block-local patch row
    # g*Q + r corresponds to spatial position 4*r + g and the kernel's packed
    # (Q, 4*C_hid) outputs come back in plain row-major order for free.
    def quarter(g):
        cols = []
        for ky in range(K):
            for kx in range(K):
                start = g + kx
                stop = start + 4 * (Wq - 1) + 1
                cols.append(xpad[:, ky:ky + H, start:stop:4, :])  # (B,H,Wq,C_tot)
        return jnp.concatenate(cols, axis=-1).reshape(num_blocks, Q, KKC)

    patches = jnp.stack([quarter(g) for g in range(4)], axis=1).reshape(M, KKC)

    # bf16 MXU operands, f32 accumulation / elementwise.
    w_flat = w_hwio.reshape(KKC, G).astype(jnp.bfloat16)
    # Bias pre-packed to the kernel's lane-dense layout: row `col` holds gate
    # `col`'s C_hid biases tiled across the four spatial lane-groups.
    b_packed = jnp.tile(bias.reshape(4, C_hid), (1, 4)).astype(jnp.float32)

    # Prev cell state in the lane-dense packed layout (free contiguous reshape).
    c_packed = prev_c.astype(jnp.float32).reshape(M // 4, G)

    # VMEM per block ~= 2*(Mblk*KKC*2B) + KKC*G*2B + 6*(Q*G*4B) ~= 1.1 MiB at
    # these shapes — far under the scoped limit on every chip generation.
    h_pk, c_pk = pl.pallas_call(
        convlstm_kernel,
        out_shape=(jax.ShapeDtypeStruct((M // 4, G), jnp.float32),
                   jax.ShapeDtypeStruct((M // 4, G), jnp.float32)),
        grid_spec=pltpu.PrefetchScalarGridSpec(
            num_scalar_prefetch=0,
            grid=(num_blocks,),
            in_specs=[
                pl.BlockSpec((Mblk, KKC), lambda m: (m, 0)),   # patches
                pl.BlockSpec((KKC, G), lambda m: (0, 0)),      # weight (resident)
                pl.BlockSpec((4, G), lambda m: (0, 0)),        # packed bias
                pl.BlockSpec((Q, G), lambda m: (m, 0)),        # prev cell (packed)
            ],
            out_specs=(
                pl.BlockSpec((Q, G), lambda m: (m, 0)),        # hidden (packed)
                pl.BlockSpec((Q, G), lambda m: (m, 0)),        # cell (packed)
            ),
        ),
        compiler_params=pltpu.CompilerParams(
            dimension_semantics=("parallel",)),                # 2 TCs on v7x only
    )(patches, w_flat, b_packed, c_packed)

    # Free reshapes back to NHWC (layout already row-major correct).
    return h_pk.reshape(B, H, W, C_hid), c_pk.reshape(B, H, W, C_hid)


def reference(x_nhwc, prev_h, prev_c, w_hwio, bias):
    """Pure-JAX f32 reference matching PyTorch semantics (for verification)."""
    C_hid = prev_h.shape[-1]
    stacked = jnp.concatenate([x_nhwc, prev_h], axis=-1)
    gates = lax.conv_general_dilated(
        stacked, w_hwio, window_strides=(1, 1), padding="SAME",
        dimension_numbers=("NHWC", "HWIO", "NHWC")) + bias
    i = jax.nn.sigmoid(gates[..., 0 * C_hid:1 * C_hid])
    r = jax.nn.sigmoid(gates[..., 1 * C_hid:2 * C_hid])
    o = jax.nn.sigmoid(gates[..., 2 * C_hid:3 * C_hid])
    g = jnp.tanh(gates[..., 3 * C_hid:4 * C_hid])
    c = r * prev_c + i * g
    h = o * jnp.tanh(c)
    return h, c


if __name__ == "__main__":
    B, C_in, C_hid, H, W, K = 2, 4, 32, 16, 16, 3

    key = jax.random.PRNGKey(0)
    k_x, k_h, k_c, k_w, k_b = jax.random.split(key, 5)

    # PyTorch ConvLSTM2d inputs are NCHW; generate NCHW then transpose to NHWC.
    x_nchw = jax.random.normal(k_x, (B, C_in, H, W), jnp.float32)
    h_nchw = jax.random.normal(k_h, (B, C_hid, H, W), jnp.float32)
    c_nchw = jax.random.normal(k_c, (B, C_hid, H, W), jnp.float32)
    x = jnp.transpose(x_nchw, (0, 2, 3, 1))
    prev_h = jnp.transpose(h_nchw, (0, 2, 3, 1))
    prev_c = jnp.transpose(c_nchw, (0, 2, 3, 1))

    # Deterministic Conv2d params: PyTorch default uniform(-1/sqrt(fan_in), +).
    C_tot = C_in + C_hid
    fan_in = C_tot * K * K
    bound = 1.0 / jnp.sqrt(jnp.float32(fan_in))
    w_oihw = jax.random.uniform(k_w, (4 * C_hid, C_tot, K, K), jnp.float32,
                                minval=-bound, maxval=bound)
    bias = jax.random.uniform(k_b, (4 * C_hid,), jnp.float32,
                              minval=-bound, maxval=bound)
    w_hwio = jnp.transpose(w_oihw, (2, 3, 1, 0))   # OIHW -> HWIO

    h_out, c_out = conv_lstm_2d(x, prev_h, prev_c, w_hwio, bias)
    jax.block_until_ready((h_out, c_out))

    h_exp, c_exp = reference(x, prev_h, prev_c, w_hwio, bias)
    # Tolerance accounts for bf16 MXU operands (f32 accumulation / elementwise).
    assert jnp.allclose(h_out, h_exp, atol=3e-2, rtol=3e-2)
    assert jnp.allclose(c_out, c_exp, atol=3e-2, rtol=3e-2)

    print("KERNEL_OK")
</pallas_src>

<mosaic_0001>
module attributes {stable_mosaic.version = 11 : i64} {
  func.func @convlstm_kernel(%arg0: i32, %arg1: memref<512x324xbf16, #tpu.memory_space<vmem>>, %arg2: memref<324x128xbf16, #tpu.memory_space<vmem>>, %arg3: memref<4x128xf32, #tpu.memory_space<vmem>>, %arg4: memref<128x128xf32, #tpu.memory_space<vmem>>, %arg5: memref<128x128xf32, #tpu.memory_space<vmem>>, %arg6: memref<128x128xf32, #tpu.memory_space<vmem>>) attributes {dimension_semantics = [#tpu.dimension_semantics<parallel>], iteration_bounds = array<i64: 1>, scalar_prefetch = 0 : i64, scratch_operands = 0 : i64, tpu.core_type = #tpu.core_type<tc>, window_params = [{transform_indices = @transform_0, window_bounds = array<i64: 512, 324>}, {pipeline_mode = #tpu.pipeline_mode<synchronous>, transform_indices = @transform_1, window_bounds = array<i64: 324, 128>}, {pipeline_mode = #tpu.pipeline_mode<synchronous>, transform_indices = @transform_2, window_bounds = array<i64: 4, 128>}, {transform_indices = @transform_3, window_bounds = array<i64: 128, 128>}, {transform_indices = @transform_4, window_bounds = array<i64: 128, 128>}, {transform_indices = @transform_5, window_bounds = array<i64: 128, 128>}]} {
    %c0 = arith.constant 0 : index
    %c0_0 = arith.constant 0 : index
    %0 = vector.load %arg1[%c0, %c0_0] : memref<512x324xbf16, #tpu.memory_space<vmem>>, vector<512x324xbf16>
    %c0_1 = arith.constant 0 : index
    %c0_2 = arith.constant 0 : index
    %1 = vector.load %arg2[%c0_1, %c0_2] : memref<324x128xbf16, #tpu.memory_space<vmem>>, vector<324x128xbf16>
    %cst = arith.constant dense<0.000000e+00> : vector<512x128xf32>
    %2 = tpu.matmul %0, %1, %cst {dimension_numbers = #tpu.dot_dimension_numbers<[1], [0], [0], [1], [0, 0, 1, 1], [], []>} : vector<512x324xbf16>, vector<324x128xbf16>, vector<512x128xf32> -> vector<512x128xf32>
    %3 = vector.extract_strided_slice %2 {offsets = [0, 0], sizes = [64, 32], strides = [1, 1]} : vector<512x128xf32> to vector<64x32xf32>
    %4 = vector.extract_strided_slice %2 {offsets = [128, 0], sizes = [64, 32], strides = [1, 1]} : vector<512x128xf32> to vector<64x32xf32>
    %5 = vector.extract_strided_slice %2 {offsets = [256, 0], sizes = [64, 32], strides = [1, 1]} : vector<512x128xf32> to vector<64x32xf32>
    %6 = vector.extract_strided_slice %2 {offsets = [384, 0], sizes = [64, 32], strides = [1, 1]} : vector<512x128xf32> to vector<64x32xf32>
    %7 = tpu.concatenate %3, %4, %5, %6 in 1 : vector<64x32xf32>, vector<64x32xf32>, vector<64x32xf32>, vector<64x32xf32> -> vector<64x128xf32>
    %c0_3 = arith.constant 0 : index
    %c0_4 = arith.constant 0 : index
    %8 = vector.load %arg3[%c0_3, %c0_4] : memref<4x128xf32, #tpu.memory_space<vmem>>, vector<1x128xf32>
    %9 = vector.broadcast %8 : vector<1x128xf32> to vector<64x128xf32>
    %10 = arith.addf %7, %9 : vector<64x128xf32>
    %cst_5 = arith.constant 5.000000e-01 : f32
    %11 = vector.broadcast %cst_5 : f32 to vector<64x128xf32>
    %12 = arith.mulf %11, %10 : vector<64x128xf32>
    %13 = math.tanh %12 : vector<64x128xf32>
    %cst_6 = arith.constant 5.000000e-01 : f32
    %14 = vector.broadcast %cst_6 : f32 to vector<64x128xf32>
    %15 = arith.mulf %14, %13 : vector<64x128xf32>
    %cst_7 = arith.constant 5.000000e-01 : f32
    %16 = vector.broadcast %cst_7 : f32 to vector<64x128xf32>
    %17 = arith.addf %15, %16 : vector<64x128xf32>
    %18 = vector.extract_strided_slice %2 {offsets = [0, 32], sizes = [64, 32], strides = [1, 1]} : vector<512x128xf32> to vector<64x32xf32>
    %19 = vector.extract_strided_slice %2 {offsets = [128, 32], sizes = [64, 32], strides = [1, 1]} : vector<512x128xf32> to vector<64x32xf32>
    %20 = vector.extract_strided_slice %2 {offsets = [256, 32], sizes = [64, 32], strides = [1, 1]} : vector<512x128xf32> to vector<64x32xf32>
    %21 = vector.extract_strided_slice %2 {offsets = [384, 32], sizes = [64, 32], strides = [1, 1]} : vector<512x128xf32> to vector<64x32xf32>
    %22 = tpu.concatenate %18, %19, %20, %21 in 1 : vector<64x32xf32>, vector<64x32xf32>, vector<64x32xf32>, vector<64x32xf32> -> vector<64x128xf32>
    %c1 = arith.constant 1 : index
    %c0_8 = arith.constant 0 : index
    %23 = vector.load %arg3[%c1, %c0_8] : memref<4x128xf32, #tpu.memory_space<vmem>>, vector<1x128xf32>
    %24 = vector.broadcast %23 : vector<1x128xf32> to vector<64x128xf32>
    %25 = arith.addf %22, %24 : vector<64x128xf32>
    %cst_9 = arith.constant 5.000000e-01 : f32
    %26 = vector.broadcast %cst_9 : f32 to vector<64x128xf32>
    %27 = arith.mulf %26, %25 : vector<64x128xf32>
    %28 = math.tanh %27 : vector<64x128xf32>
    %cst_10 = arith.constant 5.000000e-01 : f32
    %29 = vector.broadcast %cst_10 : f32 to vector<64x128xf32>
    %30 = arith.mulf %29, %28 : vector<64x128xf32>
    %cst_11 = arith.constant 5.000000e-01 : f32
    %31 = vector.broadcast %cst_11 : f32 to vector<64x128xf32>
    %32 = arith.addf %30, %31 : vector<64x128xf32>
    %33 = vector.extract_strided_slice %2 {offsets = [0, 64], sizes = [64, 32], strides = [1, 1]} : vector<512x128xf32> to vector<64x32xf32>
    %34 = vector.extract_strided_slice %2 {offsets = [128, 64], sizes = [64, 32], strides = [1, 1]} : vector<512x128xf32> to vector<64x32xf32>
    %35 = vector.extract_strided_slice %2 {offsets = [256, 64], sizes = [64, 32], strides = [1, 1]} : vector<512x128xf32> to vector<64x32xf32>
    %36 = vector.extract_strided_slice %2 {offsets = [384, 64], sizes = [64, 32], strides = [1, 1]} : vector<512x128xf32> to vector<64x32xf32>
    %37 = tpu.concatenate %33, %34, %35, %36 in 1 : vector<64x32xf32>, vector<64x32xf32>, vector<64x32xf32>, vector<64x32xf32> -> vector<64x128xf32>
    %c2 = arith.constant 2 : index
    %c0_12 = arith.constant 0 : index
    %38 = vector.load %arg3[%c2, %c0_12] : memref<4x128xf32, #tpu.memory_space<vmem>>, vector<1x128xf32>
    %39 = vector.broadcast %38 : vector<1x128xf32> to vector<64x128xf32>
    %40 = arith.addf %37, %39 : vector<64x128xf32>
    %cst_13 = arith.constant 5.000000e-01 : f32
    %41 = vector.broadcast %cst_13 : f32 to vector<64x128xf32>
    %42 = arith.mulf %41, %40 : vector<64x128xf32>
    %43 = math.tanh %42 : vector<64x128xf32>
    %cst_14 = arith.constant 5.000000e-01 : f32
    %44 = vector.broadcast %cst_14 : f32 to vector<64x128xf32>
    %45 = arith.mulf %44, %43 : vector<64x128xf32>
    %cst_15 = arith.constant 5.000000e-01 : f32
    %46 = vector.broadcast %cst_15 : f32 to vector<64x128xf32>
    %47 = arith.addf %45, %46 : vector<64x128xf32>
    %48 = vector.extract_strided_slice %2 {offsets = [0, 96], sizes = [64, 32], strides = [1, 1]} : vector<512x128xf32> to vector<64x32xf32>
    %49 = vector.extract_strided_slice %2 {offsets = [128, 96], sizes = [64, 32], strides = [1, 1]} : vector<512x128xf32> to vector<64x32xf32>
    %50 = vector.extract_strided_slice %2 {offsets = [256, 96], sizes = [64, 32], strides = [1, 1]} : vector<512x128xf32> to vector<64x32xf32>
    %51 = vector.extract_strided_slice %2 {offsets = [384, 96], sizes = [64, 32], strides = [1, 1]} : vector<512x128xf32> to vector<64x32xf32>
    %52 = tpu.concatenate %48, %49, %50, %51 in 1 : vector<64x32xf32>, vector<64x32xf32>, vector<64x32xf32>, vector<64x32xf32> -> vector<64x128xf32>
    %c3 = arith.constant 3 : index
    %c0_16 = arith.constant 0 : index
    %53 = vector.load %arg3[%c3, %c0_16] : memref<4x128xf32, #tpu.memory_space<vmem>>, vector<1x128xf32>
    %54 = vector.broadcast %53 : vector<1x128xf32> to vector<64x128xf32>
    %55 = arith.addf %52, %54 : vector<64x128xf32>
    %56 = math.tanh %55 : vector<64x128xf32>
    %c0_17 = arith.constant 0 : index
    %c0_18 = arith.constant 0 : index
    %57 = vector.load %arg4[%c0_17, %c0_18] : memref<128x128xf32, #tpu.memory_space<vmem>>, vector<64x128xf32>
    %58 = arith.mulf %32, %57 : vector<64x128xf32>
    %59 = arith.mulf %17, %56 : vector<64x128xf32>
    %60 = arith.addf %58, %59 : vector<64x128xf32>
    %61 = math.tanh %60 : vector<64x128xf32>
    %62 = arith.mulf %47, %61 : vector<64x128xf32>
    %c0_19 = arith.constant 0 : index
    %c0_20 = arith.constant 0 : index
    %63 = vector.load %arg6[%c0_19, %c0_20] : memref<128x128xf32, #tpu.memory_space<vmem>>, vector<64x128xf32>
    tpu.vector_store %arg6[%c0_19, %c0_20], %60 {strides = array<i32>} : memref<128x128xf32, #tpu.memory_space<vmem>>, vector<64x128xf32>,
    %c0_21 = arith.constant 0 : index
    %c0_22 = arith.constant 0 : index
    %64 = vector.load %arg5[%c0_21, %c0_22] : memref<128x128xf32, #tpu.memory_space<vmem>>, vector<64x128xf32>
    tpu.vector_store %arg5[%c0_21, %c0_22], %62 {strides = array<i32>} : memref<128x128xf32, #tpu.memory_space<vmem>>, vector<64x128xf32>,
    %65 = vector.extract_strided_slice %2 {offsets = [64, 0], sizes = [64, 32], strides = [1, 1]} : vector<512x128xf32> to vector<64x32xf32>
    %66 = vector.extract_strided_slice %2 {offsets = [192, 0], sizes = [64, 32], strides = [1, 1]} : vector<512x128xf32> to vector<64x32xf32>
    %67 = vector.extract_strided_slice %2 {offsets = [320, 0], sizes = [64, 32], strides = [1, 1]} : vector<512x128xf32> to vector<64x32xf32>
    %68 = vector.extract_strided_slice %2 {offsets = [448, 0], sizes = [64, 32], strides = [1, 1]} : vector<512x128xf32> to vector<64x32xf32>
    %69 = tpu.concatenate %65, %66, %67, %68 in 1 : vector<64x32xf32>, vector<64x32xf32>, vector<64x32xf32>, vector<64x32xf32> -> vector<64x128xf32>
    %c0_23 = arith.constant 0 : index
    %c0_24 = arith.constant 0 : index
    %70 = vector.load %arg3[%c0_23, %c0_24] : memref<4x128xf32, #tpu.memory_space<vmem>>, vector<1x128xf32>
    %71 = vector.broadcast %70 : vector<1x128xf32> to vector<64x128xf32>
    %72 = arith.addf %69, %71 : vector<64x128xf32>
    %cst_25 = arith.constant 5.000000e-01 : f32
    %73 = vector.broadcast %cst_25 : f32 to vector<64x128xf32>
    %74 = arith.mulf %73, %72 : vector<64x128xf32>
    %75 = math.tanh %74 : vector<64x128xf32>
    %cst_26 = arith.constant 5.000000e-01 : f32
    %76 = vector.broadcast %cst_26 : f32 to vector<64x128xf32>
    %77 = arith.mulf %76, %75 : vector<64x128xf32>
    %cst_27 = arith.constant 5.000000e-01 : f32
    %78 = vector.broadcast %cst_27 : f32 to vector<64x128xf32>
    %79 = arith.addf %77, %78 : vector<64x128xf32>
    %80 = vector.extract_strided_slice %2 {offsets = [64, 32], sizes = [64, 32], strides = [1, 1]} : vector<512x128xf32> to vector<64x32xf32>
    %81 = vector.extract_strided_slice %2 {offsets = [192, 32], sizes = [64, 32], strides = [1, 1]} : vector<512x128xf32> to vector<64x32xf32>
    %82 = vector.extract_strided_slice %2 {offsets = [320, 32], sizes = [64, 32], strides = [1, 1]} : vector<512x128xf32> to vector<64x32xf32>
    %83 = vector.extract_strided_slice %2 {offsets = [448, 32], sizes = [64, 32], strides = [1, 1]} : vector<512x128xf32> to vector<64x32xf32>
    %84 = tpu.concatenate %80, %81, %82, %83 in 1 : vector<64x32xf32>, vector<64x32xf32>, vector<64x32xf32>, vector<64x32xf32> -> vector<64x128xf32>
    %c1_28 = arith.constant 1 : index
    %c0_29 = arith.constant 0 : index
    %85 = vector.load %arg3[%c1_28, %c0_29] : memref<4x128xf32, #tpu.memory_space<vmem>>, vector<1x128xf32>
    %86 = vector.broadcast %85 : vector<1x128xf32> to vector<64x128xf32>
    %87 = arith.addf %84, %86 : vector<64x128xf32>
    %cst_30 = arith.constant 5.000000e-01 : f32
    %88 = vector.broadcast %cst_30 : f32 to vector<64x128xf32>
    %89 = arith.mulf %88, %87 : vector<64x128xf32>
    %90 = math.tanh %89 : vector<64x128xf32>
    %cst_31 = arith.constant 5.000000e-01 : f32
    %91 = vector.broadcast %cst_31 : f32 to vector<64x128xf32>
    %92 = arith.mulf %91, %90 : vector<64x128xf32>
    %cst_32 = arith.constant 5.000000e-01 : f32
    %93 = vector.broadcast %cst_32 : f32 to vector<64x128xf32>
    %94 = arith.addf %92, %93 : vector<64x128xf32>
    %95 = vector.extract_strided_slice %2 {offsets = [64, 64], sizes = [64, 32], strides = [1, 1]} : vector<512x128xf32> to vector<64x32xf32>
    %96 = vector.extract_strided_slice %2 {offsets = [192, 64], sizes = [64, 32], strides = [1, 1]} : vector<512x128xf32> to vector<64x32xf32>
    %97 = vector.extract_strided_slice %2 {offsets = [320, 64], sizes = [64, 32], strides = [1, 1]} : vector<512x128xf32> to vector<64x32xf32>
    %98 = vector.extract_strided_slice %2 {offsets = [448, 64], sizes = [64, 32], strides = [1, 1]} : vector<512x128xf32> to vector<64x32xf32>
    %99 = tpu.concatenate %95, %96, %97, %98 in 1 : vector<64x32xf32>, vector<64x32xf32>, vector<64x32xf32>, vector<64x32xf32> -> vector<64x128xf32>
    %c2_33 = arith.constant 2 : index
    %c0_34 = arith.constant 0 : index
    %100 = vector.load %arg3[%c2_33, %c0_34] : memref<4x128xf32, #tpu.memory_space<vmem>>, vector<1x128xf32>
    %101 = vector.broadcast %100 : vector<1x128xf32> to vector<64x128xf32>
    %102 = arith.addf %99, %101 : vector<64x128xf32>
    %cst_35 = arith.constant 5.000000e-01 : f32
    %103 = vector.broadcast %cst_35 : f32 to vector<64x128xf32>
    %104 = arith.mulf %103, %102 : vector<64x128xf32>
    %105 = math.tanh %104 : vector<64x128xf32>
    %cst_36 = arith.constant 5.000000e-01 : f32
    %106 = vector.broadcast %cst_36 : f32 to vector<64x128xf32>
    %107 = arith.mulf %106, %105 : vector<64x128xf32>
    %cst_37 = arith.constant 5.000000e-01 : f32
    %108 = vector.broadcast %cst_37 : f32 to vector<64x128xf32>
    %109 = arith.addf %107, %108 : vector<64x128xf32>
    %110 = vector.extract_strided_slice %2 {offsets = [64, 96], sizes = [64, 32], strides = [1, 1]} : vector<512x128xf32> to vector<64x32xf32>
    %111 = vector.extract_strided_slice %2 {offsets = [192, 96], sizes = [64, 32], strides = [1, 1]} : vector<512x128xf32> to vector<64x32xf32>
    %112 = vector.extract_strided_slice %2 {offsets = [320, 96], sizes = [64, 32], strides = [1, 1]} : vector<512x128xf32> to vector<64x32xf32>
    %113 = vector.extract_strided_slice %2 {offsets = [448, 96], sizes = [64, 32], strides = [1, 1]} : vector<512x128xf32> to vector<64x32xf32>
    %114 = tpu.concatenate %110, %111, %112, %113 in 1 : vector<64x32xf32>, vector<64x32xf32>, vector<64x32xf32>, vector<64x32xf32> -> vector<64x128xf32>
    %c3_38 = arith.constant 3 : index
    %c0_39 = arith.constant 0 : index
    %115 = vector.load %arg3[%c3_38, %c0_39] : memref<4x128xf32, #tpu.memory_space<vmem>>, vector<1x128xf32>
    %116 = vector.broadcast %115 : vector<1x128xf32> to vector<64x128xf32>
    %117 = arith.addf %114, %116 : vector<64x128xf32>
    %118 = math.tanh %117 : vector<64x128xf32>
    %c64 = arith.constant 64 : index
    %c0_40 = arith.constant 0 : index
    %119 = vector.load %arg4[%c64, %c0_40] : memref<128x128xf32, #tpu.memory_space<vmem>>, vector<64x128xf32>
    %120 = arith.mulf %94, %119 : vector<64x128xf32>
    %121 = arith.mulf %79, %118 : vector<64x128xf32>
    %122 = arith.addf %120, %121 : vector<64x128xf32>
    %123 = math.tanh %122 : vector<64x128xf32>
    %124 = arith.mulf %109, %123 : vector<64x128xf32>
    %c64_41 = arith.constant 64 : index
    %c0_42 = arith.constant 0 : index
    %125 = vector.load %arg6[%c64_41, %c0_42] : memref<128x128xf32, #tpu.memory_space<vmem>>, vector<64x128xf32>
    tpu.vector_store %arg6[%c64_41, %c0_42], %122 {strides = array<i32>} : memref<128x128xf32, #tpu.memory_space<vmem>>, vector<64x128xf32>,
    %c64_43 = arith.constant 64 : index
    %c0_44 = arith.constant 0 : index
    %126 = vector.load %arg5[%c64_43, %c0_44] : memref<128x128xf32, #tpu.memory_space<vmem>>, vector<64x128xf32>
    tpu.vector_store %arg5[%c64_43, %c0_44], %124 {strides = array<i32>} : memref<128x128xf32, #tpu.memory_space<vmem>>, vector<64x128xf32>,
    return
  }
  func.func @transform_0(%arg0: i32) -> (i32, i32) {
    %c0_i32 = arith.constant 0 : i32
    %c0_i32_0 = arith.constant 0 : i32
    return %arg0, %c0_i32 : i32, i32
  }
  func.func @transform_1(%arg0: i32) -> (i32, i32) {
    %c0_i32 = arith.constant 0 : i32
    %c0_i32_0 = arith.constant 0 : i32
    %c0_i32_1 = arith.constant 0 : i32
    return %c0_i32, %c0_i32_0 : i32, i32
  }
  func.func @transform_2(%arg0: i32) -> (i32, i32) {
    %c0_i32 = arith.constant 0 : i32
    %c0_i32_0 = arith.constant 0 : i32
    %c0_i32_1 = arith.constant 0 : i32
    return %c0_i32, %c0_i32_0 : i32, i32
  }
  func.func @transform_3(%arg0: i32) -> (i32, i32) {
    %c0_i32 = arith.constant 0 : i32
    %c0_i32_0 = arith.constant 0 : i32
    return %arg0, %c0_i32 : i32, i32
  }
  func.func @transform_4(%arg0: i32) -> (i32, i32) {
    %c0_i32 = arith.constant 0 : i32
    %c0_i32_0 = arith.constant 0 : i32
    return %arg0, %c0_i32 : i32, i32
  }
  func.func @transform_5(%arg0: i32) -> (i32, i32) {
    %c0_i32 = arith.constant 0 : i32
    %c0_i32_0 = arith.constant 0 : i32
    return %arg0, %c0_i32 : i32, i32
  }
}

</mosaic_0001>

<bundles_post_ra>
// kernel: tile.7
= control target key start
LH: loop header
LB: loop body
LE: loop exit
PB: predicated region body
PF: predicated region fallthrough
CT: control target
= control target key end

     0   :  { %vm22_vm0 = vcmask 261120   ;;  %s59_s14 = smov 32   ;;  %s60_s15 = smov 64   ;;  %vm28_vm1 = vcmask 1048320   ;;  %vm34_vm2 = vcmask 785920   ;;  %vm40_vm3 = vcmask 523520   ;;  %s86_s0 = inlined_call_operand.vmem [shape: f32[4,4,32], index: 0, kind: input, shape index: {}]   ;;  %s87_s1 = inlined_call_operand.vmem [shape: f32[4,128], index: 1, kind: output, shape index: {}]  }
   0x1   :  { %v52_v0 = vld [vmem:[%s86_s0 + $0xc] sm:$0xf]  ;;  %v53_v1 = vld [vmem:[%s86_s0 + $0x8] sm:$0xf]  ;;  %v54_v2 = vld [vmem:[%s86_s0 + $0x4] sm:$0xf] }
   0x2   :  { %9 = vst [vmem:[#allocation1 + $0x18] sm:$0xf] %v52_v0  ;;  %14 = vst [vmem:[#allocation1 + $0x10] sm:$0xf] %v53_v1  ;;  %v19_v3 = vld [vmem:[%s86_s0] sm:$0xf] }
   0x3   :  { %18 = vst [vmem:[#allocation1 + $0x8] sm:$0xf] %v54_v2  ;;  %20 = vst [vmem:[#allocation1] sm:$0xf] %v19_v3  ;;  %s58_s0 = smov 96  }
   0xa   :  { %v25_v4 = vld [vmem:[#allocation1 + $0x3] ss:$8 sm:$0xf]   ;;  %v37_v5 = vld [vmem:[#allocation1 + $0x1] ss:$8 sm:$0xf]  }
   0xb   :  { %26 = vrot.lane.b32.xlu0 %v25_v4, %s58_s0  ;;  %v21_v6 = vld [vmem:[#allocation1] ss:$8 sm:$0xf]   ;;  %v31_v7 = vld [vmem:[#allocation1 + $0x2] ss:$8 sm:$0xf]   ;;  %38 = vrot.lane.b32.xlu1 %v37_v5, %s59_s14 }
   0xc   :  { %23 = vst.msk [vmem:[#allocation0] sm:$0xf] %vm22_vm0, %v21_v6  }
   0xf   :  { %32 = vrot.lane.b32.xlu0 %v31_v7, %s60_s15 }
  0x7d   :  { %v27_v8 = vpop.permute.xlu0 %26   ;;  %v39_v9 = vpop.permute.xlu1 %38  }
  0x7e   :  { %29 = vst.msk [vmem:[#allocation0] sm:$0xf] %vm28_vm1, %v27_v8  }
  0x81   :  { %v33_v10 = vpop.permute.xlu0 %32  }
  0x82   :  { %35 = vst.msk [vmem:[#allocation0] sm:$0xf] %vm34_vm2, %v33_v10  }
  0x83   :  { %41 = vst.msk [vmem:[#allocation0] sm:$0xf] %vm40_vm3, %v39_v9  }
  0x8a   :  { %v46_v11 = vld [vmem:[#allocation0] sm:$0xf] }
  0x8b   :  { %49 = vst [vmem:[%s87_s1] sm:$0xf] %v46_v11 }

// kernel: conv_lstm_2d.1
= control target key start
LH: loop header
LB: loop body
LE: loop exit
PB: predicated region body
PF: predicated region fallthrough
CT: control target
= control target key end

     0   :  { %v3372_v0 = vmov 0   ;;  %vm889_vm0 = vcmask 1041408   ;;  %vm792_vm1 = vcmask 556032   ;;  %s3374_s20 = smov 64   ;;  %s3375_s21 = smov 32   ;;  %vm1567_vm2 = vcmask 261120   ;;  %s5512_s1 = inlined_call_operand.vmem [shape: bf16[324,128], index: 1, kind: input, shape index: {}]   ;;  %s5513_s0 = inlined_call_operand.vmem [shape: bf16[512,324], index: 0, kind: input, shape index: {}]   ;;  %s5514_s2 = inlined_call_operand.vmem [shape: f32[4,128], index: 2, kind: input, shape index: {}]   ;;  %s5515_s3 = inlined_call_operand.vmem [shape: f32[128,128], index: 3, kind: input, shape index: {}]   ;;  %s5516_s5 = inlined_call_operand.vmem [shape: f32[128,128], index: 5, kind: output, shape index: {1}]   ;;  %s5517_s4 = inlined_call_operand.vmem [shape: f32[128,128], index: 4, kind: output, shape index: {0}]  }
   0x1   :  { %3022 = vmatprep.subr.bf16.mxu1 %v3372_v0  ;;  %v3059_v1 = vld [vmem:[%s5512_s1 + $0x38] sm:$0xff]   ;;  %893 = vmatprep.subr.bf16.mxu0 %v3372_v0  ;;  %v3060_v2 = vld [vmem:[%s5512_s1 + $0x30] sm:$0xff]   ;;  %v3061_v3 = vld [vmem:[%s5512_s1 + $0x28] sm:$0xff]   ;;  %vm1576_vm3 = vcmask 523264   ;;  %vm1585_vm4 = vcmask 785408  }
   0x2   :  { %3038 = vmatpush1.bf16.msra.mxu1 %v3059_v1  ;;  %894 = vmatpush1.bf16.msra.mxu0 %v3059_v1  ;;  %v3062_v4 = vld [vmem:[%s5512_s1 + $0x20] sm:$0xff]   ;;  %v3063_v5 = vld [vmem:[%s5512_s1 + $0x18] sm:$0xff]   ;;  %v3064_v7 = vld [vmem:[%s5512_s1 + $0x10] sm:$0xff]  }
   0x3   :  { %3023 = vmatprep.subr.bf16.mxu1 %v3372_v0  ;;  %895 = vmatprep.subr.bf16.mxu0 %v3372_v0  ;;  %v3077_v6 = vld [vmem:[%s5513_s0 + $0x244] ss:$12 sps:$4 sm:$0xff]   ;;  %v3065_v8 = vld [vmem:[%s5512_s1 + $0x8] sm:$0xff]   ;;  %v3067_v10 = vld [vmem:[%s5512_s1 + $0x78] sm:$0xff]  }
   0x4   :  { %1117 = vmatprep.mubr.bf16.mxu1 %v3077_v6  ;;  %v3066_v9 = vld [vmem:[%s5512_s1] sm:$0xff]   ;;  %v3068_v12 = vld [vmem:[%s5512_s1 + $0x70] sm:$0xff]   ;;  %v3069_v13 = vld [vmem:[%s5512_s1 + $0x68] sm:$0xff]  }
   0x5   :  { %v3102_v11 = vld [vmem:[%s5513_s0 + $0x4] ss:$12 sps:$4 sm:$0xff]   ;;  %v3071_v15 = vld [vmem:[%s5512_s1 + $0x58] sm:$0xff]   ;;  %v3073_v17 = vld [vmem:[%s5512_s1 + $0x48] sm:$0xff]  }
   0x6   :  { %3039 = vmatpush1.bf16.msra.mxu1 %v3060_v2  ;;  %896 = vmatpush1.bf16.msra.mxu0 %v3060_v2  ;;  %v3070_v14 = vld [vmem:[%s5512_s1 + $0x60] sm:$0xff]   ;;  %v3072_v16 = vld [vmem:[%s5512_s1 + $0x50] sm:$0xff]   ;;  %v3079_v22 = vld [vmem:[%s5513_s0 + $0x25c] ss:$12 sps:$4 sm:$0xff]  }
   0x7   :  { %3024 = vmatprep.subr.bf16.mxu1 %v3372_v0  ;;  %897 = vmatprep.subr.bf16.mxu0 %v3372_v0  ;;  %v3074_v18 = vld [vmem:[%s5512_s1 + $0x40] sm:$0xff]   ;;  %v3082_v23 = vld [vmem:[%s5512_s1 + $0x98] sm:$0xff]   ;;  %v3089_v26 = vld [vmem:[%s5512_s1 + $0x90] sm:$0xff]  }
   0x8   :  { %925 = vmatprep.mubr.bf16.mxu0 %v3102_v11  ;;  %v3078_v19 = vld [vmem:[%s5512_s1 + $0xa0] ss:$0 sps:$4 sm:$0x33]   ;;  %v3107_v24 = vld [vmem:[%s5513_s0 + $0x1c] ss:$12 sps:$4 sm:$0xff]  }
   0x9   :  { %v3075_v20 = vld [vmem:[%s5513_s0 + $0x240] ss:$12 sps:$4 sm:$0xff]   ;;  %v891_v25 = vsel %vm889_vm0, %v3078_v19, 0  ;;  %v3081_v27 = vld [vmem:[%s5513_s0 + $0x258] ss:$12 sps:$4 sm:$0xff]  }
   0xa   :  { %3040 = vmatpush1.bf16.msra.mxu1 %v3061_v3  ;;  %898 = vmatpush1.bf16.msra.mxu0 %v3061_v3  ;;  %v3100_v21 = vld [vmem:[%s5513_s0] ss:$12 sps:$4 sm:$0xff]   ;;  %v3109_v28 = vld [vmem:[%s5513_s0 + $0x18] ss:$12 sps:$4 sm:$0xff]   ;;  %v3085_v33 = vld [vmem:[%s5513_s0 + $0x270] ss:$12 sps:$4 sm:$0xff]  }
   0xb   :  { %3025 = vmatprep.subr.bf16.mxu1 %v3372_v0  ;;  %899 = vmatprep.subr.bf16.mxu0 %v3372_v0  ;;  %v3083_v29 = vld [vmem:[%s5513_s0 + $0x274] ss:$12 sps:$4 sm:$0xff]   ;;  %v3095_v30 = vld [vmem:[%s5512_s1 + $0x88] sm:$0xff]   ;;  %v3116_v34 = vld [vmem:[%s5513_s0 + $0x30] ss:$12 sps:$4 sm:$0xff]  }
   0xc   :  { %v3114_v31 = vld [vmem:[%s5513_s0 + $0x34] ss:$12 sps:$4 sm:$0xff]   ;;  %v3086_v35 = vld [vmem:[%s5513_s0 + $0x28c] ss:$12 sps:$4 sm:$0xff]   ;;  %v3090_v39 = vld [vmem:[%s5513_s0 + $0x2a4] ss:$12 sps:$4 sm:$0xff]  }
   0xd   :  { %v3103_v32 = vld [vmem:[%s5512_s1 + $0x80] sm:$0xff]   ;;  %v3119_v36 = vld [vmem:[%s5513_s0 + $0x4c] ss:$12 sps:$4 sm:$0xff]   ;;  %v3088_v37 = vld [vmem:[%s5513_s0 + $0x288] ss:$12 sps:$4 sm:$0xff]  }
   0xe   :  { %3041 = vmatpush1.bf16.msra.mxu1 %v3062_v4  ;;  %900 = vmatpush1.bf16.msra.mxu0 %v3062_v4  ;;  %v3121_v38 = vld [vmem:[%s5513_s0 + $0x48] ss:$12 sps:$4 sm:$0xff]   ;;  %v3126_v40 = vld [vmem:[%s5513_s0 + $0x64] ss:$12 sps:$4 sm:$0xff]   ;;  %v3092_v41 = vld [vmem:[%s5513_s0 + $0x2a0] ss:$12 sps:$4 sm:$0xff]  }
   0xf   :  { %3026 = vmatprep.subr.bf16.mxu1 %v3372_v0  ;;  %901 = vmatprep.subr.bf16.mxu0 %v3372_v0  ;;  %v3128_v42 = vld [vmem:[%s5513_s0 + $0x60] ss:$12 sps:$4 sm:$0xff]   ;;  %v3093_v43 = vld [vmem:[%s5513_s0 + $0x2bc] ss:$12 sps:$4 sm:$0xff]   ;;  %v3096_v45 = vld [vmem:[%s5513_s0 + $0x2b8] ss:$12 sps:$4 sm:$0xff]  }
  0x10   :  { %v3131_v44 = vld [vmem:[%s5513_s0 + $0x7c] ss:$12 sps:$4 sm:$0xff]   ;;  %v3133_v46 = vld [vmem:[%s5513_s0 + $0x78] ss:$12 sps:$4 sm:$0xff]   ;;  %v3097_v47 = vld [vmem:[%s5513_s0 + $0x2d4] ss:$12 sps:$4 sm:$0xff]  }
  0x11   :  { %v3138_v48 = vld [vmem:[%s5513_s0 + $0x94] ss:$12 sps:$4 sm:$0xff]   ;;  %v3099_v49 = vld [vmem:[%s5513_s0 + $0x2d0] ss:$12 sps:$4 sm:$0xff]   ;;  %v3104_v51 = vld [vmem:[%s5513_s0 + $0x2ec] ss:$12 sps:$4 sm:$0xff]  }
  0x12   :  { %3042 = vmatpush1.bf16.msra.mxu1 %v3063_v5  ;;  %902 = vmatpush1.bf16.msra.mxu0 %v3063_v5  ;;  %v3140_v50 = vld [vmem:[%s5513_s0 + $0x90] ss:$12 sps:$4 sm:$0xff]   ;;  %v3143_v52 = vld [vmem:[%s5513_s0 + $0xac] ss:$12 sps:$4 sm:$0xff]   ;;  %v3106_v53 = vld [vmem:[%s5513_s0 + $0x2e8] ss:$12 sps:$4 sm:$0xff]  }
  0x13   :  { %3027 = vmatprep.subr.bf16.mxu1 %v3372_v0  ;;  %903 = vmatprep.subr.bf16.mxu0 %v3372_v0  ;;  %v3145_v54 = vld [vmem:[%s5513_s0 + $0xa8] ss:$12 sps:$4 sm:$0xff]   ;;  %v3150_v56 = vld [vmem:[%s5513_s0 + $0xc4] ss:$12 sps:$4 sm:$0xff]   ;;  %v3111_v57 = vld [vmem:[%s5513_s0 + $0x20] ss:$12 sps:$4 sm:$0xff]  }
  0x14   :  { %v3110_v55 = vld [vmem:[%s5513_s0 + $0x8] ss:$12 sps:$4 sm:$0xff]   ;;  %v3152_v58 = vld [vmem:[%s5513_s0 + $0xc0] ss:$12 sps:$4 sm:$0xff]   ;;  %v3112_v59 = vld [vmem:[%s5513_s0 + $0x38] ss:$12 sps:$4 sm:$0xff]  }
  0x15   :  { %v3155_v60 = vld [vmem:[%s5513_s0 + $0xdc] ss:$12 sps:$4 sm:$0xff]   ;;  %v3157_v62 = vld [vmem:[%s5513_s0 + $0xd8] ss:$12 sps:$4 sm:$0xff]   ;;  %v3118_v1 = vld [vmem:[%s5513_s0 + $0x80] ss:$12 sps:$4 sm:$0xff]  }
  0x16   :  { %3043 = vmatpush1.bf16.msra.mxu1 %v3064_v7  ;;  %904 = vmatpush1.bf16.msra.mxu0 %v3064_v7  ;;  %v3113_v61 = vld [vmem:[%s5513_s0 + $0x50] ss:$12 sps:$4 sm:$0xff]   ;;  %v3117_v63 = vld [vmem:[%s5513_s0 + $0x68] ss:$12 sps:$4 sm:$0xff]   ;;  %v3122_v3 = vld [vmem:[%s5513_s0 + $0x98] ss:$12 sps:$4 sm:$0xff]  }
  0x17   :  { %3028 = vmatprep.subr.bf16.mxu1 %v3372_v0  ;;  %905 = vmatprep.subr.bf16.mxu0 %v3372_v0  ;;  %v3164_v2 = vld [vmem:[%s5513_s0 + $0xf0] ss:$12 sps:$4 sm:$0xff]   ;;  %v3167_v4 = vld [vmem:[%s5513_s0 + $0x10c] ss:$12 sps:$4 sm:$0xff]   ;;  %v3169_v6 = vld [vmem:[%s5513_s0 + $0x108] ss:$12 sps:$4 sm:$0xff]  }
  0x18   :  { %v3123_v5 = vld [vmem:[%s5513_s0 + $0xb0] ss:$12 sps:$4 sm:$0xff]   ;;  %v3124_v7 = vld [vmem:[%s5513_s0 + $0xc8] ss:$12 sps:$4 sm:$0xff]   ;;  %v3129_v11 = vld [vmem:[%s5513_s0 + $0xf8] ss:$12 sps:$4 sm:$0xff]  }
  0x1a   :  { %3044 = vmatpush1.bf16.msra.mxu1 %v3065_v8  ;;  %906 = vmatpush1.bf16.msra.mxu0 %v3065_v8  ;;  %v3172_v8 = vld [vmem:[%s5513_s0 + $0x124] ss:$12 sps:$4 sm:$0xff]  }
  0x1b   :  { %3029 = vmatprep.subr.bf16.mxu1 %v3372_v0  ;;  %907 = vmatprep.subr.bf16.mxu0 %v3372_v0 }
  0x1e   :  { %3045 = vmatpush1.bf16.msra.mxu1 %v3066_v9  ;;  %908 = vmatpush1.bf16.msra.mxu0 %v3066_v9  ;;  %v3125_v9 = vld [vmem:[%s5513_s0 + $0xe0] ss:$12 sps:$4 sm:$0xff]  }
  0x1f   :  { %3030 = vmatprep.subr.bf16.mxu1 %v3372_v0  ;;  %909 = vmatprep.subr.bf16.mxu0 %v3372_v0 }
  0x22   :  { %3046 = vmatpush2.bf16.msra.mxu1 %v3067_v10  ;;  %910 = vmatpush2.bf16.msra.mxu0 %v3067_v10  ;;  %v3174_v10 = vld [vmem:[%s5513_s0 + $0x120] ss:$12 sps:$4 sm:$0xff]  }
  0x23   :  { %3031 = vmatprep.subr.bf16.mxu1 %v3372_v0  ;;  %911 = vmatprep.subr.bf16.mxu0 %v3372_v0 }
  0x26   :  { %3047 = vmatpush2.bf16.msra.mxu1 %v3068_v12  ;;  %912 = vmatpush2.bf16.msra.mxu0 %v3068_v12  ;;  %v3175_v12 = vld [vmem:[%s5513_s0 + $0x13c] ss:$12 sps:$4 sm:$0xff]  }
  0x27   :  { %3032 = vmatprep.subr.bf16.mxu1 %v3372_v0  ;;  %913 = vmatprep.subr.bf16.mxu0 %v3372_v0 }
  0x2a   :  { %3048 = vmatpush2.bf16.msra.mxu1 %v3069_v13  ;;  %914 = vmatpush2.bf16.msra.mxu0 %v3069_v13  ;;  %v3130_v13 = vld [vmem:[%s5513_s0 + $0x110] ss:$12 sps:$4 sm:$0xff]  }
  0x2b   :  { %3033 = vmatprep.subr.bf16.mxu1 %v3372_v0  ;;  %915 = vmatprep.subr.bf16.mxu0 %v3372_v0 }
  0x2e   :  { %3049 = vmatpush2.bf16.msra.mxu1 %v3070_v14  ;;  %916 = vmatpush2.bf16.msra.mxu0 %v3070_v14  ;;  %v3177_v14 = vld [vmem:[%s5513_s0 + $0x138] ss:$12 sps:$4 sm:$0xff]  }
  0x2f   :  { %3034 = vmatprep.subr.bf16.mxu1 %v3372_v0  ;;  %917 = vmatprep.subr.bf16.mxu0 %v3372_v0 }
  0x32   :  { %3050 = vmatpush2.bf16.msra.mxu1 %v3071_v15  ;;  %918 = vmatpush2.bf16.msra.mxu0 %v3071_v15  ;;  %v3134_v15 = vld [vmem:[%s5513_s0 + $0x128] ss:$12 sps:$4 sm:$0xff]  }
  0x33   :  { %3035 = vmatprep.subr.bf16.mxu1 %v3372_v0  ;;  %919 = vmatprep.subr.bf16.mxu0 %v3372_v0 }
  0x36   :  { %3051 = vmatpush2.bf16.msra.mxu1 %v3072_v16  ;;  %920 = vmatpush2.bf16.msra.mxu0 %v3072_v16  ;;  %v3178_v16 = vld [vmem:[%s5513_s0 + $0x154] ss:$12 sps:$4 sm:$0xff]  }
  0x37   :  { %3036 = vmatprep.subr.bf16.mxu1 %v3372_v0  ;;  %921 = vmatprep.subr.bf16.mxu0 %v3372_v0 }
  0x3a   :  { %3052 = vmatpush2.bf16.msra.mxu1 %v3073_v17  ;;  %922 = vmatpush2.bf16.msra.mxu0 %v3073_v17  ;;  %v3135_v17 = vld [vmem:[%s5513_s0 + $0x140] ss:$12 sps:$4 sm:$0xff]  }
  0x3b   :  { %3037 = vmatprep.subr.bf16.mxu1 %v3372_v0  ;;  %923 = vmatprep.subr.bf16.mxu0 %v3372_v0  ;;  %v3162_v0 = vld [vmem:[%s5513_s0 + $0xf4] ss:$12 sps:$4 sm:$0xff]  }
  0x3e   :  { %3053 = vmatpush2.bf16.msra.mxu1 %v3074_v18  ;;  %924 = vmatpush2.bf16.msra.mxu0 %v3074_v18  ;;  %v3180_v18 = vld [vmem:[%s5513_s0 + $0x150] ss:$12 sps:$4 sm:$0xff]  }
  0x3f   :  { %3054 = vmatprep.subr.msk.bf16.mxu1 %vm889_vm0, %v3078_v19  ;;  %v3136_v19 = vld [vmem:[%s5513_s0 + $0x158] ss:$12 sps:$4 sm:$0xff]  }
  0x41   :  { %1118 = vmatmul.mubr.bf16.vlgmr.msra.gmra.mxu1 %v3075_v20  ;;  %926 = vmatmul.mubr.bf16.vlgmr.msra.gmra.mxu0 %v3100_v21  ;;  %v3181_v20 = vld [vmem:[%s5513_s0 + $0x16c] ss:$12 sps:$4 sm:$0xff]   ;;  %v3137_v21 = vld [vmem:[%s5513_s0 + $0x170] ss:$12 sps:$4 sm:$0xff]  }
  0x42   :  { %2949 = vmatpush3.bf16.msra.mxu1 %v891_v25  ;;  %1125 = vmatprep.mubr.bf16.mxu1 %v3079_v22  ;;  %v3183_v22 = vld [vmem:[%s5513_s0 + $0x168] ss:$12 sps:$4 sm:$0xff]   ;;  %v3142_v25 = vld [vmem:[%s5513_s0 + $0x1a0] ss:$12 sps:$4 sm:$0xff]  }
  0x43   :  { %2950 = vmatprep.subr.bf16.mxu1 %v3082_v23  ;;  %933 = vmatprep.mubr.bf16.mxu0 %v3107_v24  ;;  %v3184_v24 = vld [vmem:[%s5513_s0 + $0x184] ss:$12 sps:$4 sm:$0xff]  }
  0x46   :  { %2951 = vmatpush3.bf16.msra.mxu1 %v3082_v23  ;;  %v3141_v23 = vld [vmem:[%s5513_s0 + $0x188] ss:$12 sps:$4 sm:$0xff]  }
  0x47   :  { %2952 = vmatprep.subr.bf16.mxu1 %v3089_v26 }
  0x49   :  { %1126 = vmatmul.mubr.bf16.gmra.mxu1 %v3081_v27  ;;  %934 = vmatmul.mubr.bf16.gmra.mxu0 %v3109_v28  ;;  %v3146_v27 = vld [vmem:[%s5513_s0 + $0x1b8] ss:$12 sps:$4 sm:$0xff]   ;;  %v3187_v28 = vld [vmem:[%s5513_s0 + $0x19c] ss:$12 sps:$4 sm:$0xff]  }
  0x4a   :  { %1133 = vmatprep.mubr.bf16.mxu1 %v3083_v29  ;;  %2953 = vmatpush3.bf16.msra.mxu1 %v3089_v26  ;;  %v3186_v26 = vld [vmem:[%s5513_s0 + $0x180] ss:$12 sps:$4 sm:$0xff]   ;;  %v3147_v29 = vld [vmem:[%s5513_s0 + $0x1d0] ss:$12 sps:$4 sm:$0xff]  }
  0x4b   :  { %2954 = vmatprep.subr.bf16.mxu1 %v3095_v30  ;;  %941 = vmatprep.mubr.bf16.mxu0 %v3114_v31  ;;  %v3148_v31 = vld [vmem:[%s5513_s0 + $0x1e8] ss:$12 sps:$4 sm:$0xff]  }
  0x4e   :  { %2955 = vmatpush3.bf16.msra.mxu1 %v3095_v30  ;;  %v3189_v30 = vld [vmem:[%s5513_s0 + $0x198] ss:$12 sps:$4 sm:$0xff]  }
  0x4f   :  { %2956 = vmatprep.subr.bf16.mxu1 %v3103_v32 }
  0x51   :  { %1134 = vmatmul.mubr.bf16.gmra.mxu1 %v3085_v33  ;;  %942 = vmatmul.mubr.bf16.gmra.mxu0 %v3116_v34  ;;  %v3149_v33 = vld [vmem:[%s5513_s0 + $0x200] ss:$12 sps:$4 sm:$0xff]   ;;  %v3192_v34 = vld [vmem:[%s5513_s0 + $0x1b0] ss:$12 sps:$4 sm:$0xff]  }
  0x52   :  { %1141 = vmatprep.mubr.bf16.mxu1 %v3086_v35  ;;  %2957 = vmatpush3.bf16.msra.mxu1 %v3103_v32  ;;  %v3190_v32 = vld [vmem:[%s5513_s0 + $0x1b4] ss:$12 sps:$4 sm:$0xff]   ;;  %v3153_v35 = vld [vmem:[%s5513_s0 + $0x218] ss:$12 sps:$4 sm:$0xff]  }
  0x53   :  { %949 = vmatprep.mubr.bf16.mxu0 %v3119_v36  ;;  %v3193_v36 = vld [vmem:[%s5513_s0 + $0x1cc] ss:$12 sps:$4 sm:$0xff]  }
  0x59   :  { %1142 = vmatmul.mubr.bf16.gmra.mxu1 %v3088_v37  ;;  %950 = vmatmul.mubr.bf16.gmra.mxu0 %v3121_v38  ;;  %v3154_v37 = vld [vmem:[%s5513_s0 + $0x230] ss:$12 sps:$4 sm:$0xff]   ;;  %v3195_v38 = vld [vmem:[%s5513_s0 + $0x1c8] ss:$12 sps:$4 sm:$0xff]  }
  0x5a   :  { %1149 = vmatprep.mubr.bf16.mxu1 %v3090_v39  ;;  %957 = vmatprep.mubr.bf16.mxu0 %v3126_v40  ;;  %v3158_v39 = vld [vmem:[%s5513_s0 + $0x248] ss:$12 sps:$4 sm:$0xff]   ;;  %v3196_v40 = vld [vmem:[%s5513_s0 + $0x1e4] ss:$12 sps:$4 sm:$0xff]  }
  0x61   :  { %1150 = vmatmul.mubr.bf16.gmra.mxu1 %v3092_v41  ;;  %958 = vmatmul.mubr.bf16.gmra.mxu0 %v3128_v42  ;;  %v3159_v41 = vld [vmem:[%s5513_s0 + $0x260] ss:$12 sps:$4 sm:$0xff]  }
  0x62   :  { %1157 = vmatprep.mubr.bf16.mxu1 %v3093_v43  ;;  %965 = vmatprep.mubr.bf16.mxu0 %v3131_v44  ;;  %v3198_v42 = vld [vmem:[%s5513_s0 + $0x1e0] ss:$12 sps:$4 sm:$0xff]   ;;  %v3160_v43 = vld [vmem:[%s5513_s0 + $0x278] ss:$12 sps:$4 sm:$0xff]   ;;  %v3199_v44 = vld [vmem:[%s5513_s0 + $0x1fc] ss:$12 sps:$4 sm:$0xff]  }
  0x69   :  { %1158 = vmatmul.mubr.bf16.gmra.mxu1 %v3096_v45  ;;  %966 = vmatmul.mubr.bf16.gmra.mxu0 %v3133_v46  ;;  %v3161_v45 = vld [vmem:[%s5513_s0 + $0x290] ss:$12 sps:$4 sm:$0xff]   ;;  %v3201_v46 = vld [vmem:[%s5513_s0 + $0x1f8] ss:$12 sps:$4 sm:$0xff]  }
  0x6a   :  { %1165 = vmatprep.mubr.bf16.mxu1 %v3097_v47  ;;  %973 = vmatprep.mubr.bf16.mxu0 %v3138_v48  ;;  %v3165_v47 = vld [vmem:[%s5513_s0 + $0x2a8] ss:$12 sps:$4 sm:$0xff]  }
  0x6b   :  { %v3202_v48 = vld [vmem:[%s5513_s0 + $0x214] ss:$12 sps:$4 sm:$0xff]  }
  0x71   :  { %1166 = vmatmul.mubr.bf16.gmra.mxu1 %v3099_v49  ;;  %974 = vmatmul.mubr.bf16.gmra.mxu0 %v3140_v50  ;;  %v3166_v49 = vld [vmem:[%s5513_s0 + $0x2c0] ss:$12 sps:$4 sm:$0xff]   ;;  %v3204_v50 = vld [vmem:[%s5513_s0 + $0x210] ss:$12 sps:$4 sm:$0xff]  }
  0x72   :  { %1173 = vmatprep.mubr.bf16.mxu1 %v3104_v51  ;;  %981 = vmatprep.mubr.bf16.mxu0 %v3143_v52  ;;  %v3170_v51 = vld [vmem:[%s5513_s0 + $0x2d8] ss:$12 sps:$4 sm:$0xff]  }
  0x73   :  { %v3205_v52 = vld [vmem:[%s5513_s0 + $0x22c] ss:$12 sps:$4 sm:$0xff]  }
  0x79   :  { %1174 = vmatmul.mubr.bf16.gmra.mxu1 %v3106_v53  ;;  %982 = vmatmul.mubr.bf16.gmra.mxu0 %v3145_v54  ;;  %v3171_v53 = vld [vmem:[%s5513_s0 + $0x2f0] ss:$12 sps:$4 sm:$0xff]   ;;  %v3207_v54 = vld [vmem:[%s5513_s0 + $0x228] ss:$12 sps:$4 sm:$0xff]   ;;  %s3373_s0 = smov 96  }
  0x7a   :  { %2958 = vmatprep.mubr.msk.bf16.mxu1 %vm792_vm1, %v3110_v55  ;;  %989 = vmatprep.mubr.bf16.mxu0 %v3150_v56 }
  0x81   :  { %2959 = vmatmul.mubr.msk.bf16.vlgmr.msra.gmra.mxu1 %vm792_vm1, %v3111_v57  ;;  %990 = vmatmul.mubr.bf16.gmra.mxu0 %v3152_v58 }
  0x82   :  { %2962 = vmatprep.mubr.msk.bf16.mxu1 %vm792_vm1, %v3112_v59  ;;  %997 = vmatprep.mubr.bf16.mxu0 %v3155_v60 }
  0x89   :  { %2963 = vmatmul.mubr.msk.bf16.gmra.mxu1 %vm792_vm1, %v3113_v61  ;;  %998 = vmatmul.mubr.bf16.gmra.mxu0 %v3157_v62 }
  0x8a   :  { %2966 = vmatprep.mubr.msk.bf16.mxu1 %vm792_vm1, %v3117_v63  ;;  %1005 = vmatprep.mubr.bf16.mxu0 %v3162_v0 }
  0x91   :  { %2967 = vmatmul.mubr.msk.bf16.gmra.mxu1 %vm792_vm1, %v3118_v1  ;;  %1006 = vmatmul.mubr.bf16.gmra.mxu0 %v3164_v2 }
  0x92   :  { %2970 = vmatprep.mubr.msk.bf16.mxu1 %vm792_vm1, %v3122_v3  ;;  %1013 = vmatprep.mubr.bf16.mxu0 %v3167_v4 }
  0x99   :  { %2971 = vmatmul.mubr.msk.bf16.gmra.mxu1 %vm792_vm1, %v3123_v5  ;;  %1014 = vmatmul.mubr.bf16.gmra.mxu0 %v3169_v6 }
  0x9a   :  { %2974 = vmatprep.mubr.msk.bf16.mxu1 %vm792_vm1, %v3124_v7  ;;  %1021 = vmatprep.mubr.bf16.mxu0 %v3172_v8 }
  0xa1   :  { %2975 = vmatmul.mubr.msk.bf16.gmra.mxu1 %vm792_vm1, %v3125_v9  ;;  %1022 = vmatmul.mubr.bf16.gmra.mxu0 %v3174_v10 }
  0xa2   :  { %2978 = vmatprep.mubr.msk.bf16.mxu1 %vm792_vm1, %v3129_v11  ;;  %1029 = vmatprep.mubr.bf16.mxu0 %v3175_v12 }
  0xa9   :  { %2979 = vmatmul.mubr.msk.bf16.gmra.mxu1 %vm792_vm1, %v3130_v13  ;;  %1030 = vmatmul.mubr.bf16.gmra.mxu0 %v3177_v14 }
  0xaa   :  { %2982 = vmatprep.mubr.msk.bf16.mxu1 %vm792_vm1, %v3134_v15  ;;  %1037 = vmatprep.mubr.bf16.mxu0 %v3178_v16 }
  0xb1   :  { %2983 = vmatmul.mubr.msk.bf16.gmra.mxu1 %vm792_vm1, %v3135_v17  ;;  %1038 = vmatmul.mubr.bf16.gmra.mxu0 %v3180_v18 }
  0xb2   :  { %2986 = vmatprep.mubr.msk.bf16.mxu1 %vm792_vm1, %v3136_v19  ;;  %1045 = vmatprep.mubr.bf16.mxu0 %v3181_v20 }
  0xb9   :  { %2987 = vmatmul.mubr.msk.bf16.gmra.mxu1 %vm792_vm1, %v3137_v21  ;;  %1046 = vmatmul.mubr.bf16.gmra.mxu0 %v3183_v22 }
  0xba   :  { %2990 = vmatprep.mubr.msk.bf16.mxu1 %vm792_vm1, %v3141_v23  ;;  %1053 = vmatprep.mubr.bf16.mxu0 %v3184_v24 }
  0xc1   :  { %2991 = vmatmul.mubr.msk.bf16.gmra.mxu1 %vm792_vm1, %v3142_v25  ;;  %1054 = vmatmul.mubr.bf16.gmra.mxu0 %v3186_v26 }
  0xc2   :  { %2994 = vmatprep.mubr.msk.bf16.mxu1 %vm792_vm1, %v3146_v27  ;;  %1061 = vmatprep.mubr.bf16.mxu0 %v3187_v28 }
  0xc9   :  { %2995 = vmatmul.mubr.msk.bf16.gmra.mxu1 %vm792_vm1, %v3147_v29  ;;  %1062 = vmatmul.mubr.bf16.gmra.mxu0 %v3189_v30 }
  0xca   :  { %2998 = vmatprep.mubr.msk.bf16.mxu1 %vm792_vm1, %v3148_v31  ;;  %1069 = vmatprep.mubr.bf16.mxu0 %v3190_v32 }
  0xd1   :  { %2999 = vmatmul.mubr.msk.bf16.gmra.mxu1 %vm792_vm1, %v3149_v33  ;;  %1070 = vmatmul.mubr.bf16.gmra.mxu0 %v3192_v34 }
  0xd2   :  { %3002 = vmatprep.mubr.msk.bf16.mxu1 %vm792_vm1, %v3153_v35  ;;  %1077 = vmatprep.mubr.bf16.mxu0 %v3193_v36 }
  0xd9   :  { %3003 = vmatmul.mubr.msk.bf16.gmra.mxu1 %vm792_vm1, %v3154_v37  ;;  %1078 = vmatmul.mubr.bf16.gmra.mxu0 %v3195_v38 }
  0xda   :  { %3006 = vmatprep.mubr.msk.bf16.mxu1 %vm792_vm1, %v3158_v39  ;;  %1085 = vmatprep.mubr.bf16.mxu0 %v3196_v40 }
  0xe1   :  { %3007 = vmatmul.mubr.msk.bf16.gmra.mxu1 %vm792_vm1, %v3159_v41  ;;  %1086 = vmatmul.mubr.bf16.gmra.mxu0 %v3198_v42 }
  0xe2   :  { %3010 = vmatprep.mubr.msk.bf16.mxu1 %vm792_vm1, %v3160_v43  ;;  %1093 = vmatprep.mubr.bf16.mxu0 %v3199_v44 }
  0xe9   :  { %3011 = vmatmul.mubr.msk.bf16.gmra.mxu1 %vm792_vm1, %v3161_v45  ;;  %1094 = vmatmul.mubr.bf16.gmra.mxu0 %v3201_v46 }
  0xea   :  { %3014 = vmatprep.mubr.msk.bf16.mxu1 %vm792_vm1, %v3165_v47  ;;  %1101 = vmatprep.mubr.bf16.mxu0 %v3202_v48 }
  0xf1   :  { %3015 = vmatmul.mubr.msk.bf16.gmra.mxu1 %vm792_vm1, %v3166_v49  ;;  %1102 = vmatmul.mubr.bf16.gmra.mxu0 %v3204_v50 }
  0xf2   :  { %3018 = vmatprep.mubr.msk.bf16.mxu1 %vm792_vm1, %v3170_v51  ;;  %1109 = vmatprep.mubr.bf16.mxu0 %v3205_v52 }
  0xf9   :  { %3019 = vmatmul.mubr.msk.bf16.gmra.mxu1 %vm792_vm1, %v3171_v53  ;;  %1110 = vmatmul.mubr.bf16.gmra.mxu0 %v3207_v54 }
 0x101   :  { %v3821_v55 = vpop.f32.mrf.mxu1  ;;  %v3823_v56 = vpop.f32.mrf.mxu0 }
 0x102   :  { %5556 = vst [vmem:[#allocation2_spill] sm:$0xff] %v3821_v55 }
 0x103   :  { %v1121_v57 = vpop.f32.mrf.mxu1  ;;  %v929_v58 = vpop.f32.mrf.mxu0 }
 0x105   :  { %v3825_v59 = vpop.f32.mrf.mxu1  ;;  %v3827_v60 = vpop.f32.mrf.mxu0 }
 0x106   :  { %5557 = vst [vmem:[#allocation3_spill] sm:$0xff] %v3825_v59 }
 0x107   :  { %v1124_v61 = vpop.f32.mrf.mxu1  ;;  %v932_v62 = vpop.f32.mrf.mxu0 }
 0x109   :  { %v3829_v63 = vpop.f32.mrf.mxu1  ;;  %v935_v0 = vpop.f32.mrf.mxu0 }
 0x10b   :  { %v1129_v1 = vpop.f32.mrf.mxu1  ;;  %v937_v2 = vpop.f32.mrf.mxu0 }
 0x10d   :  { %v3831_v3 = vpop.f32.mrf.mxu1  ;;  %v938_v4 = vpop.f32.mrf.mxu0 }
 0x10f   :  { %v1132_v5 = vpop.f32.mrf.mxu1  ;;  %v940_v6 = vpop.f32.mrf.mxu0 }
 0x111   :  { %v3833_v7 = vpop.f32.mrf.mxu1  ;;  %v3835_v8 = vpop.f32.mrf.mxu0 }
 0x112   :  { %5558 = vst [vmem:[#allocation4_spill] sm:$0xff] %v3833_v7 }
 0x113   :  { %v1137_v9 = vpop.f32.mrf.mxu1  ;;  %v945_v10 = vpop.f32.mrf.mxu0 }
 0x115   :  { %v3837_v11 = vpop.f32.mrf.mxu1  ;;  %v3839_v12 = vpop.f32.mrf.mxu0 }
 0x116   :  { %5559 = vst [vmem:[#allocation5_spill] sm:$0xff] %v3837_v11 }
 0x117   :  { %v1140_v13 = vpop.f32.mrf.mxu1  ;;  %v948_v14 = vpop.f32.mrf.mxu0 }
 0x119   :  { %v3841_v15 = vpop.f32.mrf.mxu1  ;;  %v3843_v16 = vpop.f32.mrf.mxu0 }
 0x11a   :  { %5560 = vst [vmem:[#allocation6_spill] sm:$0xff] %v3841_v15 }
 0x11b   :  { %v1145_v17 = vpop.f32.mrf.mxu1  ;;  %v953_v18 = vpop.f32.mrf.mxu0 }
 0x11d   :  { %v3845_v19 = vpop.f32.mrf.mxu1  ;;  %v3847_v20 = vpop.f32.mrf.mxu0 }
 0x11e   :  { %5561 = vst [vmem:[#allocation7_spill] sm:$0xff] %v3845_v19 }
 0x11f   :  { %v1148_v21 = vpop.f32.mrf.mxu1  ;;  %v956_v22 = vpop.f32.mrf.mxu0 }
 0x121   :  { %v3849_v23 = vpop.f32.mrf.mxu1  ;;  %v3851_v24 = vpop.f32.mrf.mxu0 }
 0x122   :  { %5562 = vst [vmem:[#allocation8_spill] sm:$0xff] %v3849_v23 }
 0x123   :  { %v1153_v25 = vpop.f32.mrf.mxu1  ;;  %v961_v26 = vpop.f32.mrf.mxu0 }
 0x125   :  { %v3853_v27 = vpop.f32.mrf.mxu1  ;;  %v3855_v28 = vpop.f32.mrf.mxu0 }
 0x126   :  { %5563 = vst [vmem:[#allocation9_spill] sm:$0xff] %v3853_v27 }
 0x127   :  { %v1156_v29 = vpop.f32.mrf.mxu1  ;;  %v964_v30 = vpop.f32.mrf.mxu0 }
 0x129   :  { %v3857_v31 = vpop.f32.mrf.mxu1  ;;  %v3859_v32 = vpop.f32.mrf.mxu0 }
 0x12a   :  { %5564 = vst [vmem:[#allocation10_spill] sm:$0xff] %v3857_v31 }
 0x12b   :  { %v1161_v33 = vpop.f32.mrf.mxu1  ;;  %v969_v34 = vpop.f32.mrf.mxu0 }
 0x12d   :  { %v3861_v35 = vpop.f32.mrf.mxu1  ;;  %v3863_v36 = vpop.f32.mrf.mxu0 }
 0x12e   :  { %5565 = vst [vmem:[#allocation11_spill] sm:$0xff] %v3861_v35 }
 0x12f   :  { %v1164_v37 = vpop.f32.mrf.mxu1  ;;  %v972_v38 = vpop.f32.mrf.mxu0 }
 0x131   :  { %v3865_v39 = vpop.f32.mrf.mxu1  ;;  %v3867_v40 = vpop.f32.mrf.mxu0 }
 0x132   :  { %5566 = vst [vmem:[#allocation12_spill] sm:$0xff] %v3865_v39 }
 0x133   :  { %v1169_v41 = vpop.f32.mrf.mxu1  ;;  %v977_v42 = vpop.f32.mrf.mxu0 }
 0x135   :  { %v3869_v43 = vpop.f32.mrf.mxu1  ;;  %v3871_v44 = vpop.f32.mrf.mxu0 }
 0x136   :  { %5567 = vst [vmem:[#allocation13_spill] sm:$0xff] %v3869_v43 }
 0x137   :  { %v1172_v45 = vpop.f32.mrf.mxu1  ;;  %v980_v46 = vpop.f32.mrf.mxu0 }
 0x139   :  { %v3873_v47 = vpop.f32.mrf.mxu1  ;;  %v3875_v48 = vpop.f32.mrf.mxu0 }
 0x13a   :  { %5568 = vst [vmem:[#allocation14_spill] sm:$0xff] %v3873_v47 }
 0x13b   :  { %v1177_v49 = vpop.f32.mrf.mxu1  ;;  %v985_v50 = vpop.f32.mrf.mxu0 }
 0x13d   :  { %v3877_v51 = vpop.f32.mrf.mxu1  ;;  %v3879_v52 = vpop.f32.mrf.mxu0 }
 0x13e   :  { %5569 = vst [vmem:[#allocation15_spill] sm:$0xff] %v3877_v51 }
 0x13f   :  { %v1180_v53 = vpop.f32.mrf.mxu1  ;;  %v988_v54 = vpop.f32.mrf.mxu0 }
 0x141   :  { %v2960_v57 = vpop.f32.mrf.mxu1  ;;  %v3881_v58 = vpop.f32.mrf.mxu0 }
 0x142   :  { %v3883_v61 = vadd.f32 %v2960_v57, %v935_v0 }
 0x143   :  { %v1216_v62 = vpop.f32.mrf.mxu1  ;;  %v993_v1 = vpop.f32.mrf.mxu0 }
 0x144   :  { %5570 = vst [vmem:[#allocation16_spill] sm:$0xff] %v3883_v61  ;;  %1651 = vrot.lane.b32.xlu0 %v3883_v61, %s3373_s0  ;;  %v3904_v21 = vadd.f32 %v1216_v62, %v3823_v56 }
 0x145   :  { %v2961_v2 = vpop.f32.mrf.mxu1  ;;  %v3887_v5 = vpop.f32.mrf.mxu0 }
 0x146   :  { %v3889_v6 = vadd.f32 %v2961_v2, %v938_v4  ;;  %5572 = vst [vmem:[#allocation18_spill] sm:$0xff] %v3904_v21 }
 0x147   :  { %v1219_v9 = vpop.f32.mrf.mxu1  ;;  %v996_v10 = vpop.f32.mrf.mxu0 }
 0x148   :  { %5571 = vst [vmem:[#allocation17_spill] sm:$0xff] %v3889_v6  ;;  %1792 = vrot.lane.b32.xlu0 %v3883_v61, %s3374_s20  ;;  %1653 = vrot.lane.b32.xlu1 %v3889_v6, %s3373_s0  ;;  %v3913_v30 = vadd.f32 %v1219_v9, %v3827_v60 }
 0x149   :  { %v2964_v0 = vpop.f32.mrf.mxu1  ;;  %v3895_v13 = vpop.f32.mrf.mxu0 }
 0x14a   :  { %5573 = vst [vmem:[#allocation19_spill] sm:$0xff] %v3913_v30  ;;  %v3926_v42 = vadd.f32 %v2964_v0, %v3843_v16 }
 0x14b   :  { %v1232_v14 = vpop.f32.mrf.mxu1  ;;  %v1001_v17 = vpop.f32.mrf.mxu0 }
 0x14c   :  { %1933 = vrot.lane.b32.xlu0 %v3883_v61, %s3375_s21  ;;  %1794 = vrot.lane.b32.xlu1 %v3889_v6, %s3374_s20  ;;  %5574 = vst [vmem:[#allocation20_spill] sm:$0xff] %v3926_v42  ;;  %v3970_v0 = vadd.f32 %v1232_v14, %v3835_v8 }
 0x14d   :  { %v2965_v4 = vpop.f32.mrf.mxu1  ;;  %v3901_v18 = vpop.f32.mrf.mxu0 }
 0x14e   :  { %v3947_v53 = vadd.f32 %v2965_v4, %v3847_v20  ;;  %5576 = vst [vmem:[#allocation22_spill] sm:$0xff] %v3970_v0 }
 0x14f   :  { %v1235_v22 = vpop.f32.mrf.mxu1  ;;  %v1004_v25 = vpop.f32.mrf.mxu0 }
 0x150   :  { %1647 = vrot.lane.b32.xlu0 %v3904_v21, %s3373_s0  ;;  %1935 = vrot.lane.b32.xlu1 %v3889_v6, %s3375_s21  ;;  %5575 = vst [vmem:[#allocation21_spill] sm:$0xff] %v3947_v53 }
 0x151   :  { %v2968_v26 = vpop.f32.mrf.mxu1  ;;  %v3910_v29 = vpop.f32.mrf.mxu0 }
 0x153   :  { %v3915_v33 = vpop.f32.mrf.mxu1  ;;  %v1009_v34 = vpop.f32.mrf.mxu0 }
 0x154   :  { %1788 = vrot.lane.b32.xlu0 %v3904_v21, %s3374_s20  ;;  %1649 = vrot.lane.b32.xlu1 %v3913_v30, %s3373_s0 }
 0x155   :  { %v2969_v56 = vpop.f32.mrf.mxu1  ;;  %v3921_v37 = vpop.f32.mrf.mxu0 }
 0x157   :  { %v3923_v38 = vpop.f32.mrf.mxu1  ;;  %v1012_v41 = vpop.f32.mrf.mxu0 }
 0x158   :  { %1929 = vrot.lane.b32.xlu0 %v3904_v21, %s3375_s21  ;;  %1790 = vrot.lane.b32.xlu1 %v3913_v30, %s3374_s20  ;;  %v3983_v41 = vadd.f32 %v1235_v22, %v3839_v12  ;;  %v4057_v61 = vadd.f32 %v3923_v38, %v3855_v28 }
 0x159   :  { %v3932_v60 = vpop.f32.mrf.mxu1  ;;  %v3934_v45 = vpop.f32.mrf.mxu0 }
 0x15a   :  { %5577 = vst [vmem:[#allocation23_spill] sm:$0xff] %v3983_v41  ;;  %5581 = vst [vmem:[#allocation27_spill] sm:$0xff] %v4057_v61  ;;  %v4073_v28 = vadd.f32 %v3932_v60, %v3875_v48 }
 0x15b   :  { %v3936_v46 = vpop.f32.mrf.mxu1  ;;  %v1017_v49 = vpop.f32.mrf.mxu0 }
 0x15c   :  { %1931 = vrot.lane.b32.xlu1 %v3913_v30, %s3375_s21  ;;  %1659 = vrot.lane.b32.xlu0 %v3926_v42, %s3373_s0  ;;  %5582 = vst [vmem:[#allocation28_spill] sm:$0xff] %v4073_v28 }
 0x15d   :  { %v3942_v16 = vpop.f32.mrf.mxu1  ;;  %v3944_v50 = vpop.f32.mrf.mxu0 }
 0x15e   :  { %v4093_v60 = vadd.f32 %v3942_v16, %v3879_v52 }
 0x15f   :  { %v3949_v54 = vpop.f32.mrf.mxu1  ;;  %v1020_v57 = vpop.f32.mrf.mxu0 }
 0x160   :  { %1800 = vrot.lane.b32.xlu0 %v3926_v42, %s3374_s20  ;;  %1661 = vrot.lane.b32.xlu1 %v3947_v53, %s3373_s0  ;;  %5583 = vst [vmem:[#allocation29_spill] sm:$0xff] %v4093_v60  ;;  %v4123_v31 = vadd.f32 %v3949_v54, %v3871_v44 }
 0x161   :  { %v3955_v62 = vpop.f32.mrf.mxu1  ;;  %v3957_v1 = vpop.f32.mrf.mxu0 }
 0x162   :  { %5585 = vst [vmem:[#allocation31_spill] sm:$0xff] %v4123_v31 }
 0x163   :  { %v3959_v2 = vpop.f32.mrf.mxu1  ;;  %v1025_v9 = vpop.f32.mrf.mxu0 }
 0x164   :  { %1941 = vrot.lane.b32.xlu0 %v3926_v42, %s3375_s21  ;;  %1802 = vrot.lane.b32.xlu1 %v3947_v53, %s3374_s20 }
 0x165   :  { %v3965_v20 = vpop.f32.mrf.mxu1  ;;  %v3967_v10 = vpop.f32.mrf.mxu0 }
 0x167   :  { %v3972_v17 = vpop.f32.mrf.mxu1  ;;  %v1028_v4 = vpop.f32.mrf.mxu0 }
 0x168   :  { %1655 = vrot.lane.b32.xlu0 %v3970_v0, %s3373_s0  ;;  %1943 = vrot.lane.b32.xlu1 %v3947_v53, %s3375_s21  ;;  %v3998_v53 = vadd.f32 %v2968_v26, %v3859_v32 }
 0x169   :  { %v3978_v25 = vpop.f32.mrf.mxu1  ;;  %v3980_v34 = vpop.f32.mrf.mxu0 }
 0x16a   :  { %5578 = vst [vmem:[#allocation24_spill] sm:$0xff] %v3998_v53 }
 0x16b   :  { %v3985_v49 = vpop.f32.mrf.mxu1  ;;  %v1033_v8 = vpop.f32.mrf.mxu0 }
 0x16c   :  { %1796 = vrot.lane.b32.xlu0 %v3970_v0, %s3374_s20  ;;  %1657 = vrot.lane.b32.xlu1 %v3983_v41, %s3373_s0 }
 0x16d   :  { %v3991_v14 = vpop.f32.mrf.mxu1  ;;  %v3993_v57 = vpop.f32.mrf.mxu0 }
 0x16f   :  { %v3995_v9 = vpop.f32.mrf.mxu1  ;;  %v1036_v4 = vpop.f32.mrf.mxu0 }
 0x170   :  { %1937 = vrot.lane.b32.xlu0 %v3970_v0, %s3375_s21  ;;  %1798 = vrot.lane.b32.xlu1 %v3983_v41, %s3374_s20  ;;  %v4019_v4 = vadd.f32 %v2969_v56, %v3863_v36  ;;  %v4043_v56 = vadd.f32 %v3915_v33, %v3851_v24 }
 0x171   :  { %v4004_v12 = vpop.f32.mrf.mxu1  ;;  %v4006_v22 = vpop.f32.mrf.mxu0 }
 0x172   :  { %5579 = vst [vmem:[#allocation25_spill] sm:$0xff] %v4019_v4  ;;  %5580 = vst [vmem:[#allocation26_spill] sm:$0xff] %v4043_v56 }
 0x173   :  { %v4008_v8 = vpop.f32.mrf.mxu1  ;;  %v1041_v42 = vpop.f32.mrf.mxu0 }
 0x174   :  { %1939 = vrot.lane.b32.xlu1 %v3983_v41, %s3375_s21  ;;  %2287 = vrot.lane.b32.xlu0 %v3998_v53, %s3373_s0 }
 0x175   :  { %v4014_v32 = vpop.f32.mrf.mxu1  ;;  %v4016_v26 = vpop.f32.mrf.mxu0 }
 0x177   :  { %v4021_v0 = vpop.f32.mrf.mxu1  ;;  %v1044_v30 = vpop.f32.mrf.mxu0 }
 0x178   :  { %2569 = vrot.lane.b32.xlu0 %v3998_v53, %s3375_s21  ;;  %2289 = vrot.lane.b32.xlu1 %v4019_v4, %s3373_s0 }
 0x179   :  { %v4027_v42 = vpop.f32.mrf.mxu1  ;;  %v4029_v41 = vpop.f32.mrf.mxu0 }
 0x17b   :  { %v4031_v21 = vpop.f32.mrf.mxu1  ;;  %v1049_v43 = vpop.f32.mrf.mxu0 }
 0x17c   :  { %2428 = vrot.lane.b32.xlu0 %v3998_v53, %s3374_s20  ;;  %2571 = vrot.lane.b32.xlu1 %v4019_v4, %s3375_s21 }
 0x17d   :  { %v4037_v36 = vpop.f32.mrf.mxu1  ;;  %v4039_v30 = vpop.f32.mrf.mxu0 }
 0x17f   :  { %v4045_v6 = vpop.f32.mrf.mxu1  ;;  %v1052_v39 = vpop.f32.mrf.mxu0 }
 0x180   :  { %2283 = vrot.lane.b32.xlu0 %v4043_v56, %s3373_s0  ;;  %2430 = vrot.lane.b32.xlu1 %v4019_v4, %s3374_s20 }
 0x181   :  { %v4051_v43 = vpop.f32.mrf.mxu1  ;;  %v4053_v53 = vpop.f32.mrf.mxu0 }
 0x183   :  { %v4059_v51 = vpop.f32.mrf.mxu1  ;;  %v1057_v24 = vpop.f32.mrf.mxu0 }
 0x184   :  { %2565 = vrot.lane.b32.xlu0 %v4043_v56, %s3375_s21  ;;  %2285 = vrot.lane.b32.xlu1 %v4057_v61, %s3373_s0 }
 0x185   :  { %v4065_v39 = vpop.f32.mrf.mxu1  ;;  %v4067_v33 = vpop.f32.mrf.mxu0 }
 0x187   :  { %v4069_v4 = vpop.f32.mrf.mxu1  ;;  %v1060_v47 = vpop.f32.mrf.mxu0 }
 0x188   :  { %2424 = vrot.lane.b32.xlu0 %v4043_v56, %s3374_s20  ;;  %2567 = vrot.lane.b32.xlu1 %v4057_v61, %s3375_s21 }
 0x189   :  { %v4079_v38 = vpop.f32.mrf.mxu1  ;;  %v4081_v24 = vpop.f32.mrf.mxu0 }
 0x18b   :  { %v1065_v27 = vpop.f32.mrf.mxu0  ;;  %v4087_v47 = vpop.f32.mrf.mxu1 }
 0x18c   :  { %2426 = vrot.lane.b32.xlu1 %v4057_v61, %s3374_s20  ;;  %2295 = vrot.lane.b32.xlu0 %v4073_v28, %s3373_s0 }
 0x18d   :  { %v4089_v48 = vpop.f32.mrf.mxu0  ;;  %v4099_v27 = vpop.f32.mrf.mxu1 }
 0x18f   :  { %v1068_v56 = vpop.f32.mrf.mxu0  ;;  %v4107_v52 = vpop.f32.mrf.mxu1 }
 0x190   :  { %2577 = vrot.lane.b32.xlu0 %v4073_v28, %s3375_s21  ;;  %2297 = vrot.lane.b32.xlu1 %v4093_v60, %s3373_s0  ;;  %v4113_v56 = vadd.f32 %v3936_v46, %v3867_v40 }
 0x191   :  { %v4101_v61 = vpop.f32.mrf.mxu0 }
 0x192   :  { %5584 = vst [vmem:[#allocation30_spill] sm:$0xff] %v4113_v56 }
 0x193   :  { %v1073_v23 = vpop.f32.mrf.mxu0 }
 0x194   :  { %2436 = vrot.lane.b32.xlu0 %v4073_v28, %s3374_s20  ;;  %2579 = vrot.lane.b32.xlu1 %v4093_v60, %s3375_s21  ;;  %v3000_v23 = vpop.f32.mrf.mxu1 }
 0x195   :  { %v4109_v16 = vpop.f32.mrf.mxu0 }
 0x197   :  { %v1076_v35 = vpop.f32.mrf.mxu0 }
 0x198   :  { %2291 = vrot.lane.b32.xlu0 %v4113_v56, %s3373_s0  ;;  %2438 = vrot.lane.b32.xlu1 %v4093_v60, %s3374_s20  ;;  %v4129_v35 = vpop.f32.mrf.mxu1 }
 0x199   :  { %v4119_v28 = vpop.f32.mrf.mxu0 }
 0x19a   :  { %v3001_v44 = vpop.f32.mrf.mxu1 }
 0x19b   :  { %v1081_v11 = vpop.f32.mrf.mxu0 }
 0x19c   :  { %2573 = vrot.lane.b32.xlu0 %v4113_v56, %s3375_s21  ;;  %2293 = vrot.lane.b32.xlu1 %v4123_v31, %s3373_s0  ;;  %v4139_v11 = vadd.f32 %v3955_v62, %v3895_v13 }
 0x19d   :  { %v4131_v40 = vpop.f32.mrf.mxu0 }
 0x19e   :  { %5586 = vst [vmem:[#allocation32_spill] sm:$0xff] %v4139_v11 }
 0x19f   :  { %v1084_v46 = vpop.f32.mrf.mxu0 }
 0x1a0   :  { %2432 = vrot.lane.b32.xlu0 %v4113_v56, %s3374_s20  ;;  %2575 = vrot.lane.b32.xlu1 %v4123_v31, %s3375_s21  ;;  %v4147_v46 = vpop.f32.mrf.mxu1 }
 0x1a1   :  { %v4141_v54 = vpop.f32.mrf.mxu0 }
 0x1a2   :  { %v3004_v13 = vpop.f32.mrf.mxu1 }
 0x1a3   :  { %v1089_v60 = vpop.f32.mrf.mxu0 }
 0x1a4   :  { %2434 = vrot.lane.b32.xlu1 %v4123_v31, %s3374_s20  ;;  %1816 = vrot.lane.b32.xlu0 %v4139_v11, %s3373_s0  ;;  %v4157_v60 = vadd.f32 %v3959_v2, %v3881_v58  ;;  %v4161_v31 = vadd.f32 %v3965_v20, %v3901_v18 }
 0x1a5   :  { %v4149_v56 = vpop.f32.mrf.mxu0 }
 0x1a7   :  { %v1092_v7 = vpop.f32.mrf.mxu0 }
 0x1a8   :  { %1957 = vrot.lane.b32.xlu0 %v4139_v11, %s3374_s20  ;;  %1483 = vrot.lane.b32.xlu1 %v4139_v11, %s3375_s21  ;;  %v1392_v7 = vpop.f32.mrf.mxu1 }
 0x1a9   :  { %v1095_v62 = vpop.f32.mrf.mxu0 }
 0x1aa   :  { %v4163_v19 = vadd.f32 %v3000_v23, %v1095_v62  ;;  %v3005_v58 = vpop.f32.mrf.mxu1 }
 0x1ab   :  { %v1097_v15 = vpop.f32.mrf.mxu0 }
 0x1ac   :  { %5587 = vst [vmem:[#allocation33_spill] sm:$0xff] %v4163_v19  ;;  %1479 = vrot.lane.b32.xlu0 %v4157_v60, %s3375_s21  ;;  %1485 = vrot.lane.b32.xlu1 %v4161_v31, %s3375_s21  ;;  %v1395_v20 = vpop.f32.mrf.mxu1 }
 0x1ad   :  { %v1098_v11 = vpop.f32.mrf.mxu0 }
 0x1ae   :  { %v4169_v59 = vadd.f32 %v3001_v44, %v1098_v11 }
 0x1af   :  { %v1100_v55 = vpop.f32.mrf.mxu0 }
 0x1b0   :  { %5588 = vst [vmem:[#allocation34_spill] sm:$0xff] %v4169_v59  ;;  %1812 = vrot.lane.b32.xlu0 %v4157_v60, %s3373_s0  ;;  %1818 = vrot.lane.b32.xlu1 %v4161_v31, %s3373_s0  ;;  %v4183_v55 = vadd.f32 %v3972_v17, %v3887_v5 }
 0x1b1   :  { %v1103_v18 = vpop.f32.mrf.mxu0 }
 0x1b2   :  { %v4175_v15 = vadd.f32 %v1392_v7, %v1103_v18  ;;  %v4191_v7 = vadd.f32 %v3978_v25, %v3934_v45  ;;  %v4209_v25 = vadd.f32 %v3991_v14, %v3944_v50  ;;  %v4231_v50 = vadd.f32 %v3985_v49, %v3910_v29 }
 0x1b3   :  { %v1105_v2 = vpop.f32.mrf.mxu0 }
 0x1b4   :  { %5589 = vst [vmem:[#allocation35_spill] sm:$0xff] %v4175_v15  ;;  %1953 = vrot.lane.b32.xlu0 %v4157_v60, %s3374_s20  ;;  %1959 = vrot.lane.b32.xlu1 %v4161_v31, %s3374_s20  ;;  %5591 = vst [vmem:[#allocation37_spill] sm:$0xff] %v4191_v7 }
 0x1b5   :  { %v1106_v23 = vpop.f32.mrf.mxu0  ;;  %5594 = vst [vmem:[#allocation40_spill] sm:$0xff] %v4209_v25 }
 0x1b6   :  { %v4185_v11 = vpop.permute.xlu0 %1651  ;;  %v4187_v44 = vadd.f32 %v1395_v20, %v1106_v23 }
 0x1b7   :  { %v1108_v62 = vpop.f32.mrf.mxu0 }
 0x1b8   :  { %5590 = vst [vmem:[#allocation36_spill] sm:$0xff] %v4187_v44  ;;  %1481 = vrot.lane.b32.xlu0 %v4183_v55, %s3375_s21  ;;  %1814 = vrot.lane.b32.xlu1 %v4183_v55, %s3373_s0 }
 0x1b9   :  { %v1111_v18 = vpop.f32.mrf.mxu0 }
 0x1ba   :  { %v4197_v2 = vpop.permute.xlu0 %1792  ;;  %v4199_v5 = vpop.permute.xlu1 %1653  ;;  %v4201_v17 = vadd.f32 %v3004_v13, %v1111_v18 }
 0x1bb   :  { %5592 = vst [vmem:[#allocation38_spill] sm:$0xff] %v4197_v2  ;;  %v1113_v20 = vpop.f32.mrf.mxu0 }
 0x1bc   :  { %5593 = vst [vmem:[#allocation39_spill] sm:$0xff] %v4201_v17  ;;  %1955 = vrot.lane.b32.xlu1 %v4183_v55, %s3374_s20  ;;  %1491 = vrot.lane.b32.xlu0 %v4191_v7, %s3375_s21 }
 0x1bd   :  { %v1114_v45 = vpop.f32.mrf.mxu0 }
 0x1be   :  { %v4211_v23 = vpop.permute.xlu0 %1933  ;;  %v4213_v62 = vpop.permute.xlu1 %1794  ;;  %v4215_v2 = vadd.f32 %v3005_v58, %v1114_v45  ;;  %v4243_v45 = vadd.f32 %v3995_v9, %v3921_v37 }
 0x1bf   :  { %v1116_v13 = vpop.f32.mrf.mxu0 }
 0x1c0   :  { %1824 = vrot.lane.b32.xlu0 %v4191_v7, %s3373_s0  ;;  %1493 = vrot.lane.b32.xlu1 %v4209_v25, %s3375_s21 }
 0x1c2   :  { %v4221_v18 = vpop.permute.xlu0 %1647  ;;  %v4223_v20 = vpop.permute.xlu1 %1935 }
 0x1c4   :  { %1965 = vrot.lane.b32.xlu0 %v4191_v7, %s3374_s20  ;;  %1826 = vrot.lane.b32.xlu1 %v4209_v25, %s3373_s0 }
 0x1c6   :  { %v4233_v14 = vpop.permute.xlu0 %1788  ;;  %v4235_v58 = vpop.permute.xlu1 %1649 }
 0x1c7   :  { %5595 = vst [vmem:[#allocation41_spill] sm:$0xff] %v4233_v14 }
 0x1c8   :  { %1487 = vrot.lane.b32.xlu0 %v4231_v50, %s3375_s21  ;;  %1967 = vrot.lane.b32.xlu1 %v4209_v25, %s3374_s20  ;;  %v4259_v25 = vadd.f32 %v4004_v12, %v3980_v34  ;;  %v4275_v34 = vadd.f32 %v4014_v32, %v3993_v57  ;;  %v4295_v57 = vadd.f32 %v4008_v8, %v3957_v1 }
 0x1ca   :  { %v4245_v13 = vpop.permute.xlu0 %1929  ;;  %v4247_v7 = vpop.permute.xlu1 %1790  ;;  %5598 = vst [vmem:[#allocation44_spill] sm:$0xff] %v4259_v25  ;;  %5601 = vst [vmem:[#allocation47_spill] sm:$0xff] %v4275_v34 }
 0x1cb   :  { %5596 = vst [vmem:[#allocation42_spill] sm:$0xff] %v4247_v7 }
 0x1cc   :  { %1820 = vrot.lane.b32.xlu0 %v4231_v50, %s3373_s0  ;;  %1489 = vrot.lane.b32.xlu1 %v4243_v45, %s3375_s21 }
 0x1ce   :  { %v4253_v29 = vpop.permute.xlu1 %1931  ;;  %v4255_v49 = vpop.permute.xlu0 %1659 }
 0x1cf   :  { %5597 = vst [vmem:[#allocation43_spill] sm:$0xff] %v4255_v49 }
 0x1d0   :  { %1961 = vrot.lane.b32.xlu0 %v4231_v50, %s3374_s20  ;;  %1822 = vrot.lane.b32.xlu1 %v4243_v45, %s3373_s0 }
 0x1d2   :  { %v4265_v37 = vpop.permute.xlu0 %1800  ;;  %v4267_v9 = vpop.permute.xlu1 %1661 }
 0x1d3   :  { %5599 = vst [vmem:[#allocation45_spill] sm:$0xff] %v4265_v37  ;;  %5600 = vst [vmem:[#allocation46_spill] sm:$0xff] %v4267_v9 }
 0x1d4   :  { %1963 = vrot.lane.b32.xlu1 %v4243_v45, %s3374_s20  ;;  %2122 = vrot.lane.b32.xlu0 %v4259_v25, %s3375_s21 }
 0x1d6   :  { %v4277_v12 = vpop.permute.xlu0 %1941  ;;  %v4279_v7 = vpop.permute.xlu1 %1802 }
 0x1d7   :  { %5602 = vst [vmem:[#allocation48_spill] sm:$0xff] %v4277_v12  ;;  %5603 = vst [vmem:[#allocation49_spill] sm:$0xff] %v4279_v7 }
 0x1d8   :  { %2593 = vrot.lane.b32.xlu0 %v4259_v25, %s3374_s20  ;;  %2124 = vrot.lane.b32.xlu1 %v4275_v34, %s3375_s21 }
 0x1da   :  { %v4285_v37 = vpop.permute.xlu0 %1655  ;;  %v4287_v9 = vpop.permute.xlu1 %1943 }
 0x1db   :  { %5604 = vst [vmem:[#allocation50_spill] sm:$0xff] %v4287_v9 }
 0x1dc   :  { %2452 = vrot.lane.b32.xlu0 %v4259_v25, %s3373_s0  ;;  %2595 = vrot.lane.b32.xlu1 %v4275_v34, %s3374_s20  ;;  %v4307_v25 = vadd.f32 %v4021_v0, %v3967_v10 }
 0x1de   :  { %v4297_v32 = vpop.permute.xlu0 %1796  ;;  %v4299_v7 = vpop.permute.xlu1 %1657 }
 0x1df   :  { %5605 = vst [vmem:[#allocation51_spill] sm:$0xff] %v4297_v32 }
 0x1e0   :  { %2118 = vrot.lane.b32.xlu0 %v4295_v57, %s3375_s21  ;;  %2454 = vrot.lane.b32.xlu1 %v4275_v34, %s3373_s0  ;;  %v4323_v34 = vadd.f32 %v4027_v42, %v4029_v41  ;;  %v4339_v41 = vadd.f32 %v4037_v36, %v4039_v30  ;;  %v4363_v36 = vadd.f32 %v4045_v6, %v4016_v26 }
 0x1e1   :  { %v4383_v6 = vadd.f32 %v4059_v51, %v4053_v53 }
 0x1e2   :  { %v4309_v9 = vpop.permute.xlu0 %1937  ;;  %v4311_v12 = vpop.permute.xlu1 %1798  ;;  %5614 = vst [vmem:[#allocation60_spill] sm:$0xff] %v4363_v36 }
 0x1e3   :  { %5606 = vst [vmem:[#allocation52_spill] sm:$0xff] %v4311_v12  ;;  %5616 = vst [vmem:[#allocation62_spill] sm:$0xff] %v4383_v6 }
 0x1e4   :  { %2589 = vrot.lane.b32.xlu0 %v4295_v57, %s3374_s20  ;;  %2120 = vrot.lane.b32.xlu1 %v4307_v25, %s3375_s21 }
 0x1e6   :  { %v4317_v1 = vpop.permute.xlu1 %1939  ;;  %v4319_v8 = vpop.permute.xlu0 %2287 }
 0x1e7   :  { %5607 = vst [vmem:[#allocation53_spill] sm:$0xff] %v4319_v8 }
 0x1e8   :  { %2448 = vrot.lane.b32.xlu0 %v4295_v57, %s3373_s0  ;;  %2591 = vrot.lane.b32.xlu1 %v4307_v25, %s3374_s20 }
 0x1ea   :  { %v4329_v10 = vpop.permute.xlu0 %2569  ;;  %v4331_v0 = vpop.permute.xlu1 %2289 }
 0x1eb   :  { %5608 = vst [vmem:[#allocation54_spill] sm:$0xff] %v4329_v10  ;;  %5609 = vst [vmem:[#allocation55_spill] sm:$0xff] %v4331_v0  ;;  %v4351_v0 = vadd.f32 %v4031_v21, %v4006_v22 }
 0x1ec   :  { %2450 = vrot.lane.b32.xlu1 %v4307_v25, %s3373_s0  ;;  %2130 = vrot.lane.b32.xlu0 %v4323_v34, %s3375_s21 }
 0x1ed   :  { %5612 = vst [vmem:[#allocation58_spill] sm:$0xff] %v4351_v0 }
 0x1ee   :  { %v4341_v42 = vpop.permute.xlu0 %2428  ;;  %v4343_v8 = vpop.permute.xlu1 %2571 }
 0x1ef   :  { %5610 = vst [vmem:[#allocation56_spill] sm:$0xff] %v4341_v42  ;;  %5611 = vst [vmem:[#allocation57_spill] sm:$0xff] %v4343_v8 }
 0x1f0   :  { %2601 = vrot.lane.b32.xlu0 %v4323_v34, %s3374_s20  ;;  %2132 = vrot.lane.b32.xlu1 %v4339_v41, %s3375_s21 }
 0x1f2   :  { %v4353_v10 = vpop.permute.xlu0 %2283  ;;  %v4355_v12 = vpop.permute.xlu1 %2430 }
 0x1f3   :  { %5613 = vst [vmem:[#allocation59_spill] sm:$0xff] %v4355_v12 }
 0x1f4   :  { %2126 = vrot.lane.b32.xlu0 %v4351_v0, %s3375_s21  ;;  %2603 = vrot.lane.b32.xlu1 %v4339_v41, %s3374_s20 }
 0x1f6   :  { %v4365_v30 = vpop.permute.xlu0 %2565  ;;  %v4367_v42 = vpop.permute.xlu1 %2285 }
 0x1f8   :  { %2597 = vrot.lane.b32.xlu0 %v4351_v0, %s3374_s20  ;;  %2128 = vrot.lane.b32.xlu1 %v4363_v36, %s3375_s21 }
 0x1fa   :  { %v4373_v21 = vpop.permute.xlu0 %2424  ;;  %v4375_v22 = vpop.permute.xlu1 %2567 }
 0x1fb   :  { %5615 = vst [vmem:[#allocation61_spill] sm:$0xff] %v4373_v21  ;;  %v4395_v21 = vadd.f32 %v4069_v4, %v4067_v33  ;;  %v4415_v4 = vadd.f32 %v4051_v43, %v4081_v24 }
 0x1fc   :  { %2456 = vrot.lane.b32.xlu0 %v4351_v0, %s3373_s0  ;;  %2599 = vrot.lane.b32.xlu1 %v4363_v36, %s3374_s20 }
 0x1fd   :  { %5619 = vst [vmem:[#allocation65_spill] sm:$0xff] %v4395_v21 }
 0x1fe   :  { %v4385_v26 = vpop.permute.xlu1 %2426  ;;  %v4387_v12 = vpop.permute.xlu0 %2295 }
 0x1ff   :  { %5617 = vst [vmem:[#allocation63_spill] sm:$0xff] %v4385_v26  ;;  %5618 = vst [vmem:[#allocation64_spill] sm:$0xff] %v4387_v12 }
 0x200   :  { %2458 = vrot.lane.b32.xlu1 %v4363_v36, %s3373_s0  ;;  %1511 = vrot.lane.b32.xlu0 %v4383_v6, %s3374_s20 }
 0x202   :  { %v4397_v0 = vpop.permute.xlu0 %2577  ;;  %v4399_v8 = vpop.permute.xlu1 %2297 }
 0x203   :  { %5620 = vst [vmem:[#allocation66_spill] sm:$0xff] %v4397_v0  ;;  %5621 = vst [vmem:[#allocation67_spill] sm:$0xff] %v4399_v8 }
 0x204   :  { %1671 = vrot.lane.b32.xlu0 %v4383_v6, %s3375_s21  ;;  %1513 = vrot.lane.b32.xlu1 %v4395_v21, %s3374_s20 }
 0x206   :  { %v4405_v51 = vpop.permute.xlu0 %2436  ;;  %v4407_v53 = vpop.permute.xlu1 %2579 }
 0x207   :  { %5622 = vst [vmem:[#allocation68_spill] sm:$0xff] %v4405_v51  ;;  %5623 = vst [vmem:[#allocation69_spill] sm:$0xff] %v4407_v53  ;;  %v4427_v51 = vadd.f32 %v4065_v39, %v4089_v48  ;;  %v4447_v39 = vadd.f32 %v4087_v47, %v4101_v61 }
 0x208   :  { %1977 = vrot.lane.b32.xlu0 %v4383_v6, %s3373_s0  ;;  %1673 = vrot.lane.b32.xlu1 %v4395_v21, %s3375_s21 }
 0x209   :  { %5630 = vst [vmem:[#allocation76_spill] sm:$0xff] %v4447_v39 }
 0x20a   :  { %v4417_v33 = vpop.permute.xlu0 %2291  ;;  %v4419_v26 = vpop.permute.xlu1 %2438 }
 0x20b   :  { %5624 = vst [vmem:[#allocation70_spill] sm:$0xff] %v4417_v33  ;;  %5625 = vst [vmem:[#allocation71_spill] sm:$0xff] %v4419_v26 }
 0x20c   :  { %1979 = vrot.lane.b32.xlu1 %v4395_v21, %s3373_s0  ;;  %1515 = vrot.lane.b32.xlu0 %v4415_v4, %s3374_s20 }
 0x20e   :  { %v4429_v36 = vpop.permute.xlu0 %2573  ;;  %v4431_v53 = vpop.permute.xlu1 %2293 }
 0x20f   :  { %5626 = vst [vmem:[#allocation72_spill] sm:$0xff] %v4429_v36  ;;  %5627 = vst [vmem:[#allocation73_spill] sm:$0xff] %v4431_v53  ;;  %v4491_v36 = vadd.f32 %v4099_v27, %v4131_v40 }
 0x210   :  { %1675 = vrot.lane.b32.xlu0 %v4415_v4, %s3375_s21  ;;  %1517 = vrot.lane.b32.xlu1 %v4427_v51, %s3374_s20 }
 0x211   :  { %5635 = vst [vmem:[#allocation81_spill] sm:$0xff] %v4491_v36 }
 0x212   :  { %v4437_v43 = vpop.permute.xlu0 %2432  ;;  %v4439_v24 = vpop.permute.xlu1 %2575 }
 0x213   :  { %5628 = vst [vmem:[#allocation74_spill] sm:$0xff] %v4437_v43  ;;  %5629 = vst [vmem:[#allocation75_spill] sm:$0xff] %v4439_v24  ;;  %v4459_v43 = vadd.f32 %v4107_v52, %v4109_v16  ;;  %v4479_v52 = vadd.f32 %v4079_v38, %v4119_v28  ;;  %v3008_v28 = vpop.f32.mrf.mxu1 }
 0x214   :  { %1981 = vrot.lane.b32.xlu0 %v4415_v4, %s3373_s0  ;;  %1677 = vrot.lane.b32.xlu1 %v4427_v51, %s3375_s21  ;;  %v4510_v27 = vadd.f32 %v3008_v28, %v3829_v63 }
 0x215   :  { %5632 = vst [vmem:[#allocation78_spill] sm:$0xff] %v4459_v43  ;;  %5633 = vst [vmem:[#allocation79_spill] sm:$0xff] %v4479_v52  ;;  %v1408_v12 = vpop.f32.mrf.mxu1 }
 0x216   :  { %v4449_v48 = vpop.permute.xlu1 %2434  ;;  %v4451_v26 = vpop.permute.xlu0 %1816 }
 0x217   :  { %5631 = vst [vmem:[#allocation77_spill] sm:$0xff] %v4449_v48 }
 0x218   :  { %1983 = vrot.lane.b32.xlu1 %v4427_v51, %s3373_s0  ;;  %1519 = vrot.lane.b32.xlu0 %v4447_v39, %s3374_s20 }
 0x21a   :  { %v4461_v53 = vpop.permute.xlu0 %1957  ;;  %v4463_v24 = vpop.permute.xlu1 %1483 }
 0x21c   :  { %1679 = vrot.lane.b32.xlu0 %v4447_v39, %s3375_s21  ;;  %1521 = vrot.lane.b32.xlu1 %v4459_v43, %s3374_s20 }
 0x21e   :  { %v4469_v61 = vpop.permute.xlu0 %1479  ;;  %v4471_v47 = vpop.permute.xlu1 %1485 }
 0x220   :  { %1985 = vrot.lane.b32.xlu0 %v4447_v39, %s3373_s0  ;;  %1681 = vrot.lane.b32.xlu1 %v4459_v43, %s3375_s21  ;;  %v3009_v39 = vpop.f32.mrf.mxu1 }
 0x221   :  { %v4521_v32 = vadd.f32 %v3009_v39, %v3831_v3  ;;  %v4541_v3 = vadd.f32 %v4129_v35, %v4141_v54 }
 0x222   :  { %v4481_v16 = vpop.permute.xlu0 %1812  ;;  %v4483_v48 = vpop.permute.xlu1 %1818 }
 0x223   :  { %5634 = vst [vmem:[#allocation80_spill] sm:$0xff] %v4481_v16  ;;  %5642 = vst [vmem:[#allocation88_spill] sm:$0xff] %v4541_v3 }
 0x224   :  { %1987 = vrot.lane.b32.xlu1 %v4459_v43, %s3373_s0  ;;  %1523 = vrot.lane.b32.xlu0 %v4479_v52, %s3374_s20 }
 0x226   :  { %v4493_v0 = vpop.permute.xlu0 %1953  ;;  %v4495_v33 = vpop.permute.xlu1 %1959 }
 0x228   :  { %1683 = vrot.lane.b32.xlu0 %v4479_v52, %s3375_s21  ;;  %1525 = vrot.lane.b32.xlu1 %v4491_v36, %s3374_s20 }
 0x22a   :  { %v4501_v38 = vpop.permute.xlu0 %1481  ;;  %v4503_v8 = vpop.permute.xlu1 %1814 }
 0x22b   :  { %5636 = vst [vmem:[#allocation82_spill] sm:$0xff] %v4503_v8 }
 0x22c   :  { %1989 = vrot.lane.b32.xlu0 %v4479_v52, %s3373_s0  ;;  %1685 = vrot.lane.b32.xlu1 %v4491_v36, %s3375_s21 }
 0x22e   :  { %v4512_v40 = vpop.permute.xlu1 %1955  ;;  %v4514_v43 = vpop.permute.xlu0 %1491 }
 0x22f   :  { %5637 = vst [vmem:[#allocation83_spill] sm:$0xff] %v4514_v43 }
 0x230   :  { %1547 = vrot.lane.b32.xlu0 %v4510_v27, %s3373_s0  ;;  %1991 = vrot.lane.b32.xlu1 %v4491_v36, %s3373_s0 }
 0x232   :  { %v4523_v52 = vpop.permute.xlu0 %1824  ;;  %v4525_v21 = vpop.permute.xlu1 %1493 }
 0x233   :  { %5638 = vst [vmem:[#allocation84_spill] sm:$0xff] %v4523_v52  ;;  %5639 = vst [vmem:[#allocation85_spill] sm:$0xff] %v4525_v21 }
 0x234   :  { %1699 = vrot.lane.b32.xlu0 %v4510_v27, %s3374_s20  ;;  %1549 = vrot.lane.b32.xlu1 %v4521_v32, %s3373_s0 }
 0x236   :  { %v4531_v63 = vpop.permute.xlu0 %1965  ;;  %v4533_v28 = vpop.permute.xlu1 %1826 }
 0x237   :  { %5640 = vst [vmem:[#allocation86_spill] sm:$0xff] %v4531_v63  ;;  %5641 = vst [vmem:[#allocation87_spill] sm:$0xff] %v4533_v28  ;;  %v4553_v28 = vadd.f32 %v4147_v46, %v4149_v56  ;;  %v5649_v56 = vld [vmem:[#allocation2_spill] sm:$0xff] }
 0x238   :  { %1840 = vrot.lane.b32.xlu0 %v4510_v27, %s3375_s21  ;;  %1701 = vrot.lane.b32.xlu1 %v4521_v32, %s3374_s20  ;;  %v4572_v46 = vadd.f32 %v1408_v12, %v5649_v56 }
 0x239   :  { %5645 = vst [vmem:[#allocation91_spill] sm:$0xff] %v4553_v28 }
 0x23a   :  { %v4543_v39 = vpop.permute.xlu0 %1487  ;;  %v4545_v36 = vpop.permute.xlu1 %1967 }
 0x23b   :  { %5643 = vst [vmem:[#allocation89_spill] sm:$0xff] %v4543_v39  ;;  %5644 = vst [vmem:[#allocation90_spill] sm:$0xff] %v4545_v36  ;;  %v1411_v39 = vpop.f32.mrf.mxu1 }
 0x23c   :  { %1842 = vrot.lane.b32.xlu1 %v4521_v32, %s3375_s21  ;;  %2150 = vrot.lane.b32.xlu0 %v4541_v3, %s3374_s20 }
 0x23d   :  { %v3012_v12 = vpop.f32.mrf.mxu1 }
 0x23e   :  { %v4555_v52 = vpop.permute.xlu0 %1820  ;;  %v4557_v63 = vpop.permute.xlu1 %1489 }
 0x23f   :  { %5646 = vst [vmem:[#allocation92_spill] sm:$0xff] %v4555_v52  ;;  %5647 = vst [vmem:[#allocation93_spill] sm:$0xff] %v4557_v63  ;;  %v1424_v8 = vpop.f32.mrf.mxu1 }
 0x240   :  { %2307 = vrot.lane.b32.xlu0 %v4541_v3, %s3375_s21  ;;  %2152 = vrot.lane.b32.xlu1 %v4553_v28, %s3374_s20 }
 0x242   :  { %v4563_v35 = vpop.permute.xlu0 %1961  ;;  %v4565_v54 = vpop.permute.xlu1 %1822 }
 0x243   :  { %5648 = vst [vmem:[#allocation94_spill] sm:$0xff] %v4565_v54  ;;  %v5651_v54 = vld [vmem:[#allocation3_spill] sm:$0xff] }
 0x244   :  { %2613 = vrot.lane.b32.xlu0 %v4541_v3, %s3373_s0  ;;  %2309 = vrot.lane.b32.xlu1 %v4553_v28, %s3375_s21  ;;  %v4583_v36 = vadd.f32 %v1411_v39, %v5651_v54  ;;  %v5656_v39 = vld [vmem:[#allocation6_spill] sm:$0xff] }
 0x245   :  { %v4602_v54 = vadd.f32 %v3012_v12, %v5656_v39 }
 0x246   :  { %v4574_v52 = vpop.permute.xlu1 %1963  ;;  %v4576_v63 = vpop.permute.xlu0 %2122 }
 0x247   :  { %5650 = vst [vmem:[#allocation2_spill] sm:$0xff] %v4576_v63  ;;  %5657 = vst [vmem:[#allocation6_spill] sm:$0xff] %v4602_v54 }
 0x248   :  { %1543 = vrot.lane.b32.xlu0 %v4572_v46, %s3373_s0  ;;  %2615 = vrot.lane.b32.xlu1 %v4553_v28, %s3373_s0 }
 0x24a   :  { %v4585_v3 = vpop.permute.xlu0 %2593  ;;  %v4587_v21 = vpop.permute.xlu1 %2124 }
 0x24b   :  { %5652 = vst [vmem:[#allocation3_spill] sm:$0xff] %v4585_v3  ;;  %5653 = vst [vmem:[#allocation95_spill] sm:$0xff] %v4587_v21  ;;  %v3013_v3 = vpop.f32.mrf.mxu1 }
 0x24c   :  { %1695 = vrot.lane.b32.xlu0 %v4572_v46, %s3374_s20  ;;  %1545 = vrot.lane.b32.xlu1 %v4583_v36, %s3373_s0 }
 0x24e   :  { %v4593_v56 = vpop.permute.xlu0 %2452  ;;  %v4595_v63 = vpop.permute.xlu1 %2595 }
 0x24f   :  { %5654 = vst [vmem:[#allocation96_spill] sm:$0xff] %v4593_v56  ;;  %5655 = vst [vmem:[#allocation97_spill] sm:$0xff] %v4595_v63  ;;  %v5660_v56 = vld [vmem:[#allocation7_spill] sm:$0xff] }
 0x250   :  { %1836 = vrot.lane.b32.xlu0 %v4572_v46, %s3375_s21  ;;  %1697 = vrot.lane.b32.xlu1 %v4583_v36, %s3374_s20  ;;  %v4613_v63 = vadd.f32 %v3013_v3, %v5660_v56 }
 0x252   :  { %v4604_v28 = vpop.permute.xlu0 %2118  ;;  %v4606_v21 = vpop.permute.xlu1 %2454  ;;  %5661 = vst [vmem:[#allocation7_spill] sm:$0xff] %v4613_v63 }
 0x253   :  { %5658 = vst [vmem:[#allocation98_spill] sm:$0xff] %v4604_v28  ;;  %5659 = vst [vmem:[#allocation99_spill] sm:$0xff] %v4606_v21 }
 0x254   :  { %1555 = vrot.lane.b32.xlu0 %v4602_v54, %s3373_s0  ;;  %1838 = vrot.lane.b32.xlu1 %v4583_v36, %s3375_s21 }
 0x256   :  { %v4615_v6 = vpop.permute.xlu0 %2589  ;;  %v4617_v43 = vpop.permute.xlu1 %2120 }
 0x257   :  { %5662 = vst [vmem:[#allocation100_spill] sm:$0xff] %v4617_v43 }
 0x258   :  { %1707 = vrot.lane.b32.xlu0 %v4602_v54, %s3374_s20  ;;  %1557 = vrot.lane.b32.xlu1 %v4613_v63, %s3373_s0 }
 0x25a   :  { %v4623_v12 = vpop.permute.xlu0 %2448  ;;  %v4625_v39 = vpop.permute.xlu1 %2591 }
 0x25b   :  { %5663 = vst [vmem:[#allocation101_spill] sm:$0xff] %v4623_v12 }
 0x25c   :  { %1848 = vrot.lane.b32.xlu0 %v4602_v54, %s3375_s21  ;;  %1709 = vrot.lane.b32.xlu1 %v4613_v63, %s3374_s20 }
 0x25e   :  { %v4631_v3 = vpop.permute.xlu1 %2450  ;;  %v4633_v56 = vpop.permute.xlu0 %2130 }
 0x25f   :  { %5664 = vst [vmem:[#allocation102_spill] sm:$0xff] %v4631_v3  ;;  %5665 = vst [vmem:[#allocation103_spill] sm:$0xff] %v4633_v56  ;;  %v5670_v56 = vld [vmem:[#allocation4_spill] sm:$0xff] }
 0x260   :  { %1850 = vrot.lane.b32.xlu1 %v4613_v63, %s3375_s21  ;;  %2154 = vrot.lane.b32.xlu0 %v4163_v19, %s3374_s20  ;;  %v1427_v63 = vpop.f32.mrf.mxu1 }
 0x262   :  { %v4639_v21 = vpop.permute.xlu0 %2601  ;;  %v4641_v12 = vpop.permute.xlu1 %2132 }
 0x263   :  { %5666 = vst [vmem:[#allocation104_spill] sm:$0xff] %v4639_v21  ;;  %5667 = vst [vmem:[#allocation105_spill] sm:$0xff] %v4641_v12  ;;  %v4656_v21 = vadd.f32 %v1424_v8, %v5670_v56 }
 0x264   :  { %2311 = vrot.lane.b32.xlu0 %v4163_v19, %s3375_s21  ;;  %2156 = vrot.lane.b32.xlu1 %v4169_v59, %s3374_s20 }
 0x266   :  { %v4647_v43 = vpop.permute.xlu0 %2126  ;;  %v4649_v3 = vpop.permute.xlu1 %2603 }
 0x267   :  { %5668 = vst [vmem:[#allocation106_spill] sm:$0xff] %v4647_v43  ;;  %5669 = vst [vmem:[#allocation107_spill] sm:$0xff] %v4649_v3  ;;  %v5673_v3 = vld [vmem:[#allocation5_spill] sm:$0xff] }
 0x268   :  { %2617 = vrot.lane.b32.xlu0 %v4163_v19, %s3373_s0  ;;  %2313 = vrot.lane.b32.xlu1 %v4169_v59, %s3375_s21  ;;  %v4667_v43 = vadd.f32 %v1427_v63, %v5673_v3  ;;  %v1719_v63 = vsel %vm1567_vm2, %v4221_v18, %v4157_v60  ;;  %v1720_v60 = vsel %vm1567_vm2, %v4235_v58, %v4183_v55  ;;  %v5678_v55 = vld [vmem:[#allocation11_spill] sm:$0xff] }
 0x269   :  { %v2001_v18 = vsel %vm1567_vm2, %v4245_v13, %v4493_v0  ;;  %v2002_v13 = vsel %vm1567_vm2, %v4253_v29, %v4512_v40  ;;  %v5679_v40 = vld [vmem:[#allocation8_spill] sm:$0xff] }
 0x26a   :  { %v4658_v12 = vpop.permute.xlu0 %2597  ;;  %v4660_v28 = vpop.permute.xlu1 %2128 }
 0x26b   :  { %5671 = vst [vmem:[#allocation4_spill] sm:$0xff] %v4658_v12  ;;  %5672 = vst [vmem:[#allocation108_spill] sm:$0xff] %v4660_v28  ;;  %v3016_v28 = vpop.f32.mrf.mxu1 }
 0x26c   :  { %1551 = vrot.lane.b32.xlu0 %v4656_v21, %s3373_s0  ;;  %2619 = vrot.lane.b32.xlu1 %v4169_v59, %s3373_s0 }
 0x26e   :  { %v4669_v19 = vpop.permute.xlu0 %2456  ;;  %v4671_v54 = vpop.permute.xlu1 %2599 }
 0x26f   :  { %5674 = vst [vmem:[#allocation5_spill] sm:$0xff] %v4669_v19  ;;  %5675 = vst [vmem:[#allocation109_spill] sm:$0xff] %v4671_v54  ;;  %v1440_v19 = vpop.f32.mrf.mxu1  ;;  %v5677_v54 = vld [vmem:[#allocation10_spill] sm:$0xff] }
 0x270   :  { %1703 = vrot.lane.b32.xlu0 %v4656_v21, %s3374_s20  ;;  %1553 = vrot.lane.b32.xlu1 %v4667_v43, %s3373_s0  ;;  %v4698_v12 = vadd.f32 %v3016_v28, %v5677_v54 }
 0x271   :  { %v3017_v49 = vpop.f32.mrf.mxu1 }
 0x272   :  { %v4677_v8 = vpop.permute.xlu1 %2458  ;;  %v4679_v56 = vpop.permute.xlu0 %1511  ;;  %v4719_v58 = vadd.f32 %v3017_v49, %v5678_v55 }
 0x273   :  { %5676 = vst [vmem:[#allocation110_spill] sm:$0xff] %v4677_v8  ;;  %v1443_v55 = vpop.f32.mrf.mxu1 }
 0x274   :  { %1844 = vrot.lane.b32.xlu0 %v4656_v21, %s3375_s21  ;;  %1705 = vrot.lane.b32.xlu1 %v4667_v43, %s3374_s20 }
 0x276   :  { %v1672_v3 = vpop.permute.xlu0 %1671  ;;  %v4688_v59 = vpop.permute.xlu1 %1513 }
 0x277   :  { %v4691_v8 = vsel %vm1576_vm3, %v1719_v63, %v1672_v3 }
 0x278   :  { %1846 = vrot.lane.b32.xlu1 %v4667_v43, %s3375_s21  ;;  %2158 = vrot.lane.b32.xlu0 %v4175_v15, %s3374_s20 }
 0x27a   :  { %v1978_v63 = vpop.permute.xlu0 %1977  ;;  %v1674_v3 = vpop.permute.xlu1 %1673 }
 0x27b   :  { %v2009_v14 = vsel %vm1576_vm3, %v2001_v18, %v1978_v63  ;;  %v4708_v16 = vsel %vm1576_vm3, %v1720_v60, %v1674_v3  ;;  %v4750_v18 = vadd.f32 %v1440_v19, %v5679_v40 }
 0x27c   :  { %v4712_v28 = vsel %vm1585_vm4, %v2009_v14, %v4572_v46  ;;  %2186 = vrot.lane.b32.xlu0 %v4698_v12, %s3373_s0  ;;  %2160 = vrot.lane.b32.xlu1 %v4187_v44, %s3374_s20 }
 0x27e   :  { %v1980_v0 = vpop.permute.xlu1 %1979  ;;  %v1516_v54 = vpop.permute.xlu0 %1515 }
 0x27f   :  { %v2010_v60 = vsel %vm1576_vm3, %v2002_v13, %v1980_v0  ;;  %v5681_v13 = vld [vmem:[#allocation9_spill] sm:$0xff] }
 0x280   :  { %v4727_v14 = vsel %vm1585_vm4, %v2010_v60, %v4583_v36  ;;  %2315 = vrot.lane.b32.xlu0 %v4175_v15, %s3375_s21  ;;  %2188 = vrot.lane.b32.xlu1 %v4719_v58, %s3373_s0  ;;  %v4761_v0 = vadd.f32 %v1443_v55, %v5681_v13  ;;  %v1723_v60 = vsel %vm1567_vm2, %v4285_v37, %v4231_v50 }
 0x281   :  { %v1724_v55 = vsel %vm1567_vm2, %v4299_v7, %v4243_v45  ;;  %v2005_v50 = vsel %vm1567_vm2, %v4309_v9, %v4563_v35  ;;  %v5686_v7 = vld [vmem:[#allocation14_spill] sm:$0xff]  ;;  %v2006_v9 = vsel %vm1567_vm2, %v4317_v1, %v4574_v52 }
 0x282   :  { %v4733_v49 = vpop.permute.xlu0 %1675  ;;  %v4735_v46 = vpop.permute.xlu1 %1517 }
 0x284   :  { %2335 = vrot.lane.b32.xlu0 %v4698_v12, %s3374_s20  ;;  %2317 = vrot.lane.b32.xlu1 %v4187_v44, %s3375_s21 }
 0x286   :  { %v4741_v29 = vpop.permute.xlu0 %1981  ;;  %v4743_v36 = vpop.permute.xlu1 %1677 }
 0x288   :  { %2621 = vrot.lane.b32.xlu0 %v4175_v15, %s3373_s0  ;;  %2337 = vrot.lane.b32.xlu1 %v4719_v58, %s3374_s20  ;;  %v3020_v15 = vpop.f32.mrf.mxu1 }
 0x289   :  { %v4794_v45 = vadd.f32 %v3020_v15, %v5686_v7  ;;  %v5688_v15 = vld [vmem:[#allocation15_spill] sm:$0xff]  ;;  %v5689_v7 = vld [vmem:[#allocation16_spill] sm:$0xff] }
 0x28a   :  { %v4752_v63 = vpop.permute.xlu1 %1983  ;;  %v4754_v3 = vpop.permute.xlu0 %1519 }
 0x28b   :  { %5680 = vst [vmem:[#allocation10_spill] sm:$0xff] %v4754_v3 }
 0x28c   :  { %2182 = vrot.lane.b32.xlu0 %v4750_v18, %s3373_s0  ;;  %2623 = vrot.lane.b32.xlu1 %v4187_v44, %s3373_s0  ;;  %v1456_v44 = vpop.f32.mrf.mxu1 }
 0x28e   :  { %v1680_v19 = vpop.permute.xlu0 %1679  ;;  %v4766_v40 = vpop.permute.xlu1 %1521 }
 0x28f   :  { %5682 = vst [vmem:[#allocation11_spill] sm:$0xff] %v4766_v40  ;;  %v4769_v3 = vsel %vm1576_vm3, %v1723_v60, %v1680_v19 }
 0x290   :  { %5683 = vst [vmem:[#allocation8_spill] sm:$0xff] %v4769_v3  ;;  %2331 = vrot.lane.b32.xlu0 %v4750_v18, %s3374_s20  ;;  %2184 = vrot.lane.b32.xlu1 %v4761_v0, %s3373_s0  ;;  %v5692_v3 = vld [vmem:[#allocation12_spill] sm:$0xff] }
 0x292   :  { %v1986_v37 = vpop.permute.xlu0 %1985  ;;  %v1682_v13 = vpop.permute.xlu1 %1681 }
 0x293   :  { %v2013_v60 = vsel %vm1576_vm3, %v2005_v50, %v1986_v37  ;;  %v4783_v19 = vsel %vm1576_vm3, %v1724_v55, %v1682_v13  ;;  %v3021_v50 = vpop.f32.mrf.mxu1 }
 0x294   :  { %5684 = vst [vmem:[#allocation9_spill] sm:$0xff] %v4783_v19  ;;  %v4787_v40 = vsel %vm1585_vm4, %v2013_v60, %v4656_v21  ;;  %2333 = vrot.lane.b32.xlu1 %v4761_v0, %s3374_s20  ;;  %2162 = vrot.lane.b32.xlu0 %v4201_v17, %s3374_s20  ;;  %v4811_v13 = vadd.f32 %v3021_v50, %v5688_v15 }
 0x295   :  { %5685 = vst [vmem:[#allocation111_spill] sm:$0xff] %v4787_v40  ;;  %v4850_v40 = vadd.f32 %v1456_v44, %v5692_v3 }
 0x296   :  { %v1988_v35 = vpop.permute.xlu1 %1987  ;;  %v4799_v55 = vpop.permute.xlu0 %1523 }
 0x297   :  { %v2014_v21 = vsel %vm1576_vm3, %v2006_v9, %v1988_v35  ;;  %v1570_v9 = vsel %vm1567_vm2, %v5689_v7, %v4463_v24  ;;  %v4835_v35 = vld [vmem:[%s5514_s2] ss:$0 sm:$0xff]  ;;  %v5691_v24 = vld [vmem:[#allocation32_spill] sm:$0xff] }
 0x298   :  { %v4804_v37 = vsel %vm1585_vm4, %v2014_v21, %v4667_v43  ;;  %2194 = vrot.lane.b32.xlu0 %v4794_v45, %s3373_s0  ;;  %2164 = vrot.lane.b32.xlu1 %v4215_v2, %s3374_s20  ;;  %v1579_v50 = vsel %vm1576_vm3, %v1570_v9, %v1516_v54  ;;  %v1721_v7 = vsel %vm1567_vm2, %v4185_v11, %v5691_v24  ;;  %v1459_v54 = vpop.f32.mrf.mxu1 }
 0x299   :  { %5687 = vst [vmem:[#allocation14_spill] sm:$0xff] %v4804_v37  ;;  %v2003_v9 = vsel %vm1567_vm2, %v4211_v23, %v4461_v53  ;;  %v1729_v11 = vsel %vm1576_vm3, %v1721_v7, %v4733_v49  ;;  %v1722_v49 = vsel %vm1567_vm2, %v4199_v5, %v4161_v31 }
 0x29a   :  { %v4813_v1 = vpop.permute.xlu0 %1683  ;;  %v4815_v52 = vpop.permute.xlu1 %1525  ;;  %v2011_v3 = vsel %vm1576_vm3, %v2003_v9, %v4741_v29  ;;  %v2004_v9 = vsel %vm1567_vm2, %v4223_v20, %v4495_v33 }
 0x29c   :  { %2319 = vrot.lane.b32.xlu0 %v4201_v17, %s3375_s21  ;;  %2196 = vrot.lane.b32.xlu1 %v4811_v13, %s3373_s0 }
 0x29e   :  { %v4821_v43 = vpop.permute.xlu0 %1989  ;;  %v4823_v60 = vpop.permute.xlu1 %1685 }
 0x2a0   :  { %2343 = vrot.lane.b32.xlu0 %v4794_v45, %s3374_s20  ;;  %2321 = vrot.lane.b32.xlu1 %v4215_v2, %s3375_s21 }
 0x2a2   :  { %v1548_v21 = vpop.permute.xlu0 %1547  ;;  %v4838_v15 = vpop.permute.xlu1 %1991 }
 0x2a3   :  { %5690 = vst [vmem:[#allocation15_spill] sm:$0xff] %v4838_v15  ;;  %v1588_v37 = vsel %vm1585_vm4, %v1579_v50, %v1548_v21  ;;  %v4861_v21 = vld [vmem:[%s5514_s2 + $0x1] ss:$0 sm:$0xff] }
 0x2a4   :  { %v1601_v19 = vadd.f32 %v4835_v35, %v1588_v37  ;;  %2625 = vrot.lane.b32.xlu0 %v4201_v17, %s3373_s0  ;;  %2345 = vrot.lane.b32.xlu1 %v4811_v13, %s3374_s20  ;;  %v5693_v37 = vld [vmem:[#allocation17_spill] sm:$0xff] }
 0x2a5   :  { %v1571_v50 = vsel %vm1567_vm2, %v5693_v37, %v4471_v47 }
 0x2a6   :  { %v1580_v44 = vsel %vm1576_vm3, %v1571_v50, %v4735_v46  ;;  %v1609_v24 = vmul.f32 0.5, %v1601_v19  ;;  %v1700_v23 = vpop.permute.xlu0 %1699  ;;  %v1550_v53 = vpop.permute.xlu1 %1549  ;;  %v5694_v46 = vld [vmem:[#allocation13_spill] sm:$0xff]  ;;  %v5695_v19 = vld [vmem:[#allocation38_spill] sm:$0xff]  ;;  %v1730_v50 = vsel %vm1576_vm3, %v1722_v49, %v4743_v36 }
 0x2a7   :  { %v1737_v17 = vsel %vm1585_vm4, %v1729_v11, %v1700_v23  ;;  %v1589_v47 = vsel %vm1585_vm4, %v1580_v44, %v1550_v53  ;;  %v4881_v29 = vadd.f32 %v1459_v54, %v5694_v46  ;;  %v1862_v7 = vsel %vm1567_vm2, %v5695_v19, %v4451_v26  ;;  %v4896_v54 = vld [vmem:[%s5514_s2 + $0x3] ss:$0 sm:$0xff] }
 0x2a8   :  { %3208 = vtanh.f32 %v1609_v24  ;;  %v1750_v37 = vadd.f32 %v4861_v21, %v1737_v17  ;;  %v1602_v15 = vadd.f32 %v4835_v35, %v1589_v47  ;;  %2190 = vrot.lane.b32.xlu0 %v4850_v40, %s3373_s0  ;;  %2627 = vrot.lane.b32.xlu1 %v4215_v2, %s3373_s0  ;;  %v2019_v17 = vsel %vm1585_vm4, %v2011_v3, %v4510_v27 }
 0x2a9   :  { %v2012_v26 = vsel %vm1576_vm3, %v2004_v9, %v4752_v63  ;;  %v2032_v3 = vadd.f32 %v4896_v54, %v2019_v17  ;;  %v1870_v33 = vsel %vm1576_vm3, %v1862_v7, %v4415_v4  ;;  %v4914_v63 = vld [vmem:[%s5514_s2 + $0x2] ss:$0 sm:$0xff]  ;;  %v1863_v47 = vsel %vm1567_vm2, %v4213_v62, %v4483_v48 }
 0x2aa   :  { %v1758_v11 = vmul.f32 0.5, %v1750_v37  ;;  %v1610_v44 = vmul.f32 0.5, %v1602_v15  ;;  %v1841_v31 = vpop.permute.xlu0 %1840  ;;  %v1702_v5 = vpop.permute.xlu1 %1701  ;;  %v2020_v36 = vsel %vm1585_vm4, %v2012_v26, %v4521_v32  ;;  %v2355_v37 = vsel %vm1567_vm2, %v4353_v10, %v4295_v57 }
 0x2ab   :  { %v1738_v27 = vsel %vm1585_vm4, %v1730_v50, %v1702_v5  ;;  %v1878_v15 = vsel %vm1585_vm4, %v1870_v33, %v1841_v31  ;;  %v2033_v32 = vadd.f32 %v4896_v54, %v2020_v36  ;;  %v1871_v62 = vsel %vm1576_vm3, %v1863_v47, %v4427_v51  ;;  %v2048_v36 = vld [vmem:[%s5515_s3 + $0x10] sm:$0xff] }
 0x2ac   :  { %3210 = vtanh.f32 %v1758_v11  ;;  %v1751_v20 = vadd.f32 %v4861_v21, %v1738_v27  ;;  %2339 = vrot.lane.b32.xlu0 %v4850_v40, %s3374_s20  ;;  %2192 = vrot.lane.b32.xlu1 %v4881_v29, %s3373_s0  ;;  %v1891_v4 = vadd.f32 %v4914_v63, %v1878_v15  ;;  %v2356_v10 = vsel %vm1567_vm2, %v4367_v42, %v4307_v25  ;;  %v5696_v42 = vld [vmem:[#allocation18_spill] sm:$0xff] }
 0x2ad   :  { %3212 = vtanh.f32 %v1610_v44  ;;  %v2637_v51 = vsel %vm1567_vm2, %v4365_v30, %v4615_v6  ;;  %v1568_v30 = vsel %vm1567_vm2, %v5696_v42, %v4469_v61  ;;  %v2638_v26 = vsel %vm1567_vm2, %v4375_v22, %v4625_v39 }
 0x2ae   :  { %v1759_v24 = vmul.f32 0.5, %v1751_v20  ;;  %v1843_v23 = vpop.permute.xlu1 %1842  ;;  %v4917_v53 = vpop.permute.xlu0 %2150  ;;  %3214 = vtanh.f32 %v2032_v3  ;;  %v1899_v57 = vmul.f32 0.5, %v1891_v4 }
 0x2af   :  { %v1879_v19 = vsel %vm1585_vm4, %v1871_v62, %v1843_v23 }
 0x2b0   :  { %2460 = vrot.lane.b32.xlu0 %v4323_v34, %s3373_s0  ;;  %2341 = vrot.lane.b32.xlu1 %v4881_v29, %s3374_s20  ;;  %3216 = vtanh.f32 %v1759_v24  ;;  %v1892_v11 = vadd.f32 %v4914_v63, %v1879_v19 }
 0x2b1   :  { %3218 = vtanh.f32 %v2033_v32  ;;  %v5697_v32 = vld [vmem:[#allocation19_spill] sm:$0xff] }
 0x2b2   :  { %v2308_v49 = vpop.permute.xlu0 %2307  ;;  %v4931_v46 = vpop.permute.xlu1 %2152  ;;  %3220 = vtanh.f32 %v1899_v57  ;;  %v1900_v24 = vmul.f32 0.5, %v1892_v11  ;;  %v1569_v4 = vsel %vm1567_vm2, %v5697_v32, %v4501_v38  ;;  %v2049_v38 = vld [vmem:[%s5515_s3 + $0x18] sm:$0xff] }
 0x2b3   :  { %v4936_v48 = vsel %vm1576_vm3, %v2355_v37, %v2308_v49  ;;  %v2030_v49 = vadd.f32 %v4896_v54, %v4712_v28 }
 0x2b4   :  { %2472 = vrot.lane.b32.xlu0 %v4750_v18, %s3375_s21  ;;  %2462 = vrot.lane.b32.xlu1 %v4339_v41, %s3373_s0  ;;  %3222 = vtanh.f32 %v1900_v24  ;;  %v5701_v24 = vld [vmem:[#allocation43_spill] sm:$0xff] }
 0x2b5   :  { %v3209_v7 = vpop.eup %3208 }
 0x2b6   :  { %v1625_v17 = vmul.f32 0.5, %v3209_v7  ;;  %v2614_v9 = vpop.permute.xlu0 %2613  ;;  %v2310_v50 = vpop.permute.xlu1 %2309 }
 0x2b7   :  { %v2645_v44 = vsel %vm1576_vm3, %v2637_v51, %v2614_v9  ;;  %v4952_v31 = vsel %vm1576_vm3, %v2356_v10, %v2310_v50  ;;  %v1578_v9 = vsel %vm1576_vm3, %v1569_v4, %v4688_v59  ;;  %v5699_v59 = vld [vmem:[#allocation41_spill] sm:$0xff]  ;;  %v5704_v4 = vld [vmem:[#allocation40_spill] sm:$0xff] }
 0x2b8   :  { %v4956_v5 = vsel %vm1585_vm4, %v2645_v44, %v4750_v18  ;;  %2476 = vrot.lane.b32.xlu0 %v4698_v12, %s3375_s21  ;;  %2474 = vrot.lane.b32.xlu1 %v4761_v0, %s3375_s21  ;;  %v1577_v18 = vsel %vm1576_vm3, %v1568_v30, %v4679_v56  ;;  %v1633_v27 = vadd.f32 0.5, %v1625_v17 }
 0x2b9   :  { %v3211_v25 = vpop.eup %3210 }
 0x2ba   :  { %v3213_v6 = vpop.eup %3212  ;;  %v1774_v3 = vmul.f32 0.5, %v3211_v25  ;;  %v1544_v20 = vpop.permute.xlu0 %1543  ;;  %v5698_v25 = vld [vmem:[#allocation80_spill] sm:$0xff] }
 0x2bb   :  { %v2616_v33 = vpop.permute.xlu1 %2615  ;;  %v1626_v15 = vmul.f32 0.5, %v3213_v6  ;;  %v1586_v61 = vsel %vm1585_vm4, %v1577_v18, %v1544_v20  ;;  %v3215_v56 = vpop.eup %3214  ;;  %v1860_v42 = vsel %vm1567_vm2, %v5699_v59, %v5698_v25 }
 0x2bc   :  { %v2646_v23 = vsel %vm1576_vm3, %v2638_v26, %v2616_v33  ;;  %v1782_v47 = vadd.f32 0.5, %v1774_v3  ;;  %v1599_v22 = vadd.f32 %v4835_v35, %v1586_v61  ;;  %2480 = vrot.lane.b32.xlu0 %v4850_v40, %s3375_s21  ;;  %2478 = vrot.lane.b32.xlu1 %v4719_v58, %s3375_s21  ;;  %v2064_v62 = vmul.f32 %v3215_v56, %v1633_v27 }
 0x2bd   :  { %v4978_v39 = vsel %vm1585_vm4, %v2646_v23, %v4761_v0  ;;  %v3217_v37 = vpop.eup %3216  ;;  %v1634_v10 = vadd.f32 0.5, %v1626_v15  ;;  %v2031_v33 = vadd.f32 %v4896_v54, %v4727_v14  ;;  %v5700_v15 = vld [vmem:[#allocation37_spill] sm:$0xff]  ;;  %v5702_v23 = vld [vmem:[#allocation83_spill] sm:$0xff] }
 0x2be   :  { %v2056_v19 = vmul.f32 %v2048_v36, %v1782_v47  ;;  %v1607_v7 = vmul.f32 0.5, %v1599_v22  ;;  %v1696_v0 = vpop.permute.xlu0 %1695  ;;  %v1775_v51 = vmul.f32 0.5, %v3217_v37  ;;  %v3219_v44 = vpop.eup %3218  ;;  %v1725_v61 = vsel %vm1567_vm2, %v5701_v24, %v5700_v15  ;;  %v5703_v47 = vld [vmem:[#allocation20_spill] sm:$0xff]  ;;  %v5705_v37 = vld [vmem:[#allocation46_spill] sm:$0xff]  ;;  %v5715_v15 = vld [vmem:[#allocation65_spill] sm:$0xff] }
 0x2bf   :  { %v1546_v57 = vpop.permute.xlu1 %1545  ;;  %v1735_v17 = vsel %vm1585_vm4, %v4691_v8, %v1696_v0  ;;  %v2065_v27 = vmul.f32 %v3219_v44, %v1634_v10  ;;  %v1574_v22 = vsel %vm1567_vm2, %v5703_v47, %v5702_v23  ;;  %v1726_v14 = vsel %vm1567_vm2, %v5705_v37, %v5704_v4  ;;  %v5712_v44 = vld [vmem:[#allocation48_spill] sm:$0xff]  ;;  %v5718_v4 = vld [vmem:[#allocation6_spill] sm:$0xff] }
 0x2c0   :  { %v2072_v50 = vadd.f32 %v2064_v62, %v2056_v19  ;;  %3224 = vtanh.f32 %v1607_v7  ;;  %v1748_v28 = vadd.f32 %v4861_v21, %v1735_v17  ;;  %2484 = vrot.lane.b32.xlu0 %v4794_v45, %s3375_s21  ;;  %2482 = vrot.lane.b32.xlu1 %v4881_v29, %s3375_s21  ;;  %v1783_v11 = vadd.f32 0.5, %v1775_v51  ;;  %v5706_v62 = vld [vmem:[#allocation62_spill] sm:$0xff] }
 0x2c1   :  { %v1587_v8 = vsel %vm1585_vm4, %v1578_v9, %v1546_v57  ;;  %v1868_v19 = vsel %vm1576_vm3, %v1860_v42, %v5706_v62  ;;  %v5707_v17 = vld [vmem:[#allocation82_spill] sm:$0xff]  ;;  %v1733_v59 = vsel %vm1576_vm3, %v1725_v61, %v4813_v1 }
 0x2c2   :  { %3226 = vtanh.f32 %v2072_v50  ;;  %2096 = vst [vmem:[%s5516_s5 + $0x10] sm:$0xff] %v2072_v50  ;;  %v1756_v30 = vmul.f32 0.5, %v1748_v28  ;;  %v1600_v6 = vadd.f32 %v4835_v35, %v1587_v8  ;;  %v1837_v26 = vpop.permute.xlu0 %1836  ;;  %v2057_v3 = vmul.f32 %v2049_v38, %v1783_v11  ;;  %v5708_v9 = vld [vmem:[#allocation42_spill] sm:$0xff]  ;;  %v5709_v50 = vld [vmem:[#allocation85_spill] sm:$0xff] }
 0x2c3   :  { %v1698_v18 = vpop.permute.xlu1 %1697  ;;  %3228 = vtanh.f32 %v2030_v49  ;;  %v1583_v49 = vsel %vm1576_vm3, %v1574_v22, %v4799_v55  ;;  %v1876_v57 = vsel %vm1585_vm4, %v1868_v19, %v1837_v26  ;;  %v1861_v55 = vsel %vm1567_vm2, %v5708_v9, %v5707_v17  ;;  %v5710_v38 = vld [vmem:[#allocation21_spill] sm:$0xff]  ;;  %v5711_v8 = vld [vmem:[#allocation86_spill] sm:$0xff]  ;;  %v5719_v9 = vld [vmem:[#allocation15_spill] sm:$0xff] }
 0x2c4   :  { %v1736_v20 = vsel %vm1585_vm4, %v4708_v16, %v1698_v18  ;;  %3230 = vtanh.f32 %v1756_v30  ;;  %v1608_v36 = vmul.f32 0.5, %v1600_v6  ;;  %2486 = vrot.lane.b32.xlu1 %v4811_v13, %s3375_s21  ;;  %v2073_v56 = vadd.f32 %v2065_v27, %v2057_v3  ;;  %v3221_v16 = vpop.eup %3220 }
 0x2c5   :  { %v1749_v32 = vadd.f32 %v4861_v21, %v1736_v20  ;;  %v1575_v28 = vsel %vm1567_vm2, %v5710_v38, %v5709_v50  ;;  %v2007_v25 = vsel %vm1567_vm2, %v5712_v44, %v5711_v8  ;;  %v1915_v42 = vmul.f32 0.5, %v3221_v16  ;;  %v5713_v20 = vld [vmem:[#allocation84_spill] sm:$0xff] }
 0x2c6   :  { %3232 = vtanh.f32 %v1608_v36  ;;  %v1556_v7 = vpop.permute.xlu0 %1555  ;;  %2097 = vst [vmem:[%s5516_s5 + $0x18] sm:$0xff] %v2073_v56  ;;  %v1584_v30 = vsel %vm1576_vm3, %v1575_v28, %v4815_v52  ;;  %v2015_v6 = vsel %vm1576_vm3, %v2007_v25, %v4821_v43  ;;  %v1889_v26 = vadd.f32 %v4914_v63, %v1876_v57  ;;  %v3223_v52 = vpop.eup %3222  ;;  %v5720_v25 = vld [vmem:[#allocation79_spill] sm:$0xff] }
 0x2c7   :  { %v1839_v0 = vpop.permute.xlu1 %1838  ;;  %3234 = vtanh.f32 %v2073_v56  ;;  %v1757_v10 = vmul.f32 0.5, %v1749_v32  ;;  %v1592_v51 = vsel %vm1585_vm4, %v1583_v49, %v1556_v7  ;;  %v1869_v1 = vsel %vm1576_vm3, %v1861_v55, %v5715_v15  ;;  %v5716_v56 = vld [vmem:[#allocation90_spill] sm:$0xff] }
 0x2c8   :  { %3236 = vtanh.f32 %v2031_v33  ;;  %v1605_v11 = vadd.f32 %v4835_v35, %v1592_v51  ;;  %v5714_v33 = vld [vmem:[#allocation45_spill] sm:$0xff]  ;;  %v1877_v43 = vsel %vm1585_vm4, %v1869_v1, %v1839_v0  ;;  %v5717_v32 = vld [vmem:[#allocation50_spill] sm:$0xff]  ;;  %v2023_v37 = vsel %vm1585_vm4, %v2015_v6, %v5718_v4 }
 0x2c9   :  { %3238 = vtanh.f32 %v1757_v10  ;;  %v1866_v36 = vsel %vm1567_vm2, %v5714_v33, %v5713_v20  ;;  %v2008_v16 = vsel %vm1567_vm2, %v5717_v32, %v5716_v56  ;;  %v1734_v49 = vsel %vm1576_vm3, %v1726_v14, %v4823_v60 }
 0x2ca   :  { %v1613_v18 = vmul.f32 0.5, %v1605_v11  ;;  %v1708_v27 = vpop.permute.xlu0 %1707  ;;  %v1923_v62 = vadd.f32 0.5, %v1915_v42  ;;  %v1897_v7 = vmul.f32 0.5, %v1889_v26  ;;  %v2016_v55 = vsel %vm1576_vm3, %v2008_v16, %v5719_v9  ;;  %v2047_v9 = vld [vmem:[%s5515_s3 + $0x8] sm:$0xff] }
 0x2cb   :  { %v1558_v3 = vpop.permute.xlu1 %1557  ;;  %v1741_v24 = vsel %vm1585_vm4, %v1733_v59, %v1708_v27  ;;  %v1916_v50 = vmul.f32 0.5, %v3223_v52  ;;  %v1890_v38 = vadd.f32 %v4914_v63, %v1877_v43  ;;  %v2036_v8 = vadd.f32 %v4896_v54, %v2023_v37  ;;  %v5722_v52 = vld [vmem:[#allocation87_spill] sm:$0xff]  ;;  %v5723_v43 = vld [vmem:[#allocation49_spill] sm:$0xff] }
 0x2cc   :  { %v1593_v61 = vsel %vm1585_vm4, %v1584_v30, %v1558_v3  ;;  %3240 = vtanh.f32 %v1613_v18  ;;  %v1754_v23 = vadd.f32 %v4861_v21, %v1741_v24  ;;  %v1874_v59 = vsel %vm1576_vm3, %v1866_v36, %v5720_v25  ;;  %v5721_v30 = vld [vmem:[#allocation7_spill] sm:$0xff]  ;;  %v2046_v36 = vld [vmem:[%s5515_s3] sm:$0xff] }
 0x2cd   :  { %v1606_v47 = vadd.f32 %v4835_v35, %v1593_v61  ;;  %v3225_v22 = vpop.eup %3224  ;;  %v2024_v6 = vsel %vm1585_vm4, %v2016_v55, %v5721_v30  ;;  %v1924_v33 = vadd.f32 0.5, %v1916_v50  ;;  %v1898_v15 = vmul.f32 0.5, %v1890_v38 }
 0x2ce   :  { %v1623_v19 = vmul.f32 0.5, %v3225_v22  ;;  %v1762_v57 = vmul.f32 0.5, %v1754_v23  ;;  %v1849_v10 = vpop.permute.xlu0 %1848  ;;  %v1867_v23 = vsel %vm1567_vm2, %v5723_v43, %v5722_v52  ;;  %v2037_v32 = vadd.f32 %v4896_v54, %v2024_v6 }
 0x2cf   :  { %v1614_v0 = vmul.f32 0.5, %v1606_v47  ;;  %v1710_v51 = vpop.permute.xlu1 %1709  ;;  %v3227_v17 = vpop.eup %3226  ;;  %v1882_v1 = vsel %vm1585_vm4, %v1874_v59, %v1849_v10  ;;  %v5725_v59 = vld [vmem:[#allocation89_spill] sm:$0xff] }
 0x2d0   :  { %v1742_v28 = vsel %vm1585_vm4, %v1734_v49, %v1710_v51  ;;  %v3229_v11 = vpop.eup %3228  ;;  %v2088_v60 = vmul.f32 %v3227_v17, %v1923_v62  ;;  %v1631_v14 = vadd.f32 0.5, %v1623_v19  ;;  %3242 = vtanh.f32 %v1762_v57 }
 0x2d1   :  { %v3231_v44 = vpop.eup %3230  ;;  %3244 = vtanh.f32 %v1614_v0  ;;  %v1755_v42 = vadd.f32 %v4861_v21, %v1742_v28  ;;  %v1895_v62 = vadd.f32 %v4914_v63, %v1882_v1  ;;  %v5724_v0 = vld [vmem:[#allocation81_spill] sm:$0xff] }
 0x2d2   :  { %2104 = vst [vmem:[%s5517_s4 + $0x10] sm:$0xff] %v2088_v60  ;;  %v2062_v26 = vmul.f32 %v3229_v11, %v1631_v14  ;;  %v1772_v18 = vmul.f32 0.5, %v3231_v44  ;;  %3246 = vtanh.f32 %v1897_v7  ;;  %v5081_v3 = vpop.permute.xlu0 %2154  ;;  %v1875_v10 = vsel %vm1576_vm3, %v1867_v23, %v5724_v0 }
 0x2d3   :  { %v1851_v27 = vpop.permute.xlu1 %1850  ;;  %v3233_v20 = vpop.eup %3232  ;;  %v1763_v24 = vmul.f32 0.5, %v1755_v42  ;;  %3248 = vtanh.f32 %v2036_v8  ;;  %v1903_v11 = vmul.f32 0.5, %v1895_v62  ;;  %v5726_v42 = vld [vmem:[#allocation22_spill] sm:$0xff] }
 0x2d4   :  { %v3235_v61 = vpop.eup %3234  ;;  %v1780_v47 = vadd.f32 0.5, %v1772_v18  ;;  %v1624_v22 = vmul.f32 0.5, %v3233_v20  ;;  %v1883_v55 = vsel %vm1585_vm4, %v1875_v10, %v1851_v27  ;;  %v1572_v30 = vsel %vm1567_vm2, %v5726_v42, %v5725_v59  ;;  %v5727_v18 = vld [vmem:[#allocation10_spill] sm:$0xff]  ;;  %v5733_v42 = vld [vmem:[#allocation92_spill] sm:$0xff] }
 0x2d5   :  { %v3237_v56 = vpop.eup %3236  ;;  %v2089_v16 = vmul.f32 %v3235_v61, %v1924_v33  ;;  %3250 = vtanh.f32 %v1763_v24  ;;  %v1896_v44 = vadd.f32 %v4914_v63, %v1883_v55  ;;  %v1581_v27 = vsel %vm1576_vm3, %v1572_v30, %v5727_v18  ;;  %v2052_v24 = vld [vmem:[%s5515_s3 + $0x30] sm:$0xff]  ;;  %v5734_v30 = vld [vmem:[#allocation51_spill] sm:$0xff] }
 0x2d6   :  { %v3239_v4 = vpop.eup %3238  ;;  %v2054_v37 = vmul.f32 %v2046_v36, %v1780_v47  ;;  %v1632_v49 = vadd.f32 0.5, %v1624_v22  ;;  %v5092_v19 = vpop.permute.xlu0 %2311  ;;  %3252 = vtanh.f32 %v1898_v15 }
 0x2d7   :  { %v5094_v7 = vpop.permute.xlu1 %2156  ;;  %2105 = vst [vmem:[%s5517_s4 + $0x18] sm:$0xff] %v2089_v16  ;;  %v1773_v57 = vmul.f32 0.5, %v3239_v4  ;;  %3254 = vtanh.f32 %v2037_v32  ;;  %v1904_v52 = vmul.f32 0.5, %v1896_v44  ;;  %v5729_v32 = vld [vmem:[#allocation23_spill] sm:$0xff] }
 0x2d8   :  { %v2070_v51 = vadd.f32 %v2062_v26, %v2054_v37  ;;  %v2063_v17 = vmul.f32 %v3237_v56, %v1632_v49  ;;  %v5728_v56 = vld [vmem:[#allocation93_spill] sm:$0xff]  ;;  %v5730_v4 = vld [vmem:[#allocation111_spill] sm:$0xff] }
 0x2d9   :  { %v3241_v50 = vpop.eup %3240  ;;  %v1781_v38 = vadd.f32 0.5, %v1773_v57  ;;  %v1573_v16 = vsel %vm1567_vm2, %v5729_v32, %v5728_v56  ;;  %v2034_v37 = vadd.f32 %v4896_v54, %v5730_v4 }
 0x2da   :  { %3256 = vtanh.f32 %v2070_v51  ;;  %2094 = vst [vmem:[%s5516_s5] sm:$0xff] %v2070_v51  ;;  %v1629_v28 = vmul.f32 0.5, %v3241_v50  ;;  %v5108_v8 = vpop.permute.xlu0 %2617  ;;  %v5731_v50 = vld [vmem:[#allocation8_spill] sm:$0xff] }
 0x2db   :  { %v5110_v60 = vpop.permute.xlu1 %2313  ;;  %v2055_v14 = vmul.f32 %v2047_v9, %v1781_v38  ;;  %3258 = vtanh.f32 %v1903_v11  ;;  %v5732_v11 = vld [vmem:[#allocation11_spill] sm:$0xff] }
 0x2dc   :  { %v1637_v20 = vadd.f32 0.5, %v1629_v28 }
 0x2dd   :  { %v3243_v25 = vpop.eup %3242  ;;  %v2071_v6 = vadd.f32 %v2063_v17, %v2055_v14  ;;  %v1582_v14 = vsel %vm1576_vm3, %v1573_v16, %v5732_v11  ;;  %v5736_v16 = vld [vmem:[#allocation76_spill] sm:$0xff] }
 0x2de   :  { %v3245_v26 = vpop.eup %3244  ;;  %v1778_v33 = vmul.f32 0.5, %v3243_v25  ;;  %v1552_v36 = vpop.permute.xlu0 %1551  ;;  %v2053_v25 = vld [vmem:[%s5515_s3 + $0x38] sm:$0xff] }
 0x2df   :  { %v5118_v15 = vpop.permute.xlu1 %2619  ;;  %v3247_v1 = vpop.eup %3246  ;;  %3260 = vtanh.f32 %v2071_v6  ;;  %2095 = vst [vmem:[%s5516_s5 + $0x8] sm:$0xff] %v2071_v6  ;;  %v1630_v61 = vmul.f32 0.5, %v3245_v26  ;;  %v1590_v43 = vsel %vm1585_vm4, %v1581_v27, %v1552_v36  ;;  %v1864_v6 = vsel %vm1567_vm2, %v5734_v30, %v5733_v42 }
 0x2e0   :  { %v1786_v23 = vadd.f32 0.5, %v1778_v33  ;;  %v1603_v47 = vadd.f32 %v4835_v35, %v1590_v43  ;;  %v3249_v22 = vpop.eup %3248  ;;  %v1913_v62 = vmul.f32 0.5, %v3247_v1  ;;  %3262 = vtanh.f32 %v1904_v52 }
 0x2e1   :  { %v2068_v57 = vmul.f32 %v3249_v22, %v1637_v20  ;;  %v1638_v9 = vadd.f32 0.5, %v1630_v61  ;;  %v1872_v4 = vsel %vm1576_vm3, %v1864_v6, %v5736_v16 }
 0x2e2   :  { %v3251_v49 = vpop.eup %3250  ;;  %v2060_v0 = vmul.f32 %v2052_v24, %v1786_v23  ;;  %v1611_v10 = vmul.f32 0.5, %v1603_v47  ;;  %v1704_v51 = vpop.permute.xlu0 %1703  ;;  %v1921_v20 = vadd.f32 0.5, %v1913_v62  ;;  %v5735_v47 = vld [vmem:[#allocation9_spill] sm:$0xff] }
 0x2e3   :  { %v1554_v17 = vpop.permute.xlu1 %1553  ;;  %v1779_v55 = vmul.f32 0.5, %v3251_v49  ;;  %v1739_v38 = vsel %vm1585_vm4, %v5731_v50, %v1704_v51  ;;  %v3253_v28 = vpop.eup %3252 }
 0x2e4   :  { %v2076_v44 = vadd.f32 %v2068_v57, %v2060_v0  ;;  %3264 = vtanh.f32 %v1611_v10  ;;  %v1752_v59 = vadd.f32 %v4861_v21, %v1739_v38  ;;  %v1591_v18 = vsel %vm1585_vm4, %v1582_v14, %v1554_v17  ;;  %v3255_v27 = vpop.eup %3254  ;;  %v5738_v38 = vld [vmem:[#allocation94_spill] sm:$0xff] }
 0x2e5   :  { %3266 = vtanh.f32 %v2034_v37  ;;  %v1787_v26 = vadd.f32 0.5, %v1779_v55  ;;  %v1604_v36 = vadd.f32 %v4835_v35, %v1591_v18  ;;  %v1914_v52 = vmul.f32 0.5, %v3253_v28  ;;  %v5737_v37 = vld [vmem:[#allocation14_spill] sm:$0xff]  ;;  %v5739_v28 = vld [vmem:[#allocation52_spill] sm:$0xff] }
 0x2e6   :  { %3268 = vtanh.f32 %v2076_v44  ;;  %2100 = vst [vmem:[%s5516_s5 + $0x30] sm:$0xff] %v2076_v44  ;;  %v1760_v33 = vmul.f32 0.5, %v1752_v59  ;;  %v1845_v1 = vpop.permute.xlu0 %1844  ;;  %v2069_v43 = vmul.f32 %v3255_v27, %v1638_v9  ;;  %v2035_v49 = vadd.f32 %v4896_v54, %v5737_v37  ;;  %v5740_v44 = vld [vmem:[#allocation2_spill] sm:$0xff] }
 0x2e7   :  { %v1706_v24 = vpop.permute.xlu1 %1705  ;;  %v3257_v61 = vpop.eup %3256  ;;  %v2061_v23 = vmul.f32 %v2053_v25, %v1787_v26  ;;  %v1612_v32 = vmul.f32 0.5, %v1604_v36  ;;  %v1880_v57 = vsel %vm1585_vm4, %v1872_v4, %v1845_v1  ;;  %v1922_v9 = vadd.f32 0.5, %v1914_v52  ;;  %v5741_v25 = vld [vmem:[#allocation24_spill] sm:$0xff]  ;;  %v5742_v27 = vld [vmem:[#allocation78_spill] sm:$0xff]  ;;  %v5743_v52 = vld [vmem:[#allocation3_spill] sm:$0xff] }
 0x2e8   :  { %v1740_v22 = vsel %vm1585_vm4, %v5735_v47, %v1706_v24  ;;  %v2086_v56 = vmul.f32 %v3257_v61, %v1921_v20  ;;  %3270 = vtanh.f32 %v1760_v33  ;;  %v3259_v17 = vpop.eup %3258  ;;  %v1865_v11 = vsel %vm1567_vm2, %v5739_v28, %v5738_v38  ;;  %v5745_v47 = vld [vmem:[#allocation95_spill] sm:$0xff] }
 0x2e9   :  { %v2077_v62 = vadd.f32 %v2069_v43, %v2061_v23  ;;  %v1753_v0 = vadd.f32 %v4861_v21, %v1740_v22  ;;  %3272 = vtanh.f32 %v1612_v32  ;;  %v1893_v14 = vadd.f32 %v4914_v63, %v1880_v57  ;;  %v5744_v43 = vld [vmem:[#allocation54_spill] sm:$0xff]  ;;  %v5746_v22 = vld [vmem:[#allocation25_spill] sm:$0xff] }
 0x2ea   :  { %2102 = vst [vmem:[%s5517_s4] sm:$0xff] %v2086_v56  ;;  %v5160_v51 = vpop.permute.xlu0 %2158  ;;  %v2208_v59 = vsel %vm1567_vm2, %v5741_v25, %v5740_v44  ;;  %v1919_v30 = vmul.f32 0.5, %v3259_v17  ;;  %v1873_v20 = vsel %vm1576_vm3, %v1865_v11, %v5742_v27  ;;  %v2639_v23 = vsel %vm1567_vm2, %v5744_v43, %v5743_v52  ;;  %v5747_v11 = vld [vmem:[#allocation44_spill] sm:$0xff]  ;;  %v5749_v25 = vld [vmem:[#allocation47_spill] sm:$0xff] }
 0x2eb   :  { %v1847_v10 = vpop.permute.xlu1 %1846  ;;  %3274 = vtanh.f32 %v2077_v62  ;;  %2101 = vst [vmem:[%s5516_s5 + $0x38] sm:$0xff] %v2077_v62  ;;  %v1761_v55 = vmul.f32 0.5, %v1753_v0  ;;  %v2216_v6 = vsel %vm1576_vm3, %v2208_v59, %v5081_v3  ;;  %v1901_v1 = vmul.f32 0.5, %v1893_v14  ;;  %v5748_v14 = vld [vmem:[#allocation53_spill] sm:$0xff]  ;;  %v5750_v59 = vld [vmem:[#allocation55_spill] sm:$0xff] }
 0x2ec   :  { %v3261_v50 = vpop.eup %3260  ;;  %3276 = vtanh.f32 %v2035_v49  ;;  %v1881_v24 = vsel %vm1585_vm4, %v1873_v20, %v1847_v10  ;;  %v2209_v56 = vsel %vm1567_vm2, %v5746_v22, %v5745_v47  ;;  %v1927_v16 = vadd.f32 0.5, %v1919_v30  ;;  %v5751_v30 = vld [vmem:[#allocation97_spill] sm:$0xff] }
 0x2ed   :  { %v2087_v42 = vmul.f32 %v3261_v50, %v1922_v9  ;;  %3278 = vtanh.f32 %v1761_v55  ;;  %v3263_v36 = vpop.eup %3262  ;;  %v2217_v4 = vsel %vm1576_vm3, %v2209_v56, %v5094_v7  ;;  %v2647_v17 = vsel %vm1576_vm3, %v2639_v23, %v5108_v8  ;;  %v5752_v8 = vld [vmem:[#allocation57_spill] sm:$0xff] }
 0x2ee   :  { %v2187_v26 = vpop.permute.xlu0 %2186  ;;  %v1920_v10 = vmul.f32 0.5, %v3263_v36  ;;  %v1894_v9 = vadd.f32 %v4914_v63, %v1881_v24  ;;  %3280 = vtanh.f32 %v1901_v1  ;;  %v2357_v44 = vsel %vm1567_vm2, %v5748_v14, %v5747_v11  ;;  %v2051_v11 = vld [vmem:[%s5515_s3 + $0x28] sm:$0xff] }
 0x2ef   :  { %v5174_v18 = vpop.permute.xlu1 %2160  ;;  %2103 = vst [vmem:[%s5517_s4 + $0x8] sm:$0xff] %v2087_v42  ;;  %v2224_v33 = vsel %vm1585_vm4, %v2216_v6, %v2187_v26  ;;  %v2358_v42 = vsel %vm1567_vm2, %v5750_v59, %v5749_v25  ;;  %v2640_v63 = vsel %vm1567_vm2, %v5752_v8, %v5751_v30  ;;  %v2365_v6 = vsel %vm1576_vm3, %v2357_v44, %v5092_v19 }
 0x2f0   :  { %v2237_v61 = vadd.f32 %v4835_v35, %v2224_v33  ;;  %v1928_v24 = vadd.f32 0.5, %v1920_v10  ;;  %v1902_v52 = vmul.f32 0.5, %v1894_v9  ;;  %v2648_v19 = vsel %vm1576_vm3, %v2640_v63, %v5118_v15 }
 0x2f1   :  { %v3265_v3 = vpop.eup %3264 }
 0x2f2   :  { %v3267_v32 = vpop.eup %3266  ;;  %v1627_v37 = vmul.f32 0.5, %v3265_v3  ;;  %v2245_v49 = vmul.f32 0.5, %v2237_v61  ;;  %v5192_v62 = vpop.permute.xlu0 %2315  ;;  %v2655_v61 = vsel %vm1585_vm4, %v2647_v17, %v4698_v12  ;;  %v2050_v3 = vld [vmem:[%s5515_s3 + $0x20] sm:$0xff]  ;;  %v2656_v17 = vsel %vm1585_vm4, %v2648_v19, %v4719_v58 }
 0x2f3   :  { %v2189_v57 = vpop.permute.xlu1 %2188  ;;  %v3269_v0 = vpop.eup %3268  ;;  %v2668_v15 = vadd.f32 %v4896_v54, %v2655_v61 }
 0x2f4   :  { %v2225_v55 = vsel %vm1585_vm4, %v2217_v4, %v2189_v57  ;;  %v2092_v50 = vmul.f32 %v3269_v0, %v1927_v16  ;;  %v1635_v38 = vadd.f32 0.5, %v1627_v37  ;;  %3282 = vtanh.f32 %v2245_v49 }
 0x2f5   :  { %v2238_v28 = vadd.f32 %v4835_v35, %v2225_v55  ;;  %v3271_v7 = vpop.eup %3270  ;;  %v2366_v16 = vsel %vm1576_vm3, %v2358_v42, %v5110_v60  ;;  %v2669_v42 = vadd.f32 %v4896_v54, %v2656_v17 }
 0x2f6   :  { %2108 = vst [vmem:[%s5517_s4 + $0x30] sm:$0xff] %v2092_v50  ;;  %v2066_v26 = vmul.f32 %v3267_v32, %v1635_v38  ;;  %v1776_v27 = vmul.f32 0.5, %v3271_v7  ;;  %v2336_v33 = vpop.permute.xlu0 %2335  ;;  %v3273_v1 = vpop.eup %3272  ;;  %v5753_v38 = vld [vmem:[#allocation98_spill] sm:$0xff] }
 0x2f7   :  { %v2246_v20 = vmul.f32 0.5, %v2238_v28  ;;  %v5213_v36 = vpop.permute.xlu1 %2317  ;;  %v2373_v43 = vsel %vm1585_vm4, %v2365_v6, %v2336_v33  ;;  %v1628_v22 = vmul.f32 0.5, %v3273_v1  ;;  %v5754_v28 = vld [vmem:[#allocation26_spill] sm:$0xff] }
 0x2f8   :  { %v3275_v23 = vpop.eup %3274  ;;  %v1784_v47 = vadd.f32 0.5, %v1776_v27  ;;  %v2386_v56 = vadd.f32 %v4861_v21, %v2373_v43  ;;  %v2206_v7 = vsel %vm1567_vm2, %v5754_v28, %v5753_v38  ;;  %v5756_v27 = vld [vmem:[#allocation27_spill] sm:$0xff]  ;;  %v2666_v43 = vadd.f32 %v4896_v54, %v4956_v5 }
 0x2f9   :  { %v2093_v32 = vmul.f32 %v3275_v23, %v1928_v24  ;;  %v3277_v12 = vpop.eup %3276  ;;  %v1636_v37 = vadd.f32 0.5, %v1628_v22  ;;  %3284 = vtanh.f32 %v2246_v20  ;;  %v2214_v58 = vsel %vm1576_vm3, %v2206_v7, %v4917_v53  ;;  %v5755_v53 = vld [vmem:[#allocation100_spill] sm:$0xff] }
 0x2fa   :  { %v2058_v4 = vmul.f32 %v2050_v3, %v1784_v47  ;;  %v2394_v49 = vmul.f32 0.5, %v2386_v56  ;;  %v5226_v57 = vpop.permute.xlu0 %2621  ;;  %v3279_v10 = vpop.eup %3278  ;;  %3286 = vtanh.f32 %v1902_v52  ;;  %v2207_v20 = vsel %vm1567_vm2, %v5756_v27, %v5755_v53 }
 0x2fb   :  { %v2338_v0 = vpop.permute.xlu1 %2337  ;;  %2109 = vst [vmem:[%s5517_s4 + $0x38] sm:$0xff] %v2093_v32  ;;  %v2067_v55 = vmul.f32 %v3277_v12, %v1636_v37  ;;  %v1777_v50 = vmul.f32 0.5, %v3279_v10  ;;  %v2215_v1 = vsel %vm1576_vm3, %v2207_v20, %v4931_v46 }
 0x2fc   :  { %v2374_v60 = vsel %vm1585_vm4, %v2366_v16, %v2338_v0  ;;  %v2074_v9 = vadd.f32 %v2066_v26, %v2058_v4  ;;  %3288 = vtanh.f32 %v2394_v49  ;;  %v3281_v26 = vpop.eup %3280  ;;  %v5757_v49 = vld [vmem:[#allocation103_spill] sm:$0xff]  ;;  %v5758_v0 = vld [vmem:[#allocation28_spill] sm:$0xff] }
 0x2fd   :  { %v2387_v14 = vadd.f32 %v4861_v21, %v2374_v60  ;;  %v1785_v44 = vadd.f32 0.5, %v1777_v50  ;;  %v1917_v22 = vmul.f32 0.5, %v3281_v26  ;;  %v2212_v10 = vsel %vm1567_vm2, %v5758_v0, %v5757_v49 }
 0x2fe   :  { %3290 = vtanh.f32 %v2074_v9  ;;  %2098 = vst [vmem:[%s5516_s5 + $0x20] sm:$0xff] %v2074_v9  ;;  %v2183_v25 = vpop.permute.xlu0 %2182  ;;  %v2667_v60 = vadd.f32 %v4896_v54, %v4978_v39 }
 0x2ff   :  { %v5247_v59 = vpop.permute.xlu1 %2623  ;;  %v2395_v30 = vmul.f32 0.5, %v2387_v14  ;;  %v2222_v8 = vsel %vm1585_vm4, %v2214_v58, %v2183_v25  ;;  %3292 = vtanh.f32 %v2668_v15  ;;  %v2059_v63 = vmul.f32 %v2051_v11, %v1785_v44  ;;  %v2684_v44 = vld [vmem:[%s5515_s3 + $0x50] sm:$0xff] }
 0x300   :  { %v2235_v6 = vadd.f32 %v4835_v35, %v2222_v8  ;;  %v1925_v9 = vadd.f32 0.5, %v1917_v22 }
 0x301   :  { %3294 = vtanh.f32 %v2395_v30  ;;  %v3283_v33 = vpop.eup %3282  ;;  %v2075_v24 = vadd.f32 %v2067_v55, %v2059_v63  ;;  %v5759_v63 = vld [vmem:[#allocation105_spill] sm:$0xff] }
 0x302   :  { %v2243_v61 = vmul.f32 0.5, %v2235_v6  ;;  %v2332_v3 = vpop.permute.xlu0 %2331  ;;  %3296 = vtanh.f32 %v2669_v42  ;;  %v2261_v56 = vmul.f32 0.5, %v3283_v33  ;;  %v5760_v6 = vld [vmem:[#allocation29_spill] sm:$0xff] }
 0x303   :  { %v2185_v52 = vpop.permute.xlu1 %2184  ;;  %v2371_v23 = vsel %vm1585_vm4, %v4936_v48, %v2332_v3  ;;  %3298 = vtanh.f32 %v2075_v24  ;;  %2099 = vst [vmem:[%s5516_s5 + $0x28] sm:$0xff] %v2075_v24  ;;  %v2213_v26 = vsel %vm1567_vm2, %v5760_v6, %v5759_v63  ;;  %v5771_v6 = vld [vmem:[#allocation4_spill] sm:$0xff] }
 0x304   :  { %v2223_v19 = vsel %vm1585_vm4, %v2215_v1, %v2185_v52  ;;  %v2384_v46 = vadd.f32 %v4861_v21, %v2371_v23  ;;  %3300 = vtanh.f32 %v2243_v61  ;;  %v2269_v55 = vadd.f32 0.5, %v2261_v56  ;;  %v5761_v56 = vld [vmem:[#allocation64_spill] sm:$0xff] }
 0x305   :  { %v2236_v47 = vadd.f32 %v4835_v35, %v2223_v19  ;;  %3302 = vtanh.f32 %v2666_v43 }
 0x306   :  { %v2392_v32 = vmul.f32 0.5, %v2384_v46  ;;  %v2163_v16 = vpop.permute.xlu0 %2162  ;;  %v3285_v12 = vpop.eup %3284 }
 0x307   :  { %v2334_v5 = vpop.permute.xlu1 %2333  ;;  %v2244_v48 = vmul.f32 0.5, %v2236_v47  ;;  %v3287_v37 = vpop.eup %3286  ;;  %v2262_v50 = vmul.f32 0.5, %v3285_v12  ;;  %v2685_v47 = vld [vmem:[%s5515_s3 + $0x58] sm:$0xff] }
 0x308   :  { %v2372_v4 = vsel %vm1585_vm4, %v4952_v31, %v2334_v5  ;;  %3304 = vtanh.f32 %v2392_v32  ;;  %v2220_v31 = vsel %vm1576_vm3, %v2212_v10, %v2163_v16  ;;  %v1918_v58 = vmul.f32 0.5, %v3287_v37 }
 0x309   :  { %v2385_v15 = vadd.f32 %v4861_v21, %v2372_v4  ;;  %v3289_v17 = vpop.eup %3288  ;;  %3306 = vtanh.f32 %v2244_v48  ;;  %v2270_v20 = vadd.f32 0.5, %v2262_v50  ;;  %v2361_v32 = vsel %vm1567_vm2, %v5761_v56, %v4323_v34 }
 0x30a   :  { %v2410_v38 = vmul.f32 0.5, %v3289_v17  ;;  %v2195_v7 = vpop.permute.xlu0 %2194  ;;  %v1926_v19 = vadd.f32 0.5, %v1918_v58  ;;  %v5768_v58 = vld [vmem:[#allocation30_spill] sm:$0xff] }
 0x30b   :  { %v2393_v28 = vmul.f32 0.5, %v2385_v15  ;;  %v2165_v11 = vpop.permute.xlu1 %2164  ;;  %v3291_v14 = vpop.eup %3290  ;;  %v2228_v25 = vsel %vm1585_vm4, %v2220_v31, %v2195_v7 }
 0x30c   :  { %v2090_v42 = vmul.f32 %v3291_v14, %v1925_v9  ;;  %v2418_v39 = vadd.f32 0.5, %v2410_v38  ;;  %v2241_v30 = vadd.f32 %v4835_v35, %v2228_v25  ;;  %v3293_v8 = vpop.eup %3292  ;;  %v2221_v1 = vsel %vm1576_vm3, %v2213_v26, %v2165_v11  ;;  %v5763_v9 = vld [vmem:[#allocation58_spill] sm:$0xff]  ;;  %v5765_v38 = vld [vmem:[#allocation104_spill] sm:$0xff] }
 0x30d   :  { %3308 = vtanh.f32 %v2393_v28  ;;  %v2700_v27 = vmul.f32 %v3293_v8, %v2269_v55  ;;  %v5764_v55 = vld [vmem:[#allocation70_spill] sm:$0xff]  ;;  %v5770_v8 = vld [vmem:[#allocation69_spill] sm:$0xff]  ;;  %v5772_v26 = vld [vmem:[#allocation72_spill] sm:$0xff] }
 0x30e   :  { %3310 = vtanh.f32 %v2667_v60  ;;  %v3295_v53 = vpop.eup %3294  ;;  %2106 = vst [vmem:[%s5517_s4 + $0x20] sm:$0xff] %v2090_v42  ;;  %v2692_v33 = vmul.f32 %v2684_v44, %v2418_v39  ;;  %v2320_v24 = vpop.permute.xlu0 %2319  ;;  %v2249_v52 = vmul.f32 0.5, %v2241_v30  ;;  %v2359_v50 = vsel %vm1567_vm2, %v5764_v55, %v5763_v9  ;;  %v5766_v28 = vld [vmem:[#allocation66_spill] sm:$0xff]  ;;  %v5769_v30 = vld [vmem:[#allocation107_spill] sm:$0xff] }
 0x30f   :  { %v2197_v61 = vpop.permute.xlu1 %2196  ;;  %v2411_v3 = vmul.f32 0.5, %v3295_v53  ;;  %v3297_v23 = vpop.eup %3296  ;;  %v2369_v37 = vsel %vm1576_vm3, %v2361_v32, %v2320_v24  ;;  %v2643_v31 = vsel %vm1567_vm2, %v5766_v28, %v5765_v38  ;;  %v5767_v14 = vld [vmem:[#allocation106_spill] sm:$0xff]  ;;  %v2644_v63 = vsel %vm1567_vm2, %v5770_v8, %v5769_v30  ;;  %v5774_v9 = vld [vmem:[#allocation31_spill] sm:$0xff]  ;;  %v5775_v38 = vld [vmem:[#allocation109_spill] sm:$0xff] }
 0x310   :  { %v2229_v43 = vsel %vm1585_vm4, %v2221_v1, %v2197_v61  ;;  %v5289_v46 = vadd.f32 %v2700_v27, %v2692_v33  ;;  %v3299_v22 = vpop.eup %3298  ;;  %v2701_v4 = vmul.f32 %v3297_v23, %v2270_v20  ;;  %3312 = vtanh.f32 %v2249_v52  ;;  %v2682_v24 = vld [vmem:[%s5515_s3 + $0x40] sm:$0xff]  ;;  %v5776_v28 = vld [vmem:[#allocation75_spill] sm:$0xff] }
 0x311   :  { %v2419_v5 = vadd.f32 0.5, %v2411_v3  ;;  %v2242_v16 = vadd.f32 %v4835_v35, %v2229_v43  ;;  %v3301_v12 = vpop.eup %3300  ;;  %v2091_v48 = vmul.f32 %v3299_v22, %v1926_v19  ;;  %v5762_v35 = vld [vmem:[#allocation67_spill] sm:$0xff]  ;;  %v2210_v44 = vsel %vm1567_vm2, %v5768_v58, %v5767_v14  ;;  %v3368_v32 = vld [vmem:[%s5514_s2 + $0x1] ss:$0 sm:$0xff] }
 0x312   :  { %2732 = vst [vmem:[%s5516_s5 + $0x50] sm:$0xff] %v5289_v46  ;;  %v2344_v49 = vpop.permute.xlu0 %2343  ;;  %v2259_v15 = vmul.f32 0.5, %v3301_v12  ;;  %v3303_v17 = vpop.eup %3302  ;;  %v2362_v60 = vsel %vm1567_vm2, %v5762_v35, %v4339_v41  ;;  %v2641_v53 = vsel %vm1567_vm2, %v5772_v26, %v5771_v6  ;;  %v2218_v12 = vsel %vm1576_vm3, %v2210_v44, %v5160_v51  ;;  %v3369_v51 = vld [vmem:[%s5514_s2] ss:$0 sm:$0xff]  ;;  %v5777_v26 = vld [vmem:[#allocation60_spill] sm:$0xff] }
 0x313   :  { %v2322_v0 = vpop.permute.xlu1 %2321  ;;  %v2693_v10 = vmul.f32 %v2685_v47, %v2419_v5  ;;  %v2377_v34 = vsel %vm1585_vm4, %v2369_v37, %v2344_v49  ;;  %2107 = vst [vmem:[%s5517_s4 + $0x28] sm:$0xff] %v2091_v48  ;;  %v2250_v42 = vmul.f32 0.5, %v2242_v16  ;;  %v2649_v48 = vsel %vm1576_vm3, %v2641_v53, %v5226_v57  ;;  %v5778_v53 = vld [vmem:[#allocation73_spill] sm:$0xff] }
 0x314   :  { %v2390_v7 = vadd.f32 %v4861_v21, %v2377_v34  ;;  %v2267_v25 = vadd.f32 0.5, %v2259_v15  ;;  %v2370_v3 = vsel %vm1576_vm3, %v2362_v60, %v2322_v0  ;;  %v5773_v60 = vld [vmem:[#allocation108_spill] sm:$0xff]  ;;  %v2367_v14 = vsel %vm1576_vm3, %v2359_v50, %v5192_v62 }
 0x315   :  { %v3305_v11 = vpop.eup %3304  ;;  %v5320_v41 = vadd.f32 %v2701_v4, %v2693_v10  ;;  %v2211_v55 = vsel %vm1567_vm2, %v5774_v9, %v5773_v60  ;;  %v2688_v9 = vld [vmem:[%s5515_s3 + $0x70] sm:$0xff] }
 0x316   :  { %v3307_v39 = vpop.eup %3306  ;;  %v2408_v27 = vmul.f32 0.5, %v3305_v11  ;;  %v2398_v21 = vmul.f32 0.5, %v2390_v7  ;;  %v2626_v20 = vpop.permute.xlu0 %2625  ;;  %v2698_v1 = vmul.f32 %v3303_v17, %v2267_v25  ;;  %v2219_v11 = vsel %vm1576_vm3, %v2211_v55, %v5174_v18 }
 0x317   :  { %v2346_v33 = vpop.permute.xlu1 %2345  ;;  %2733 = vst [vmem:[%s5516_s5 + $0x58] sm:$0xff] %v5320_v41  ;;  %v2260_v61 = vmul.f32 0.5, %v3307_v39  ;;  %v2651_v52 = vsel %vm1576_vm3, %v2643_v31, %v2626_v20  ;;  %v2642_v31 = vsel %vm1567_vm2, %v5776_v28, %v5775_v38  ;;  %v2657_v39 = vsel %vm1585_vm4, %v2649_v48, %v4850_v40  ;;  %v5780_v20 = vld [vmem:[#allocation61_spill] sm:$0xff] }
 0x318   :  { %v2416_v43 = vadd.f32 0.5, %v2408_v27  ;;  %3314 = vtanh.f32 %v2398_v21  ;;  %v2659_v23 = vsel %vm1585_vm4, %v2651_v52, %v4794_v45  ;;  %v2378_v19 = vsel %vm1585_vm4, %v2370_v3, %v2346_v33  ;;  %v5779_v21 = vld [vmem:[#allocation101_spill] sm:$0xff] }
 0x319   :  { %v2268_v22 = vadd.f32 0.5, %v2260_v61  ;;  %3316 = vtanh.f32 %v2250_v42  ;;  %v2672_v56 = vadd.f32 %v4896_v54, %v2659_v23  ;;  %v2391_v5 = vadd.f32 %v3368_v32, %v2378_v19  ;;  %v2683_v54 = vld [vmem:[%s5515_s3 + $0x48] sm:$0xff] }
 0x31a   :  { %v3309_v47 = vpop.eup %3308  ;;  %v2690_v45 = vmul.f32 %v2682_v24, %v2416_v43  ;;  %v2191_v37 = vpop.permute.xlu0 %2190  ;;  %v2650_v8 = vsel %vm1576_vm3, %v2642_v31, %v5247_v59  ;;  %v2360_v40 = vsel %vm1567_vm2, %v5778_v53, %v5777_v26  ;;  %v2496_v33 = vsel %vm1567_vm2, %v5780_v20, %v5779_v21  ;;  %v5421_v31 = vld [vmem:[%s5514_s2 + $0x2] ss:$0 sm:$0xff]  ;;  %v2689_v20 = vld [vmem:[%s5515_s3 + $0x78] sm:$0xff] }
 0x31b   :  { %v3311_v16 = vpop.eup %3310  ;;  %v2409_v4 = vmul.f32 0.5, %v3309_v47  ;;  %v2628_v49 = vpop.permute.xlu1 %2627  ;;  %3318 = vtanh.f32 %v2672_v56  ;;  %v2399_v10 = vmul.f32 0.5, %v2391_v5  ;;  %v2226_v15 = vsel %vm1585_vm4, %v2218_v12, %v2191_v37  ;;  %v5782_v56 = vld [vmem:[#allocation56_spill] sm:$0xff]  ;;  %v5784_v12 = vld [vmem:[#allocation59_spill] sm:$0xff]  ;;  %v5786_v37 = vld [vmem:[#allocation102_spill] sm:$0xff] }
 0x31c   :  { %v2699_v0 = vmul.f32 %v3311_v16, %v2268_v22  ;;  %v5352_v34 = vadd.f32 %v2698_v1, %v2690_v45  ;;  %v2239_v57 = vadd.f32 %v3369_v51, %v2226_v15  ;;  %v2652_v35 = vsel %vm1576_vm3, %v2644_v63, %v2628_v49  ;;  %v5783_v16 = vld [vmem:[#allocation99_spill] sm:$0xff]  ;;  %v5785_v45 = vld [vmem:[#allocation88_spill] sm:$0xff] }
 0x31d   :  { %v2417_v17 = vadd.f32 0.5, %v2409_v4  ;;  %3320 = vtanh.f32 %v2399_v10  ;;  %v2660_v7 = vsel %vm1585_vm4, %v2652_v35, %v4811_v13  ;;  %v3370_v13 = vld [vmem:[%s5514_s2 + $0x3] ss:$0 sm:$0xff]  ;;  %v3313_v50 = vpop.eup %3312  ;;  %v2368_v1 = vsel %vm1576_vm3, %v2360_v40, %v5213_v36  ;;  %v5781_v36 = vld [vmem:[#allocation96_spill] sm:$0xff]  ;;  %v5787_v49 = vld [vmem:[#allocation63_spill] sm:$0xff] }
 0x31e   :  { %2730 = vst [vmem:[%s5516_s5 + $0x40] sm:$0xff] %v5352_v34  ;;  %v2247_v44 = vmul.f32 0.5, %v2239_v57  ;;  %v2340_v25 = vpop.permute.xlu0 %2339  ;;  %v2673_v18 = vadd.f32 %v3370_v13, %v2660_v7  ;;  %v2670_v24 = vadd.f32 %v3370_v13, %v2657_v39  ;;  %v2658_v52 = vsel %vm1585_vm4, %v2650_v8, %v4881_v29  ;;  %v5789_v57 = vld [vmem:[#allocation74_spill] sm:$0xff] }
 0x31f   :  { %v2691_v58 = vmul.f32 %v2683_v54, %v2417_v17  ;;  %v2193_v42 = vpop.permute.xlu1 %2192  ;;  %v2375_v30 = vsel %vm1585_vm4, %v2367_v14, %v2340_v25  ;;  %v2265_v43 = vmul.f32 0.5, %v3313_v50  ;;  %v2498_v5 = vsel %vm1567_vm2, %v5782_v56, %v5781_v36  ;;  %v5791_v25 = vld [vmem:[#allocation91_spill] sm:$0xff]  ;;  %v5792_v39 = vld [vmem:[#allocation34_spill] sm:$0xff] }
 0x320   :  { %v2227_v62 = vsel %vm1585_vm4, %v2219_v11, %v2193_v42  ;;  %3322 = vtanh.f32 %v2247_v44  ;;  %v2388_v6 = vadd.f32 %v3368_v32, %v2375_v30  ;;  %v2499_v48 = vsel %vm1567_vm2, %v5784_v12, %v5783_v16  ;;  %v5790_v11 = vld [vmem:[#allocation33_spill] sm:$0xff] }
 0x321   :  { %v5383_v63 = vadd.f32 %v2699_v0, %v2691_v58  ;;  %3324 = vtanh.f32 %v2673_v18  ;;  %v2240_v27 = vadd.f32 %v3369_v51, %v2227_v62  ;;  %v2504_v4 = vsel %vm1576_vm3, %v2496_v33, %v5785_v45  ;;  %v5788_v51 = vld [vmem:[#allocation5_spill] sm:$0xff] }
 0x322   :  { %v2396_v59 = vmul.f32 0.5, %v2388_v6  ;;  %v2461_v61 = vpop.permute.xlu0 %2460  ;;  %v2497_v0 = vsel %vm1567_vm2, %v5787_v49, %v5786_v37  ;;  %v2671_v54 = vadd.f32 %v3370_v13, %v2658_v52  ;;  %v2500_v35 = vsel %vm1567_vm2, %v5789_v57, %v5788_v51  ;;  %v5793_v6 = vld [vmem:[#allocation35_spill] sm:$0xff]  ;;  %v5797_v37 = vld [vmem:[#allocation36_spill] sm:$0xff] }
 0x323   :  { %2731 = vst [vmem:[%s5516_s5 + $0x48] sm:$0xff] %v5383_v63  ;;  %v2342_v3 = vpop.permute.xlu1 %2341  ;;  %v2248_v23 = vmul.f32 0.5, %v2240_v27  ;;  %v2273_v60 = vadd.f32 0.5, %v2265_v43  ;;  %v2506_v14 = vsel %vm1576_vm3, %v2498_v5, %v5790_v11  ;;  %v2505_v42 = vsel %vm1576_vm3, %v2497_v0, %v5791_v25  ;;  %v5799_v57 = vld [vmem:[#allocation71_spill] sm:$0xff] }
 0x324   :  { %v2376_v19 = vsel %vm1585_vm4, %v2368_v1, %v2342_v3  ;;  %3326 = vtanh.f32 %v2396_v59  ;;  %v2507_v13 = vsel %vm1576_vm3, %v2499_v48, %v5792_v39  ;;  %v2508_v26 = vsel %vm1576_vm3, %v2500_v35, %v5793_v6  ;;  %v5794_v59 = vld [vmem:[#allocation110_spill] sm:$0xff]  ;;  %v5795_v3 = vld [vmem:[#allocation77_spill] sm:$0xff] }
 0x325   :  { %v2389_v47 = vadd.f32 %v3368_v32, %v2376_v19  ;;  %v3315_v22 = vpop.eup %3314  ;;  %3328 = vtanh.f32 %v2248_v23 }
 0x326   :  { %v3317_v29 = vpop.eup %3316  ;;  %v2414_v32 = vmul.f32 0.5, %v3315_v22  ;;  %v2473_v15 = vpop.permute.xlu0 %2472  ;;  %3330 = vtanh.f32 %v2670_v24 }
 0x327   :  { %v2397_v10 = vmul.f32 0.5, %v2389_v47  ;;  %v2463_v17 = vpop.permute.xlu1 %2462  ;;  %v2512_v55 = vsel %vm1585_vm4, %v2504_v4, %v2473_v15  ;;  %v2266_v58 = vmul.f32 0.5, %v3317_v29  ;;  %v5796_v47 = vld [vmem:[#allocation68_spill] sm:$0xff] }
 0x328   :  { %v3319_v38 = vpop.eup %3318  ;;  %v2422_v28 = vadd.f32 0.5, %v2414_v32  ;;  %v2525_v7 = vadd.f32 %v5421_v31, %v2512_v55  ;;  %v2502_v22 = vsel %vm1567_vm2, %v5796_v47, %v2461_v61  ;;  %v5798_v32 = vld [vmem:[#allocation39_spill] sm:$0xff]  ;;  %v2503_v35 = vsel %vm1567_vm2, %v5799_v57, %v2463_v17 }
 0x329   :  { %3332 = vtanh.f32 %v2397_v10  ;;  %v2704_v44 = vmul.f32 %v3319_v38, %v2273_v60  ;;  %v2274_v52 = vadd.f32 0.5, %v2266_v58  ;;  %v2510_v10 = vsel %vm1576_vm3, %v2502_v22, %v5798_v32 }
 0x32a   :  { %v3321_v18 = vpop.eup %3320  ;;  %3334 = vtanh.f32 %v2671_v54  ;;  %v2696_v30 = vmul.f32 %v2688_v9, %v2422_v28  ;;  %v2533_v62 = vmul.f32 0.5, %v2525_v7  ;;  %v2477_v50 = vpop.permute.xlu0 %2476  ;;  %v2686_v28 = vld [vmem:[%s5515_s3 + $0x60] sm:$0xff] }
 0x32b   :  { %v2475_v8 = vpop.permute.xlu1 %2474  ;;  %3336 = vtanh.f32 %v5289_v46  ;;  %v2415_v53 = vmul.f32 0.5, %v3321_v18  ;;  %v2514_v40 = vsel %vm1585_vm4, %v2506_v14, %v2477_v50  ;;  %v2501_v46 = vsel %vm1567_vm2, %v5795_v3, %v5794_v59 }
 0x32c   :  { %v2513_v27 = vsel %vm1585_vm4, %v2505_v42, %v2475_v8  ;;  %v5435_v21 = vadd.f32 %v2704_v44, %v2696_v30  ;;  %3338 = vtanh.f32 %v2533_v62  ;;  %v2527_v33 = vadd.f32 %v5421_v31, %v2514_v40 }
 0x32d   :  { %v2526_v1 = vadd.f32 %v5421_v31, %v2513_v27  ;;  %v3323_v24 = vpop.eup %3322  ;;  %3340 = vtanh.f32 %v5352_v34  ;;  %v2423_v43 = vadd.f32 0.5, %v2415_v53  ;;  %v2509_v49 = vsel %vm1576_vm3, %v2501_v46, %v5797_v37 }
 0x32e   :  { %v3325_v23 = vpop.eup %3324  ;;  %2736 = vst [vmem:[%s5516_s5 + $0x70] sm:$0xff] %v5435_v21  ;;  %v2263_v19 = vmul.f32 0.5, %v3323_v24  ;;  %v2535_v36 = vmul.f32 0.5, %v2527_v33  ;;  %v2481_v5 = vpop.permute.xlu0 %2480 }
 0x32f   :  { %v2534_v56 = vmul.f32 0.5, %v2526_v1  ;;  %v2479_v16 = vpop.permute.xlu1 %2478  ;;  %v2697_v12 = vmul.f32 %v2689_v20, %v2423_v43  ;;  %v2705_v48 = vmul.f32 %v3325_v23, %v2274_v52  ;;  %v2516_v34 = vsel %vm1585_vm4, %v2508_v26, %v2481_v5  ;;  %v2687_v26 = vld [vmem:[%s5515_s3 + $0x68] sm:$0xff] }
 0x330   :  { %v2515_v45 = vsel %vm1585_vm4, %v2507_v13, %v2479_v16  ;;  %3342 = vtanh.f32 %v2535_v36  ;;  %v2529_v4 = vadd.f32 %v5421_v31, %v2516_v34  ;;  %v2271_v61 = vadd.f32 0.5, %v2263_v19 }
 0x331   :  { %v2528_v29 = vadd.f32 %v5421_v31, %v2515_v45  ;;  %v3327_v0 = vpop.eup %3326  ;;  %v2713_v54 = vadd.f32 %v2705_v48, %v2697_v12  ;;  %3344 = vtanh.f32 %v2534_v56  ;;  %v2511_v13 = vsel %vm1576_vm3, %v2503_v35, %v4215_v2 }
 0x332   :  { %v3329_v15 = vpop.eup %3328  ;;  %v2412_v51 = vmul.f32 0.5, %v3327_v0  ;;  %v2537_v60 = vmul.f32 0.5, %v2529_v4  ;;  %v2485_v55 = vpop.permute.xlu0 %2484  ;;  %3346 = vtanh.f32 %v5383_v63 }
 0x333   :  { %v2536_v9 = vmul.f32 0.5, %v2528_v29  ;;  %v2483_v38 = vpop.permute.xlu1 %2482  ;;  %2737 = vst [vmem:[%s5516_s5 + $0x78] sm:$0xff] %v2713_v54  ;;  %v2264_v7 = vmul.f32 0.5, %v3329_v15  ;;  %v2518_v11 = vsel %vm1585_vm4, %v2510_v10, %v2485_v55  ;;  %v3331_v17 = vpop.eup %3330 }
 0x334   :  { %v2517_v14 = vsel %vm1585_vm4, %v2509_v49, %v2483_v38  ;;  %v2420_v58 = vadd.f32 0.5, %v2412_v51  ;;  %3348 = vtanh.f32 %v2537_v60  ;;  %v2531_v44 = vadd.f32 %v5421_v31, %v2518_v11 }
 0x335   :  { %v2530_v63 = vadd.f32 %v5421_v31, %v2517_v14  ;;  %v2702_v42 = vmul.f32 %v3331_v17, %v2271_v61  ;;  %v2272_v39 = vadd.f32 0.5, %v2264_v7  ;;  %3350 = vtanh.f32 %v2536_v9 }
 0x336   :  { %v3333_v25 = vpop.eup %3332  ;;  %v2694_v18 = vmul.f32 %v2686_v28, %v2420_v58  ;;  %v2539_v62 = vmul.f32 0.5, %v2531_v44  ;;  %3352 = vtanh.f32 %v5320_v41 }
 0x337   :  { %v2413_v30 = vmul.f32 0.5, %v3333_v25  ;;  %v2538_v50 = vmul.f32 0.5, %v2530_v63  ;;  %v2487_v8 = vpop.permute.xlu1 %2486  ;;  %v3335_v6 = vpop.eup %3334 }
 0x338   :  { %v2519_v53 = vsel %vm1585_vm4, %v2511_v13, %v2487_v8  ;;  %v3337_v40 = vpop.eup %3336  ;;  %v2710_v27 = vadd.f32 %v2702_v42, %v2694_v18  ;;  %3354 = vtanh.f32 %v2539_v62  ;;  %v2703_v1 = vmul.f32 %v3335_v6, %v2272_v39 }
 0x339   :  { %v2421_v20 = vadd.f32 0.5, %v2413_v30  ;;  %v2532_v2 = vadd.f32 %v5421_v31, %v2519_v53  ;;  %v3339_v33 = vpop.eup %3338  ;;  %3356 = vtanh.f32 %v2538_v50 }
 0x33a   :  { %v3341_v24 = vpop.eup %3340  ;;  %3358 = vtanh.f32 %v2710_v27  ;;  %2734 = vst [vmem:[%s5516_s5 + $0x60] sm:$0xff] %v2710_v27  ;;  %v2549_v59 = vmul.f32 0.5, %v3339_v33 }
 0x33b   :  { %v2695_v41 = vmul.f32 %v2687_v26, %v2421_v20  ;;  %v2540_v3 = vmul.f32 0.5, %v2532_v2  ;;  %3360 = vtanh.f32 %v5435_v21 }
 0x33c   :  { %v2557_v52 = vadd.f32 0.5, %v2549_v59 }
 0x33d   :  { %v2711_v46 = vadd.f32 %v2703_v1, %v2695_v41  ;;  %3362 = vtanh.f32 %v2540_v3  ;;  %v3343_v43 = vpop.eup %3342 }
 0x33e   :  { %v3345_v23 = vpop.eup %3344  ;;  %v2722_v31 = vmul.f32 %v3341_v24, %v2557_v52  ;;  %v2551_v19 = vmul.f32 0.5, %v3343_v43 }
 0x33f   :  { %3364 = vtanh.f32 %v2711_v46  ;;  %2735 = vst [vmem:[%s5516_s5 + $0x68] sm:$0xff] %v2711_v46  ;;  %v2550_v47 = vmul.f32 0.5, %v3345_v23  ;;  %v3347_v22 = vpop.eup %3346 }
 0x340   :  { %3366 = vtanh.f32 %v2713_v54  ;;  %2738 = vst [vmem:[%s5517_s4 + $0x40] sm:$0xff] %v2722_v31  ;;  %v2559_v21 = vadd.f32 0.5, %v2551_v19 }
 0x341   :  { %v3349_v36 = vpop.eup %3348  ;;  %v2558_v56 = vadd.f32 0.5, %v2550_v47 }
 0x342   :  { %v3351_v5 = vpop.eup %3350  ;;  %v2724_v16 = vmul.f32 %v3337_v40, %v2559_v21  ;;  %v2553_v12 = vmul.f32 0.5, %v3349_v36 }
 0x343   :  { %v2723_v48 = vmul.f32 %v3347_v22, %v2558_v56  ;;  %v2552_v34 = vmul.f32 0.5, %v3351_v5  ;;  %v3353_v45 = vpop.eup %3352 }
 0x344   :  { %2740 = vst [vmem:[%s5517_s4 + $0x50] sm:$0xff] %v2724_v16  ;;  %v2561_v49 = vadd.f32 0.5, %v2553_v12 }
 0x345   :  { %v3355_v4 = vpop.eup %3354  ;;  %2739 = vst [vmem:[%s5517_s4 + $0x48] sm:$0xff] %v2723_v48  ;;  %v2560_v29 = vadd.f32 0.5, %v2552_v34 }
 0x346   :  { %v3357_v37 = vpop.eup %3356  ;;  %v2555_v0 = vmul.f32 0.5, %v3355_v4 }
 0x347   :  { %v3359_v61 = vpop.eup %3358  ;;  %v2725_v54 = vmul.f32 %v3353_v45, %v2560_v29  ;;  %v2554_v32 = vmul.f32 0.5, %v3357_v37 }
 0x348   :  { %v3361_v10 = vpop.eup %3360  ;;  %v2726_v15 = vmul.f32 %v3359_v61, %v2561_v49  ;;  %v2563_v51 = vadd.f32 0.5, %v2555_v0 }
 0x349   :  { %2741 = vst [vmem:[%s5517_s4 + $0x58] sm:$0xff] %v2725_v54  ;;  %v2562_v60 = vadd.f32 0.5, %v2554_v32 }
 0x34a   :  { %v3363_v57 = vpop.eup %3362  ;;  %2742 = vst [vmem:[%s5517_s4 + $0x60] sm:$0xff] %v2726_v15  ;;  %v2728_v35 = vmul.f32 %v3361_v10, %v2563_v51 }
 0x34b   :  { %v2556_v9 = vmul.f32 0.5, %v3363_v57 }
 0x34c   :  { %v3365_v55 = vpop.eup %3364  ;;  %2744 = vst [vmem:[%s5517_s4 + $0x70] sm:$0xff] %v2728_v35 }
 0x34d   :  { %v2727_v38 = vmul.f32 %v3365_v55, %v2562_v60  ;;  %v2564_v28 = vadd.f32 0.5, %v2556_v9  ;;  %v3367_v7 = vpop.eup %3366 }
 0x34f   :  { %2743 = vst [vmem:[%s5517_s4 + $0x68] sm:$0xff] %v2727_v38  ;;  %v2729_v11 = vmul.f32 %v3367_v7, %v2564_v28 }
 0x351   :  { %2745 = vst [vmem:[%s5517_s4 + $0x78] sm:$0xff] %v2729_v11 }

</bundles_post_ra>
